<compile_context>
chip_gen: v7x
topology: tpu7x:2x2x1
jax: 0.10.0
libtpu: 0.0.40
codegen_flags: <defaults>
</compile_context>

<pallas_src>
import functools

import jax
import jax.numpy as jnp
from jax.experimental import pallas as pl
from jax.experimental.pallas import tpu as pltpu

_VMEM = pltpu.MemorySpace.VMEM
_SMEM = pltpu.MemorySpace.SMEM
_LANE = 128  # TPU lane width


def _round_up(x, m):
    return ((x + m - 1) // m) * m


# ---------------------------------------------------------------------------
# Fused K-packed conv4x4 + BatchNorm(train) + LeakyReLU(0.2) kernel
# ---------------------------------------------------------------------------
def _conv_bn_lrelu_kernel(lhs_ref, w_ref, b_ref, o_ref, *,
                          apply_norm, apply_act, has_bias, inv_count):
    """One grid step = one stream.

      lhs_ref: (m_pad, k_pad) bf16   K-packed im2col rows (taps along lanes)
      w_ref:   (k_pad, 128)   bf16   K-packed weights (tap-major, ch-minor)
      b_ref:   (1, 128)       f32    bias (only used on non-norm layers)
      o_ref:   (m_pad, 128)   bf16   lane-dense output tile
    """
    # Single MXU matmul over the whole packed contraction depth; Mosaic tiles
    # K internally (fills the 256-deep MXU on v6e/v7x, 128 on v5e).
    y = jnp.dot(lhs_ref[...], w_ref[...], preferred_element_type=jnp.float32)
    if has_bias:
        y = y + b_ref[...]
    if apply_norm:
        # Training-mode BatchNorm2d (gamma=1, beta=0, biased variance) with
        # single-pass statistics.  Zero-padded rows contribute zero to both
        # sums (norm layers have no bias), so no validity mask is needed; we
        # divide by the true element count (inv_count = 1/(N*Ho*Wo)).
        mu = jnp.sum(y, axis=0, keepdims=True) * inv_count
        ex2 = jnp.sum(y * y, axis=0, keepdims=True) * inv_count
        var = jnp.maximum(ex2 - mu * mu, 0.0)
        y = (y - mu) * jax.lax.rsqrt(var + 1e-5)
    if apply_act:
        y = jnp.maximum(y, 0.2 * y)          # LeakyReLU(0.2)
    o_ref[...] = y.astype(o_ref.dtype)


# ---------------------------------------------------------------------------
# Loss / elementwise kernels (logits arrive lane-major: shape (1, M_pad))
# ---------------------------------------------------------------------------
def _hinge_kernel(lr_ref, lf_ref, o_ref, *, n_valid):
    lr = lr_ref[...]
    lf = lf_ref[...]
    lane = jax.lax.broadcasted_iota(jnp.int32, lr.shape, 1)
    mask = lane < n_valid
    inv = 1.0 / n_valid
    loss_real = jnp.sum(jnp.where(mask, jnp.maximum(1.0 - lr, 0.0), 0.0)) * inv
    loss_fake = jnp.sum(jnp.where(mask, jnp.maximum(1.0 + lf, 0.0), 0.0)) * inv
    o_ref[0, 0] = 0.5 * (loss_real + loss_fake)


def _vanilla_kernel(lr_ref, lf_ref, o_ref, *, n_valid):
    lr = lr_ref[...]
    lf = lf_ref[...]
    lane = jax.lax.broadcasted_iota(jnp.int32, lr.shape, 1)
    mask = lane < n_valid
    inv = 1.0 / n_valid

    def softplus(x):  # numerically stable
        return jnp.maximum(x, 0.0) + jnp.log1p(jnp.exp(-jnp.abs(x)))

    lr_term = jnp.sum(jnp.where(mask, softplus(-lr), 0.0)) * inv
    lf_term = jnp.sum(jnp.where(mask, softplus(lf), 0.0)) * inv
    o_ref[0, 0] = 0.5 * (lr_term + lf_term)


def _neg_mean_kernel(lf_ref, o_ref, *, n_valid):
    lf = lf_ref[...]
    lane = jax.lax.broadcasted_iota(jnp.int32, lf.shape, 1)
    mask = lane < n_valid
    o_ref[0, 0] = -jnp.sum(jnp.where(mask, lf, 0.0)) / n_valid


def _abs_diff_kernel(a_ref, b_ref, o_ref):
    o_ref[...] = jnp.abs(a_ref[...] - b_ref[...])


def _scalar_loss_call(kernel, *arrays):
    out = pl.pallas_call(
        kernel,
        out_shape=jax.ShapeDtypeStruct((1, 1), jnp.float32),
        in_specs=[pl.BlockSpec(memory_space=_VMEM)] * len(arrays),
        out_specs=pl.BlockSpec(memory_space=_SMEM),
    )(*arrays)
    return out[0, 0]


def _rec_loss_pallas(real, fake):
    """|real - fake| elementwise map (standalone; not used by the loss path
    because d_weight is fixed at 1.0 — see TODO in AdvLossPallas)."""
    shape = real.shape
    total = int(real.size)
    lane = 512
    if total % lane == 0:
        rows = total // lane
        blk = next((b for b in (512, 256, 128, 64, 32, 16, 8) if rows % b == 0),
                   None)
        if blk is not None:
            a2 = real.reshape(rows, lane)
            b2 = fake.reshape(rows, lane)
            rec = pl.pallas_call(
                _abs_diff_kernel,
                out_shape=jax.ShapeDtypeStruct((rows, lane), real.dtype),
                grid=(rows // blk,),
                in_specs=[pl.BlockSpec((blk, lane), lambda i: (i, 0))] * 2,
                out_specs=pl.BlockSpec((blk, lane), lambda i: (i, 0)),
                compiler_params=pltpu.CompilerParams(
                    dimension_semantics=("parallel",)),
            )(a2, b2)
            return rec.reshape(shape)
    # Fallback for awkward sizes: single untiled block.
    flat_r = real.reshape(1, total)
    flat_f = fake.reshape(1, total)
    rec = pl.pallas_call(
        _abs_diff_kernel,
        out_shape=jax.ShapeDtypeStruct((1, total), real.dtype),
        in_specs=[pl.BlockSpec(memory_space=_VMEM)] * 2,
        out_specs=pl.BlockSpec(memory_space=_VMEM),
    )(flat_r, flat_f)
    return rec.reshape(shape)


# ---------------------------------------------------------------------------
# Conv layer wrapper (thin XLA glue: pad + K-packed grouped-im2col + reshape)
# ---------------------------------------------------------------------------
def conv4x4_pallas(xs, layer):
    """One 4x4 / pad-1 conv (stride 1 or 2) + optional BN(train) + LeakyReLU
    over S independent streams, each as a single K-packed MXU matmul."""
    stride, norm, act, cout = layer["stride"], layer["norm"], layer["act"], layer["cout"]
    n, h, w, cin = xs[0].shape
    assert cin == layer["cin"]
    ho = (h + 2 - 4) // stride + 1
    wo = (w + 2 - 4) // stride + 1
    assert ho > 0 and wo > 0, "spatial size too small for this conv"

    m = n * ho * wo
    m_pad = _round_up(m, 16)           # bf16 sublane tile -> unmasked stores
    k = 16 * cin                       # taps packed along the contraction dim
    k_pad = _round_up(k, _LANE)

    lhs_list = []
    for x in xs:
        xp = jnp.pad(x, ((0, 0), (1, 1), (1, 1), (0, 0)))
        # K-packed "grouped im2col": lane index = (di*4 + dj)*Cin + ci.
        cols = [xp[:, di:di + (ho - 1) * stride + 1:stride,
                      dj:dj + (wo - 1) * stride + 1:stride, :]
                for di in range(4) for dj in range(4)]
        lhs = jnp.concatenate(cols, axis=-1).reshape(m, k)
        lhs = jnp.pad(lhs, ((0, m_pad - m), (0, k_pad - k)))
        lhs_list.append(lhs.astype(jnp.bfloat16))
    s_count = len(xs)
    lhs_all = jnp.concatenate(lhs_list, axis=0) if s_count > 1 else lhs_list[0]

    kern = functools.partial(
        _conv_bn_lrelu_kernel,
        apply_norm=norm, apply_act=act,
        has_bias=not norm,             # bias cancelled by BN mean-subtraction
        inv_count=1.0 / float(m))

    # One grid step per stream: weights stay resident (constant block index),
    # per-stream BatchNorm stats fall out naturally, and on v7x the two
    # streams shard across the two TensorCores ("parallel").
    # TODO(synk): production-sized activations need an extra M-tile grid axis
    # with two-pass (sum / sum-sq scratch) BN finalized via pl.when.
    out = pl.pallas_call(
        kern,
        out_shape=jax.ShapeDtypeStruct((s_count * m_pad, _LANE), jnp.bfloat16),
        grid=(s_count,),
        in_specs=[
            pl.BlockSpec((m_pad, k_pad), lambda s: (s, 0)),
            pl.BlockSpec((k_pad, _LANE), lambda s: (0, 0)),
            pl.BlockSpec((1, _LANE), lambda s: (0, 0)),
        ],
        out_specs=pl.BlockSpec((m_pad, _LANE), lambda s: (s, 0)),
        compiler_params=pltpu.CompilerParams(
            dimension_semantics=("parallel",),
            vmem_limit_bytes=32 * 1024 * 1024),
    )(lhs_all, layer["w"], layer["b"])

    # Strip row/lane padding (cheap XLA glue); keep real channel width only.
    return [out[s * m_pad: s * m_pad + m, :cout].reshape(n, ho, wo, cout)
            for s in range(s_count)]


# ---------------------------------------------------------------------------
# Discriminator (PatchGAN NLayerDiscriminator topology)
# ---------------------------------------------------------------------------
def _pack_conv_params(w, b):
    """(Cout,Cin,4,4) f32 -> K-packed (16*Cin padded to mult of 128, 128) bf16
    weight matrix (tap-major, channel-minor rows) + lane-padded f32 bias."""
    cout, cin = w.shape[0], w.shape[1]
    # TODO(synk): Cout > 128 (production ndf=64) needs an output-channel tile.
    assert cout <= _LANE
    k = 16 * cin
    k_pad = _round_up(k, _LANE)
    wt = jnp.transpose(w, (2, 3, 1, 0)).reshape(k, cout)   # rows: (di,dj,ci)
    wt = jnp.pad(wt, ((0, k_pad - k), (0, _LANE - cout)))
    bp = jnp.pad(b, (0, _LANE - cout)).reshape(1, _LANE)
    return wt.astype(jnp.bfloat16), bp.astype(jnp.float32)


def init_discriminator_params(key, input_nc=3, ndf=8, n_layers=4):
    plan = [(input_nc, ndf, 2, False, True)]   # (in_c, out_c, stride, norm, act)
    nf = 1
    for layer_i in range(1, n_layers):
        prev, nf = nf, min(2 ** layer_i, 8)
        plan.append((ndf * prev, ndf * nf, 2, True, True))
    prev, nf = nf, min(2 ** n_layers, 8)
    plan.append((ndf * prev, ndf * nf, 1, True, True))
    plan.append((ndf * nf, 1, 1, False, False))  # 1-channel logit head

    params = []
    for (ic, oc, s, norm, act) in plan:
        key, k1 = jax.random.split(key)
        w = 0.02 * jax.random.normal(k1, (oc, ic, 4, 4), jnp.float32)
        b = jnp.zeros((oc,), jnp.float32)
        wt, bp = _pack_conv_params(w, b)
        params.append(dict(w=wt, b=bp, stride=s, norm=norm, act=act,
                           cin=ic, cout=oc))
    return params


def discriminator_forward(params, xs):
    """xs: list of NHWC activations (real channel width), one per stream."""
    for layer in params:
        xs = conv4x4_pallas(xs, layer)
    return xs  # list of (N, Ho, Wo, 1) logits


def _nchw_to_nhwc(x):
    return jnp.transpose(x, (0, 2, 3, 1))


def _pack_logits(logits):
    """(N,Ho,Wo,1) logits -> lane-major (1, M_pad) f32 + valid count."""
    m = int(logits.size)
    m_pad = _round_up(max(m, 1), _LANE)
    flat = logits.reshape(1, m).astype(jnp.float32)
    return jnp.pad(flat, ((0, 0), (0, m_pad - m))), m


def _gen_loss(params, fake):
    logits_fake = discriminator_forward(params, [_nchw_to_nhwc(fake)])[0]
    lf, m = _pack_logits(logits_fake)
    g_loss = _scalar_loss_call(
        functools.partial(_neg_mean_kernel, n_valid=m), lf)
    # TODO(synk): calc_adaptive_weight needs torch.autograd.grad w.r.t. an
    # external decoder last_layer; no forward-only Pallas equivalent, so
    # d_weight is fixed to 1.0 (and the rec_loss it would consume is skipped).
    d_weight = jnp.float32(1.0)
    return d_weight * g_loss


def _disc_loss(params, disc_loss, real, fake):
    # real & fake share every layer's pallas_call (weights DMA'd once, streams
    # sharded over the grid) but keep separate BatchNorm statistics.
    logits_real, logits_fake = discriminator_forward(
        params, [_nchw_to_nhwc(real), _nchw_to_nhwc(fake)])
    lr, m = _pack_logits(logits_real)
    lf, _ = _pack_logits(logits_fake)
    kern = _hinge_kernel if disc_loss == "hinge" else _vanilla_kernel
    return _scalar_loss_call(functools.partial(kern, n_valid=m), lr, lf)


# ---------------------------------------------------------------------------
# AdvLoss
# ---------------------------------------------------------------------------
class AdvLossPallas:
    """Forward-pass equivalent of hakulatent AdvLoss (hinge / vanilla)."""

    def __init__(self, start_iter, disc_loss="hinge", *, key,
                 input_nc=3, ndf=8, n_layers=4):
        self.start_iter = start_iter
        self.disc_loss = disc_loss
        self.disc_params = init_discriminator_params(
            key, input_nc, ndf, n_layers)
        # jit so per-layer XLA glue (pad / im2col concat / strip) fuses.
        self._g_loss_jit = jax.jit(
            lambda fake: _gen_loss(self.disc_params, fake))
        self._d_loss_jit = jax.jit(
            lambda real, fake: _disc_loss(self.disc_params, self.disc_loss,
                                          real, fake))

    def __call__(self, real, fake, rec_loss, opt_idx, last_layer=None):
        # rec_loss (|real-fake| when None) is only consumed by the
        # untranslatable calc_adaptive_weight, so it is not computed here.
        if opt_idx == 0:
            return self._g_loss_jit(fake)
        return self._d_loss_jit(real, fake)


# ---------------------------------------------------------------------------
if __name__ == "__main__":
    key = jax.random.PRNGKey(0)
    kp, kr, kf = jax.random.split(key, 3)

    # batch=2, channels=3, spatial=64 (n_layers=4 stride-2 pyramid needs >=64)
    real = jax.random.normal(kr, (2, 3, 64, 64), jnp.float32)
    fake = jax.random.normal(kf, (2, 3, 64, 64), jnp.float32)

    adv = AdvLossPallas(start_iter=0, disc_loss="hinge", key=kp,
                        input_nc=3, ndf=8, n_layers=4)

    d_loss = adv(real, fake, None, opt_idx=1)   # discriminator hinge loss
    g_loss = adv(real, fake, None, opt_idx=0)   # generator adversarial loss
    rec = _rec_loss_pallas(real, fake)          # standalone |real-fake| map
    jax.block_until_ready((d_loss, g_loss, rec))

    print("KERNEL_OK")
</pallas_src>

<mosaic_0001>
module attributes {stable_mosaic.version = 11 : i64} {
  func.func @_conv_bn_lrelu_kernel(%arg0: i32, %arg1: memref<2048x128xbf16, #tpu.memory_space<vmem>>, %arg2: memref<128x128xbf16, #tpu.memory_space<vmem>>, %arg3: memref<1x128xf32, #tpu.memory_space<vmem>>, %arg4: memref<2048x128xbf16, #tpu.memory_space<vmem>>) attributes {dimension_semantics = [#tpu.dimension_semantics<parallel>], iteration_bounds = array<i64: 2>, scalar_prefetch = 0 : i64, scratch_operands = 0 : i64, tpu.core_type = #tpu.core_type<tc>, window_params = [{transform_indices = @transform_0, window_bounds = array<i64: 2048, 128>}, {pipeline_mode = #tpu.pipeline_mode<synchronous>, transform_indices = @transform_1, window_bounds = array<i64: 128, 128>}, {pipeline_mode = #tpu.pipeline_mode<synchronous>, transform_indices = @transform_2, window_bounds = array<i64: 1, 128>}, {transform_indices = @transform_3, window_bounds = array<i64: 2048, 128>}]} {
    %c0 = arith.constant 0 : index
    %c0_0 = arith.constant 0 : index
    %0 = vector.load %arg1[%c0, %c0_0] : memref<2048x128xbf16, #tpu.memory_space<vmem>>, vector<2048x128xbf16>
    %c0_1 = arith.constant 0 : index
    %c0_2 = arith.constant 0 : index
    %1 = vector.load %arg2[%c0_1, %c0_2] : memref<128x128xbf16, #tpu.memory_space<vmem>>, vector<128x128xbf16>
    %cst = arith.constant dense<0.000000e+00> : vector<2048x128xf32>
    %2 = tpu.matmul %0, %1, %cst {dimension_numbers = #tpu.dot_dimension_numbers<[1], [0], [0], [1], [0, 0, 1, 1], [], []>} : vector<2048x128xbf16>, vector<128x128xbf16>, vector<2048x128xf32> -> vector<2048x128xf32>
    %c0_3 = arith.constant 0 : index
    %c0_4 = arith.constant 0 : index
    %3 = vector.load %arg3[%c0_3, %c0_4] : memref<1x128xf32, #tpu.memory_space<vmem>>, vector<1x128xf32>
    %4 = vector.broadcast %3 : vector<1x128xf32> to vector<2048x128xf32>
    %5 = arith.addf %2, %4 : vector<2048x128xf32>
    %cst_5 = arith.constant 2.000000e-01 : f32
    %6 = vector.broadcast %cst_5 : f32 to vector<2048x128xf32>
    %7 = arith.mulf %6, %5 : vector<2048x128xf32>
    %8 = arith.maximumf %5, %7 : vector<2048x128xf32>
    %9 = arith.truncf %8 : vector<2048x128xf32> to vector<2048x128xbf16>
    %c0_6 = arith.constant 0 : index
    %c0_7 = arith.constant 0 : index
    %10 = vector.load %arg4[%c0_6, %c0_7] : memref<2048x128xbf16, #tpu.memory_space<vmem>>, vector<2048x128xbf16>
    tpu.vector_store %arg4[%c0_6, %c0_7], %9 {strides = array<i32>} : memref<2048x128xbf16, #tpu.memory_space<vmem>>, vector<2048x128xbf16>,
    return
  }
  func.func @transform_0(%arg0: i32) -> (i32, i32) {
    %c0_i32 = arith.constant 0 : i32
    %c0_i32_0 = arith.constant 0 : i32
    return %arg0, %c0_i32 : i32, i32
  }
  func.func @transform_1(%arg0: i32) -> (i32, i32) {
    %c0_i32 = arith.constant 0 : i32
    %c0_i32_0 = arith.constant 0 : i32
    %c0_i32_1 = arith.constant 0 : i32
    return %c0_i32, %c0_i32_0 : i32, i32
  }
  func.func @transform_2(%arg0: i32) -> (i32, i32) {
    %c0_i32 = arith.constant 0 : i32
    %c0_i32_0 = arith.constant 0 : i32
    %c0_i32_1 = arith.constant 0 : i32
    return %c0_i32, %c0_i32_0 : i32, i32
  }
  func.func @transform_3(%arg0: i32) -> (i32, i32) {
    %c0_i32 = arith.constant 0 : i32
    %c0_i32_0 = arith.constant 0 : i32
    return %arg0, %c0_i32 : i32, i32
  }
}

module attributes {stable_mosaic.version = 11 : i64} {
  func.func @_conv_bn_lrelu_kernel(%arg0: i32, %arg1: memref<512x128xbf16, #tpu.memory_space<vmem>>, %arg2: memref<128x128xbf16, #tpu.memory_space<vmem>>, %arg3: memref<1x128xf32, #tpu.memory_space<vmem>>, %arg4: memref<512x128xbf16, #tpu.memory_space<vmem>>) attributes {dimension_semantics = [#tpu.dimension_semantics<parallel>], iteration_bounds = array<i64: 2>, scalar_prefetch = 0 : i64, scratch_operands = 0 : i64, tpu.core_type = #tpu.core_type<tc>, window_params = [{transform_indices = @transform_0, window_bounds = array<i64: 512, 128>}, {pipeline_mode = #tpu.pipeline_mode<synchronous>, transform_indices = @transform_1, window_bounds = array<i64: 128, 128>}, {pipeline_mode = #tpu.pipeline_mode<synchronous>, transform_indices = @transform_2, window_bounds = array<i64: 1, 128>}, {transform_indices = @transform_3, window_bounds = array<i64: 512, 128>}]} {
    %c0 = arith.constant 0 : index
    %c0_0 = arith.constant 0 : index
    %0 = vector.load %arg1[%c0, %c0_0] : memref<512x128xbf16, #tpu.memory_space<vmem>>, vector<512x128xbf16>
    %c0_1 = arith.constant 0 : index
    %c0_2 = arith.constant 0 : index
    %1 = vector.load %arg2[%c0_1, %c0_2] : memref<128x128xbf16, #tpu.memory_space<vmem>>, vector<128x128xbf16>
    %cst = arith.constant dense<0.000000e+00> : vector<512x128xf32>
    %2 = tpu.matmul %0, %1, %cst {dimension_numbers = #tpu.dot_dimension_numbers<[1], [0], [0], [1], [0, 0, 1, 1], [], []>} : vector<512x128xbf16>, vector<128x128xbf16>, vector<512x128xf32> -> vector<512x128xf32>
    %cst_3 = arith.constant dense<0.000000e+00> : vector<128xf32>
    %3 = vector.multi_reduction <add>, %2, %cst_3 [0] : vector<512x128xf32> to vector<128xf32>
    %4 = vector.shape_cast %3 : vector<128xf32> to vector<1x128xf32>
    %cst_4 = arith.constant 0.001953125 : f32
    %5 = vector.broadcast %cst_4 : f32 to vector<1x128xf32>
    %6 = arith.mulf %4, %5 : vector<1x128xf32>
    %7 = arith.mulf %2, %2 : vector<512x128xf32>
    %cst_5 = arith.constant dense<0.000000e+00> : vector<128xf32>
    %8 = vector.multi_reduction <add>, %7, %cst_5 [0] : vector<512x128xf32> to vector<128xf32>
    %9 = vector.shape_cast %8 : vector<128xf32> to vector<1x128xf32>
    %cst_6 = arith.constant 0.001953125 : f32
    %10 = vector.broadcast %cst_6 : f32 to vector<1x128xf32>
    %11 = arith.mulf %9, %10 : vector<1x128xf32>
    %12 = arith.mulf %6, %6 : vector<1x128xf32>
    %13 = arith.subf %11, %12 : vector<1x128xf32>
    %cst_7 = arith.constant 0.000000e+00 : f32
    %14 = vector.broadcast %cst_7 : f32 to vector<1x128xf32>
    %15 = arith.maximumf %13, %14 : vector<1x128xf32>
    %16 = vector.broadcast %6 : vector<1x128xf32> to vector<512x128xf32>
    %17 = arith.subf %2, %16 : vector<512x128xf32>
    %cst_8 = arith.constant 9.99999974E-6 : f32
    %18 = vector.broadcast %cst_8 : f32 to vector<1x128xf32>
    %19 = arith.addf %15, %18 : vector<1x128xf32>
    %20 = math.rsqrt %19 : vector<1x128xf32>
    %21 = vector.broadcast %20 : vector<1x128xf32> to vector<512x128xf32>
    %22 = arith.mulf %17, %21 : vector<512x128xf32>
    %cst_9 = arith.constant 2.000000e-01 : f32
    %23 = vector.broadcast %cst_9 : f32 to vector<512x128xf32>
    %24 = arith.mulf %23, %22 : vector<512x128xf32>
    %25 = arith.maximumf %22, %24 : vector<512x128xf32>
    %26 = arith.truncf %25 : vector<512x128xf32> to vector<512x128xbf16>
    %c0_10 = arith.constant 0 : index
    %c0_11 = arith.constant 0 : index
    %27 = vector.load %arg4[%c0_10, %c0_11] : memref<512x128xbf16, #tpu.memory_space<vmem>>, vector<512x128xbf16>
    tpu.vector_store %arg4[%c0_10, %c0_11], %26 {strides = array<i32>} : memref<512x128xbf16, #tpu.memory_space<vmem>>, vector<512x128xbf16>,
    return
  }
  func.func @transform_0(%arg0: i32) -> (i32, i32) {
    %c0_i32 = arith.constant 0 : i32
    %c0_i32_0 = arith.constant 0 : i32
    return %arg0, %c0_i32 : i32, i32
  }
  func.func @transform_1(%arg0: i32) -> (i32, i32) {
    %c0_i32 = arith.constant 0 : i32
    %c0_i32_0 = arith.constant 0 : i32
    %c0_i32_1 = arith.constant 0 : i32
    return %c0_i32, %c0_i32_0 : i32, i32
  }
  func.func @transform_2(%arg0: i32) -> (i32, i32) {
    %c0_i32 = arith.constant 0 : i32
    %c0_i32_0 = arith.constant 0 : i32
    %c0_i32_1 = arith.constant 0 : i32
    return %c0_i32, %c0_i32_0 : i32, i32
  }
  func.func @transform_3(%arg0: i32) -> (i32, i32) {
    %c0_i32 = arith.constant 0 : i32
    %c0_i32_0 = arith.constant 0 : i32
    return %arg0, %c0_i32 : i32, i32
  }
}

module attributes {stable_mosaic.version = 11 : i64} {
  func.func @_conv_bn_lrelu_kernel(%arg0: i32, %arg1: memref<128x256xbf16, #tpu.memory_space<vmem>>, %arg2: memref<256x128xbf16, #tpu.memory_space<vmem>>, %arg3: memref<1x128xf32, #tpu.memory_space<vmem>>, %arg4: memref<128x128xbf16, #tpu.memory_space<vmem>>) attributes {dimension_semantics = [#tpu.dimension_semantics<parallel>], iteration_bounds = array<i64: 2>, scalar_prefetch = 0 : i64, scratch_operands = 0 : i64, tpu.core_type = #tpu.core_type<tc>, window_params = [{transform_indices = @transform_0, window_bounds = array<i64: 128, 256>}, {pipeline_mode = #tpu.pipeline_mode<synchronous>, transform_indices = @transform_1, window_bounds = array<i64: 256, 128>}, {pipeline_mode = #tpu.pipeline_mode<synchronous>, transform_indices = @transform_2, window_bounds = array<i64: 1, 128>}, {transform_indices = @transform_3, window_bounds = array<i64: 128, 128>}]} {
    %c0 = arith.constant 0 : index
    %c0_0 = arith.constant 0 : index
    %0 = vector.load %arg1[%c0, %c0_0] : memref<128x256xbf16, #tpu.memory_space<vmem>>, vector<128x256xbf16>
    %c0_1 = arith.constant 0 : index
    %c0_2 = arith.constant 0 : index
    %1 = vector.load %arg2[%c0_1, %c0_2] : memref<256x128xbf16, #tpu.memory_space<vmem>>, vector<256x128xbf16>
    %cst = arith.constant dense<0.000000e+00> : vector<128x128xf32>
    %2 = tpu.matmul %0, %1, %cst {dimension_numbers = #tpu.dot_dimension_numbers<[1], [0], [0], [1], [0, 0, 1, 1], [], []>} : vector<128x256xbf16>, vector<256x128xbf16>, vector<128x128xf32> -> vector<128x128xf32>
    %cst_3 = arith.constant dense<0.000000e+00> : vector<128xf32>
    %3 = vector.multi_reduction <add>, %2, %cst_3 [0] : vector<128x128xf32> to vector<128xf32>
    %4 = vector.shape_cast %3 : vector<128xf32> to vector<1x128xf32>
    %cst_4 = arith.constant 7.812500e-03 : f32
    %5 = vector.broadcast %cst_4 : f32 to vector<1x128xf32>
    %6 = arith.mulf %4, %5 : vector<1x128xf32>
    %7 = arith.mulf %2, %2 : vector<128x128xf32>
    %cst_5 = arith.constant dense<0.000000e+00> : vector<128xf32>
    %8 = vector.multi_reduction <add>, %7, %cst_5 [0] : vector<128x128xf32> to vector<128xf32>
    %9 = vector.shape_cast %8 : vector<128xf32> to vector<1x128xf32>
    %cst_6 = arith.constant 7.812500e-03 : f32
    %10 = vector.broadcast %cst_6 : f32 to vector<1x128xf32>
    %11 = arith.mulf %9, %10 : vector<1x128xf32>
    %12 = arith.mulf %6, %6 : vector<1x128xf32>
    %13 = arith.subf %11, %12 : vector<1x128xf32>
    %cst_7 = arith.constant 0.000000e+00 : f32
    %14 = vector.broadcast %cst_7 : f32 to vector<1x128xf32>
    %15 = arith.maximumf %13, %14 : vector<1x128xf32>
    %16 = vector.broadcast %6 : vector<1x128xf32> to vector<128x128xf32>
    %17 = arith.subf %2, %16 : vector<128x128xf32>
    %cst_8 = arith.constant 9.99999974E-6 : f32
    %18 = vector.broadcast %cst_8 : f32 to vector<1x128xf32>
    %19 = arith.addf %15, %18 : vector<1x128xf32>
    %20 = math.rsqrt %19 : vector<1x128xf32>
    %21 = vector.broadcast %20 : vector<1x128xf32> to vector<128x128xf32>
    %22 = arith.mulf %17, %21 : vector<128x128xf32>
    %cst_9 = arith.constant 2.000000e-01 : f32
    %23 = vector.broadcast %cst_9 : f32 to vector<128x128xf32>
    %24 = arith.mulf %23, %22 : vector<128x128xf32>
    %25 = arith.maximumf %22, %24 : vector<128x128xf32>
    %26 = arith.truncf %25 : vector<128x128xf32> to vector<128x128xbf16>
    %c0_10 = arith.constant 0 : index
    %c0_11 = arith.constant 0 : index
    %27 = vector.load %arg4[%c0_10, %c0_11] : memref<128x128xbf16, #tpu.memory_space<vmem>>, vector<128x128xbf16>
    tpu.vector_store %arg4[%c0_10, %c0_11], %26 {strides = array<i32>} : memref<128x128xbf16, #tpu.memory_space<vmem>>, vector<128x128xbf16>,
    return
  }
  func.func @transform_0(%arg0: i32) -> (i32, i32) {
    %c0_i32 = arith.constant 0 : i32
    %c0_i32_0 = arith.constant 0 : i32
    return %arg0, %c0_i32 : i32, i32
  }
  func.func @transform_1(%arg0: i32) -> (i32, i32) {
    %c0_i32 = arith.constant 0 : i32
    %c0_i32_0 = arith.constant 0 : i32
    %c0_i32_1 = arith.constant 0 : i32
    return %c0_i32, %c0_i32_0 : i32, i32
  }
  func.func @transform_2(%arg0: i32) -> (i32, i32) {
    %c0_i32 = arith.constant 0 : i32
    %c0_i32_0 = arith.constant 0 : i32
    %c0_i32_1 = arith.constant 0 : i32
    return %c0_i32, %c0_i32_0 : i32, i32
  }
  func.func @transform_3(%arg0: i32) -> (i32, i32) {
    %c0_i32 = arith.constant 0 : i32
    %c0_i32_0 = arith.constant 0 : i32
    return %arg0, %c0_i32 : i32, i32
  }
}

module attributes {stable_mosaic.version = 11 : i64} {
  func.func @_conv_bn_lrelu_kernel(%arg0: i32, %arg1: memref<32x512xbf16, #tpu.memory_space<vmem>>, %arg2: memref<512x128xbf16, #tpu.memory_space<vmem>>, %arg3: memref<1x128xf32, #tpu.memory_space<vmem>>, %arg4: memref<32x128xbf16, #tpu.memory_space<vmem>>) attributes {dimension_semantics = [#tpu.dimension_semantics<parallel>], iteration_bounds = array<i64: 2>, scalar_prefetch = 0 : i64, scratch_operands = 0 : i64, tpu.core_type = #tpu.core_type<tc>, window_params = [{transform_indices = @transform_0, window_bounds = array<i64: 32, 512>}, {pipeline_mode = #tpu.pipeline_mode<synchronous>, transform_indices = @transform_1, window_bounds = array<i64: 512, 128>}, {pipeline_mode = #tpu.pipeline_mode<synchronous>, transform_indices = @transform_2, window_bounds = array<i64: 1, 128>}, {transform_indices = @transform_3, window_bounds = array<i64: 32, 128>}]} {
    %c0 = arith.constant 0 : index
    %c0_0 = arith.constant 0 : index
    %0 = vector.load %arg1[%c0, %c0_0] : memref<32x512xbf16, #tpu.memory_space<vmem>>, vector<32x512xbf16>
    %c0_1 = arith.constant 0 : index
    %c0_2 = arith.constant 0 : index
    %1 = vector.load %arg2[%c0_1, %c0_2] : memref<512x128xbf16, #tpu.memory_space<vmem>>, vector<512x128xbf16>
    %cst = arith.constant dense<0.000000e+00> : vector<32x128xf32>
    %2 = tpu.matmul %0, %1, %cst {dimension_numbers = #tpu.dot_dimension_numbers<[1], [0], [0], [1], [0, 0, 1, 1], [], []>} : vector<32x512xbf16>, vector<512x128xbf16>, vector<32x128xf32> -> vector<32x128xf32>
    %cst_3 = arith.constant dense<0.000000e+00> : vector<128xf32>
    %3 = vector.multi_reduction <add>, %2, %cst_3 [0] : vector<32x128xf32> to vector<128xf32>
    %4 = vector.shape_cast %3 : vector<128xf32> to vector<1x128xf32>
    %cst_4 = arith.constant 3.125000e-02 : f32
    %5 = vector.broadcast %cst_4 : f32 to vector<1x128xf32>
    %6 = arith.mulf %4, %5 : vector<1x128xf32>
    %7 = arith.mulf %2, %2 : vector<32x128xf32>
    %cst_5 = arith.constant dense<0.000000e+00> : vector<128xf32>
    %8 = vector.multi_reduction <add>, %7, %cst_5 [0] : vector<32x128xf32> to vector<128xf32>
    %9 = vector.shape_cast %8 : vector<128xf32> to vector<1x128xf32>
    %cst_6 = arith.constant 3.125000e-02 : f32
    %10 = vector.broadcast %cst_6 : f32 to vector<1x128xf32>
    %11 = arith.mulf %9, %10 : vector<1x128xf32>
    %12 = arith.mulf %6, %6 : vector<1x128xf32>
    %13 = arith.subf %11, %12 : vector<1x128xf32>
    %cst_7 = arith.constant 0.000000e+00 : f32
    %14 = vector.broadcast %cst_7 : f32 to vector<1x128xf32>
    %15 = arith.maximumf %13, %14 : vector<1x128xf32>
    %16 = vector.broadcast %6 : vector<1x128xf32> to vector<32x128xf32>
    %17 = arith.subf %2, %16 : vector<32x128xf32>
    %cst_8 = arith.constant 9.99999974E-6 : f32
    %18 = vector.broadcast %cst_8 : f32 to vector<1x128xf32>
    %19 = arith.addf %15, %18 : vector<1x128xf32>
    %20 = math.rsqrt %19 : vector<1x128xf32>
    %21 = vector.broadcast %20 : vector<1x128xf32> to vector<32x128xf32>
    %22 = arith.mulf %17, %21 : vector<32x128xf32>
    %cst_9 = arith.constant 2.000000e-01 : f32
    %23 = vector.broadcast %cst_9 : f32 to vector<32x128xf32>
    %24 = arith.mulf %23, %22 : vector<32x128xf32>
    %25 = arith.maximumf %22, %24 : vector<32x128xf32>
    %26 = arith.truncf %25 : vector<32x128xf32> to vector<32x128xbf16>
    %c0_10 = arith.constant 0 : index
    %c0_11 = arith.constant 0 : index
    %27 = vector.load %arg4[%c0_10, %c0_11] : memref<32x128xbf16, #tpu.memory_space<vmem>>, vector<32x128xbf16>
    tpu.vector_store %arg4[%c0_10, %c0_11], %26 {strides = array<i32>} : memref<32x128xbf16, #tpu.memory_space<vmem>>, vector<32x128xbf16>,
    return
  }
  func.func @transform_0(%arg0: i32) -> (i32, i32) {
    %c0_i32 = arith.constant 0 : i32
    %c0_i32_0 = arith.constant 0 : i32
    return %arg0, %c0_i32 : i32, i32
  }
  func.func @transform_1(%arg0: i32) -> (i32, i32) {
    %c0_i32 = arith.constant 0 : i32
    %c0_i32_0 = arith.constant 0 : i32
    %c0_i32_1 = arith.constant 0 : i32
    return %c0_i32, %c0_i32_0 : i32, i32
  }
  func.func @transform_2(%arg0: i32) -> (i32, i32) {
    %c0_i32 = arith.constant 0 : i32
    %c0_i32_0 = arith.constant 0 : i32
    %c0_i32_1 = arith.constant 0 : i32
    return %c0_i32, %c0_i32_0 : i32, i32
  }
  func.func @transform_3(%arg0: i32) -> (i32, i32) {
    %c0_i32 = arith.constant 0 : i32
    %c0_i32_0 = arith.constant 0 : i32
    return %arg0, %c0_i32 : i32, i32
  }
}

module attributes {stable_mosaic.version = 11 : i64} {
  func.func @_conv_bn_lrelu_kernel(%arg0: i32, %arg1: memref<32x1024xbf16, #tpu.memory_space<vmem>>, %arg2: memref<1024x128xbf16, #tpu.memory_space<vmem>>, %arg3: memref<1x128xf32, #tpu.memory_space<vmem>>, %arg4: memref<32x128xbf16, #tpu.memory_space<vmem>>) attributes {dimension_semantics = [#tpu.dimension_semantics<parallel>], iteration_bounds = array<i64: 2>, scalar_prefetch = 0 : i64, scratch_operands = 0 : i64, tpu.core_type = #tpu.core_type<tc>, window_params = [{transform_indices = @transform_0, window_bounds = array<i64: 32, 1024>}, {pipeline_mode = #tpu.pipeline_mode<synchronous>, transform_indices = @transform_1, window_bounds = array<i64: 1024, 128>}, {pipeline_mode = #tpu.pipeline_mode<synchronous>, transform_indices = @transform_2, window_bounds = array<i64: 1, 128>}, {transform_indices = @transform_3, window_bounds = array<i64: 32, 128>}]} {
    %c0 = arith.constant 0 : index
    %c0_0 = arith.constant 0 : index
    %0 = vector.load %arg1[%c0, %c0_0] : memref<32x1024xbf16, #tpu.memory_space<vmem>>, vector<32x1024xbf16>
    %c0_1 = arith.constant 0 : index
    %c0_2 = arith.constant 0 : index
    %1 = vector.load %arg2[%c0_1, %c0_2] : memref<1024x128xbf16, #tpu.memory_space<vmem>>, vector<1024x128xbf16>
    %cst = arith.constant dense<0.000000e+00> : vector<32x128xf32>
    %2 = tpu.matmul %0, %1, %cst {dimension_numbers = #tpu.dot_dimension_numbers<[1], [0], [0], [1], [0, 0, 1, 1], [], []>} : vector<32x1024xbf16>, vector<1024x128xbf16>, vector<32x128xf32> -> vector<32x128xf32>
    %cst_3 = arith.constant dense<0.000000e+00> : vector<128xf32>
    %3 = vector.multi_reduction <add>, %2, %cst_3 [0] : vector<32x128xf32> to vector<128xf32>
    %4 = vector.shape_cast %3 : vector<128xf32> to vector<1x128xf32>
    %cst_4 = arith.constant 0.055555556 : f32
    %5 = vector.broadcast %cst_4 : f32 to vector<1x128xf32>
    %6 = arith.mulf %4, %5 : vector<1x128xf32>
    %7 = arith.mulf %2, %2 : vector<32x128xf32>
    %cst_5 = arith.constant dense<0.000000e+00> : vector<128xf32>
    %8 = vector.multi_reduction <add>, %7, %cst_5 [0] : vector<32x128xf32> to vector<128xf32>
    %9 = vector.shape_cast %8 : vector<128xf32> to vector<1x128xf32>
    %cst_6 = arith.constant 0.055555556 : f32
    %10 = vector.broadcast %cst_6 : f32 to vector<1x128xf32>
    %11 = arith.mulf %9, %10 : vector<1x128xf32>
    %12 = arith.mulf %6, %6 : vector<1x128xf32>
    %13 = arith.subf %11, %12 : vector<1x128xf32>
    %cst_7 = arith.constant 0.000000e+00 : f32
    %14 = vector.broadcast %cst_7 : f32 to vector<1x128xf32>
    %15 = arith.maximumf %13, %14 : vector<1x128xf32>
    %16 = vector.broadcast %6 : vector<1x128xf32> to vector<32x128xf32>
    %17 = arith.subf %2, %16 : vector<32x128xf32>
    %cst_8 = arith.constant 9.99999974E-6 : f32
    %18 = vector.broadcast %cst_8 : f32 to vector<1x128xf32>
    %19 = arith.addf %15, %18 : vector<1x128xf32>
    %20 = math.rsqrt %19 : vector<1x128xf32>
    %21 = vector.broadcast %20 : vector<1x128xf32> to vector<32x128xf32>
    %22 = arith.mulf %17, %21 : vector<32x128xf32>
    %cst_9 = arith.constant 2.000000e-01 : f32
    %23 = vector.broadcast %cst_9 : f32 to vector<32x128xf32>
    %24 = arith.mulf %23, %22 : vector<32x128xf32>
    %25 = arith.maximumf %22, %24 : vector<32x128xf32>
    %26 = arith.truncf %25 : vector<32x128xf32> to vector<32x128xbf16>
    %c0_10 = arith.constant 0 : index
    %c0_11 = arith.constant 0 : index
    %27 = vector.load %arg4[%c0_10, %c0_11] : memref<32x128xbf16, #tpu.memory_space<vmem>>, vector<32x128xbf16>
    tpu.vector_store %arg4[%c0_10, %c0_11], %26 {strides = array<i32>} : memref<32x128xbf16, #tpu.memory_space<vmem>>, vector<32x128xbf16>,
    return
  }
  func.func @transform_0(%arg0: i32) -> (i32, i32) {
    %c0_i32 = arith.constant 0 : i32
    %c0_i32_0 = arith.constant 0 : i32
    return %arg0, %c0_i32 : i32, i32
  }
  func.func @transform_1(%arg0: i32) -> (i32, i32) {
    %c0_i32 = arith.constant 0 : i32
    %c0_i32_0 = arith.constant 0 : i32
    %c0_i32_1 = arith.constant 0 : i32
    return %c0_i32, %c0_i32_0 : i32, i32
  }
  func.func @transform_2(%arg0: i32) -> (i32, i32) {
    %c0_i32 = arith.constant 0 : i32
    %c0_i32_0 = arith.constant 0 : i32
    %c0_i32_1 = arith.constant 0 : i32
    return %c0_i32, %c0_i32_0 : i32, i32
  }
  func.func @transform_3(%arg0: i32) -> (i32, i32) {
    %c0_i32 = arith.constant 0 : i32
    %c0_i32_0 = arith.constant 0 : i32
    return %arg0, %c0_i32 : i32, i32
  }
}

module attributes {stable_mosaic.version = 11 : i64} {
  func.func @_conv_bn_lrelu_kernel(%arg0: i32, %arg1: memref<16x1024xbf16, #tpu.memory_space<vmem>>, %arg2: memref<1024x128xbf16, #tpu.memory_space<vmem>>, %arg3: memref<1x128xf32, #tpu.memory_space<vmem>>, %arg4: memref<16x128xbf16, #tpu.memory_space<vmem>>) attributes {dimension_semantics = [#tpu.dimension_semantics<parallel>], iteration_bounds = array<i64: 2>, scalar_prefetch = 0 : i64, scratch_operands = 0 : i64, tpu.core_type = #tpu.core_type<tc>, window_params = [{transform_indices = @transform_0, window_bounds = array<i64: 16, 1024>}, {pipeline_mode = #tpu.pipeline_mode<synchronous>, transform_indices = @transform_1, window_bounds = array<i64: 1024, 128>}, {pipeline_mode = #tpu.pipeline_mode<synchronous>, transform_indices = @transform_2, window_bounds = array<i64: 1, 128>}, {transform_indices = @transform_3, window_bounds = array<i64: 16, 128>}]} {
    %c0 = arith.constant 0 : index
    %c0_0 = arith.constant 0 : index
    %0 = vector.load %arg1[%c0, %c0_0] : memref<16x1024xbf16, #tpu.memory_space<vmem>>, vector<16x1024xbf16>
    %c0_1 = arith.constant 0 : index
    %c0_2 = arith.constant 0 : index
    %1 = vector.load %arg2[%c0_1, %c0_2] : memref<1024x128xbf16, #tpu.memory_space<vmem>>, vector<1024x128xbf16>
    %cst = arith.constant dense<0.000000e+00> : vector<16x128xf32>
    %2 = tpu.matmul %0, %1, %cst {dimension_numbers = #tpu.dot_dimension_numbers<[1], [0], [0], [1], [0, 0, 1, 1], [], []>} : vector<16x1024xbf16>, vector<1024x128xbf16>, vector<16x128xf32> -> vector<16x128xf32>
    %c0_3 = arith.constant 0 : index
    %c0_4 = arith.constant 0 : index
    %3 = vector.load %arg3[%c0_3, %c0_4] : memref<1x128xf32, #tpu.memory_space<vmem>>, vector<1x128xf32>
    %4 = vector.broadcast %3 : vector<1x128xf32> to vector<16x128xf32>
    %5 = arith.addf %2, %4 : vector<16x128xf32>
    %6 = arith.truncf %5 : vector<16x128xf32> to vector<16x128xbf16>
    %c0_5 = arith.constant 0 : index
    %c0_6 = arith.constant 0 : index
    %7 = vector.load %arg4[%c0_5, %c0_6] : memref<16x128xbf16, #tpu.memory_space<vmem>>, vector<16x128xbf16>
    tpu.vector_store %arg4[%c0_5, %c0_6], %6 {strides = array<i32>} : memref<16x128xbf16, #tpu.memory_space<vmem>>, vector<16x128xbf16>,
    return
  }
  func.func @transform_0(%arg0: i32) -> (i32, i32) {
    %c0_i32 = arith.constant 0 : i32
    %c0_i32_0 = arith.constant 0 : i32
    return %arg0, %c0_i32 : i32, i32
  }
  func.func @transform_1(%arg0: i32) -> (i32, i32) {
    %c0_i32 = arith.constant 0 : i32
    %c0_i32_0 = arith.constant 0 : i32
    %c0_i32_1 = arith.constant 0 : i32
    return %c0_i32, %c0_i32_0 : i32, i32
  }
  func.func @transform_2(%arg0: i32) -> (i32, i32) {
    %c0_i32 = arith.constant 0 : i32
    %c0_i32_0 = arith.constant 0 : i32
    %c0_i32_1 = arith.constant 0 : i32
    return %c0_i32, %c0_i32_0 : i32, i32
  }
  func.func @transform_3(%arg0: i32) -> (i32, i32) {
    %c0_i32 = arith.constant 0 : i32
    %c0_i32_0 = arith.constant 0 : i32
    return %arg0, %c0_i32 : i32, i32
  }
}

module attributes {stable_mosaic.version = 11 : i64} {
  func.func @_hinge_kernel(%arg0: memref<1x128xf32, #tpu.memory_space<vmem>>, %arg1: memref<1x128xf32, #tpu.memory_space<vmem>>, %arg2: memref<1x1xf32, #tpu.memory_space<smem>>) attributes {dimension_semantics = [], scalar_prefetch = 0 : i64, scratch_operands = 0 : i64, tpu.core_type = #tpu.core_type<tc>} {
    %c0 = arith.constant 0 : index
    %c0_0 = arith.constant 0 : index
    %0 = vector.load %arg0[%c0, %c0_0] : memref<1x128xf32, #tpu.memory_space<vmem>>, vector<1x128xf32>
    %c0_1 = arith.constant 0 : index
    %c0_2 = arith.constant 0 : index
    %1 = vector.load %arg1[%c0_1, %c0_2] : memref<1x128xf32, #tpu.memory_space<vmem>>, vector<1x128xf32>
    %2 = tpu.iota {dimensions = array<i32: 1>} : vector<1x128xi32>
    %c8_i32 = arith.constant 8 : i32
    %3 = vector.broadcast %c8_i32 : i32 to vector<1x128xi32>
    %4 = arith.cmpi slt, %2, %3 : vector<1x128xi32>
    %cst = arith.constant 1.000000e+00 : f32
    %5 = vector.broadcast %cst : f32 to vector<1x128xf32>
    %6 = arith.subf %5, %0 : vector<1x128xf32>
    %cst_3 = arith.constant 0.000000e+00 : f32
    %7 = vector.broadcast %cst_3 : f32 to vector<1x128xf32>
    %8 = arith.maximumf %6, %7 : vector<1x128xf32>
    %cst_4 = arith.constant 0.000000e+00 : f32
    %9 = vector.broadcast %cst_4 : f32 to vector<1x128xf32>
    %10 = arith.select %4, %8, %9 : vector<1x128xi1>, vector<1x128xf32>
    %11 = vector.shape_cast %10 : vector<1x128xf32> to vector<1x1x128xf32>
    %cst_5 = arith.constant dense<0.000000e+00> : vector<1xf32>
    %12 = vector.multi_reduction <add>, %11, %cst_5 [1, 2] : vector<1x1x128xf32> to vector<1xf32>
    %13 = vector.shape_cast %12 : vector<1xf32> to vector<1x1x1xf32>
    %14 = vector.extract %13[0, 0, 0] : f32 from vector<1x1x1xf32>
    %cst_6 = arith.constant 1.250000e-01 : f32
    %15 = arith.mulf %14, %cst_6 : f32
    %cst_7 = arith.constant 1.000000e+00 : f32
    %16 = vector.broadcast %cst_7 : f32 to vector<1x128xf32>
    %17 = arith.addf %16, %1 : vector<1x128xf32>
    %cst_8 = arith.constant 0.000000e+00 : f32
    %18 = vector.broadcast %cst_8 : f32 to vector<1x128xf32>
    %19 = arith.maximumf %17, %18 : vector<1x128xf32>
    %cst_9 = arith.constant 0.000000e+00 : f32
    %20 = vector.broadcast %cst_9 : f32 to vector<1x128xf32>
    %21 = arith.select %4, %19, %20 : vector<1x128xi1>, vector<1x128xf32>
    %22 = vector.shape_cast %21 : vector<1x128xf32> to vector<1x1x128xf32>
    %cst_10 = arith.constant dense<0.000000e+00> : vector<1xf32>
    %23 = vector.multi_reduction <add>, %22, %cst_10 [1, 2] : vector<1x1x128xf32> to vector<1xf32>
    %24 = vector.shape_cast %23 : vector<1xf32> to vector<1x1x1xf32>
    %25 = vector.extract %24[0, 0, 0] : f32 from vector<1x1x1xf32>
    %cst_11 = arith.constant 1.250000e-01 : f32
    %26 = arith.mulf %25, %cst_11 : f32
    %27 = arith.addf %15, %26 : f32
    %cst_12 = arith.constant 5.000000e-01 : f32
    %28 = arith.mulf %cst_12, %27 : f32
    %c0_13 = arith.constant 0 : index
    %c0_14 = arith.constant 0 : index
    %29 = memref.load %arg2[%c0_13, %c0_14] : memref<1x1xf32, #tpu.memory_space<smem>>
    memref.store %28, %arg2[%c0_13, %c0_14] : memref<1x1xf32, #tpu.memory_space<smem>>
    return
  }
}

</mosaic_0001>

<bundles_post_ra>
// kernel: _lambda_.7
= control target key start
LH: loop header
LB: loop body
LE: loop exit
PB: predicated region body
PF: predicated region fallthrough
CT: control target
= control target key end

     0   :  { %s6200_s12 = smov 0   ;;  %s6779_s0 = inlined_call_operand.vmem [shape: bf16[4096,128], index: 0, kind: input, shape index: {}]   ;;  %s6780_s1 = inlined_call_operand.vmem [shape: bf16[128,128], index: 1, kind: input, shape index: {}]   ;;  %s6781_s2 = inlined_call_operand.vmem [shape: f32[1,128], index: 2, kind: input, shape index: {}]   ;;  %s6782_s3 = inlined_call_operand.vmem [shape: bf16[4096,128], index: 3, kind: output, shape index: {}]  }
   0x1 LB: > { %s4175_s13 = sadd.s32 4294967295, %s6178_s12   ;;  %p4179_p0 = scmp.ge.s32.totalorder %s6178_s12, 1  ;;  %s6178_s12 = sphi %s6200_s12, %s13_s12  }
   0x2   : > { %p138_p1 = scmp.lt.s32.totalorder %s6178_s12, 3 }
   0x4   : > { %p139_p2 = pnand %p4179_p0, %p138_p1 }
   0x5   : > { %v6034_v0 = vld [vmem:[%s6780_s1] sm:$0xff] (!%p139_p2)   ;;  %s4180_s16 = sshll.u32 (!%p139_p2), %s4175_s13, 8  ;;  %v6035_v1 = vld [vmem:[%s6780_s1 + $0x8] sm:$0xff] (!%p139_p2)   ;;  %v6036_v2 = vld [vmem:[%s6780_s1 + $0x10] sm:$0xff] (!%p139_p2)  }
   0x6   : > { %142 = sbr.rel (%p139_p2) target bundleno = 511 (0x1ff), region = 32  ;;  %p163_p3 = scmp.lt.s32.totalorder (!%p139_p2), %s4180_s16, 511  ;;  %5738 = vmatprep.subr.bf16.mxu0 (!%p139_p2), %v6034_v0  ;;  %6010 = vmatprep.subr.bf16.mxu1 (!%p139_p2), %v6034_v0  ;;  %v6037_v3 = vld [vmem:[%s6780_s1 + $0x18] sm:$0xff] (!%p139_p2)   ;;  %v6038_v6 = vld [vmem:[%s6780_s1 + $0x20] sm:$0xff] (!%p139_p2)   ;;  %v6039_v7 = vld [vmem:[%s6780_s1 + $0x28] sm:$0xff] (!%p139_p2)  }
   0x7   : > { %5739 = vmatpush3.bf16.msra.mxu0 (!%p139_p2), %v6034_v0  ;;  %6018 = vmatpush3.bf16.msra.mxu1 (!%p139_p2), %v6034_v0  ;;  %v6040_v8 = vld [vmem:[%s6780_s1 + $0x30] sm:$0xff] (!%p139_p2)   ;;  %v6041_v9 = vld [vmem:[%s6780_s1 + $0x38] sm:$0xff] (!%p139_p2)  }
   0x8   : > { %5740 = vmatprep.subr.bf16.mxu0 (!%p139_p2), %v6035_v1  ;;  %6011 = vmatprep.subr.bf16.mxu1 (!%p139_p2), %v6035_v1 }
   0xb   : > { %5741 = vmatpush3.bf16.msra.mxu0 (!%p139_p2), %v6035_v1  ;;  %6019 = vmatpush3.bf16.msra.mxu1 (!%p139_p2), %v6035_v1 }
   0xc   : > { %5742 = vmatprep.subr.bf16.mxu0 (!%p139_p2), %v6036_v2  ;;  %6012 = vmatprep.subr.bf16.mxu1 (!%p139_p2), %v6036_v2 }
   0xd   : > { %s6784_s16 = smov (!%p163_p3, %s4180_s16), 511 }
   0xe   : > { %s4181_s21 = sshll.u32 %s6784_s16, 2 }
   0xf   : > { %s6225_s24 = scalar_lea.vmem %s6779_s0, %s4181_s21  ;;  %5743 = vmatpush3.bf16.msra.mxu0 %v6036_v2  ;;  %6020 = vmatpush3.bf16.msra.mxu1 %v6036_v2  ;;  %s6374_s13 = scalar_lea.vmem %s6782_s3, %s4181_s21 }
  0x10   : > { %v6042_v4 = vld [vmem:[%s6225_s24] sm:$0xff]   ;;  %5744 = vmatprep.subr.bf16.mxu0 %v6037_v3  ;;  %6013 = vmatprep.subr.bf16.mxu1 %v6037_v3  ;;  %v6044_v10 = vld [vmem:[%s6225_s24 + $0x8] sm:$0xff]   ;;  %v6046_v12 = vld [vmem:[%s6225_s24 + $0x10] sm:$0xff]  }
  0x11   : > { %v6043_v5 = vld [vmem:[%s6225_s24 + $0x200] sm:$0xff]   ;;  %5754 = vmatprep.mubr.bf16.mxu0 %v6042_v4  ;;  %v6045_v11 = vld [vmem:[%s6225_s24 + $0x208] sm:$0xff]   ;;  %v6047_v13 = vld [vmem:[%s6225_s24 + $0x210] sm:$0xff]  }
  0x12   : > { %5882 = vmatprep.mubr.bf16.mxu1 %v6043_v5  ;;  %v6048_v14 = vld [vmem:[%s6225_s24 + $0x18] sm:$0xff]   ;;  %v6050_v16 = vld [vmem:[%s6225_s24 + $0x20] sm:$0xff]   ;;  %v6052_v18 = vld [vmem:[%s6225_s24 + $0x28] sm:$0xff]  }
  0x13   : > { %5745 = vmatpush3.bf16.msra.mxu0 %v6037_v3  ;;  %6021 = vmatpush3.bf16.msra.mxu1 %v6037_v3  ;;  %v6049_v15 = vld [vmem:[%s6225_s24 + $0x218] sm:$0xff]   ;;  %v6051_v17 = vld [vmem:[%s6225_s24 + $0x220] sm:$0xff]   ;;  %v6053_v19 = vld [vmem:[%s6225_s24 + $0x228] sm:$0xff]  }
  0x14   : > { %5746 = vmatprep.subr.bf16.mxu0 %v6038_v6  ;;  %6014 = vmatprep.subr.bf16.mxu1 %v6038_v6  ;;  %v6054_v20 = vld [vmem:[%s6225_s24 + $0x30] sm:$0xff]   ;;  %v6056_v22 = vld [vmem:[%s6225_s24 + $0x38] sm:$0xff]   ;;  %v6058_v24 = vld [vmem:[%s6225_s24 + $0x40] sm:$0xff]  }
  0x15   : > { %v6055_v21 = vld [vmem:[%s6225_s24 + $0x230] sm:$0xff]   ;;  %v6057_v23 = vld [vmem:[%s6225_s24 + $0x238] sm:$0xff]   ;;  %v6059_v25 = vld [vmem:[%s6225_s24 + $0x240] sm:$0xff]  }
  0x16   : > { %v6060_v26 = vld [vmem:[%s6225_s24 + $0x48] sm:$0xff]   ;;  %v6062_v28 = vld [vmem:[%s6225_s24 + $0x50] sm:$0xff]   ;;  %v6064_v30 = vld [vmem:[%s6225_s24 + $0x58] sm:$0xff]  }
  0x17   : > { %5747 = vmatpush3.bf16.msra.mxu0 %v6038_v6  ;;  %6022 = vmatpush3.bf16.msra.mxu1 %v6038_v6  ;;  %v6061_v27 = vld [vmem:[%s6225_s24 + $0x248] sm:$0xff]   ;;  %v6063_v29 = vld [vmem:[%s6225_s24 + $0x250] sm:$0xff]   ;;  %v6065_v31 = vld [vmem:[%s6225_s24 + $0x258] sm:$0xff]  }
  0x18   : > { %5748 = vmatprep.subr.bf16.mxu0 %v6039_v7  ;;  %6015 = vmatprep.subr.bf16.mxu1 %v6039_v7  ;;  %v6066_v32 = vld [vmem:[%s6225_s24 + $0x60] sm:$0xff]   ;;  %v6068_v34 = vld [vmem:[%s6225_s24 + $0x68] sm:$0xff]   ;;  %v6070_v36 = vld [vmem:[%s6225_s24 + $0x70] sm:$0xff]  }
  0x19   : > { %v6067_v33 = vld [vmem:[%s6225_s24 + $0x260] sm:$0xff]   ;;  %v6069_v35 = vld [vmem:[%s6225_s24 + $0x268] sm:$0xff]   ;;  %v6071_v37 = vld [vmem:[%s6225_s24 + $0x270] sm:$0xff]  }
  0x1a   : > { %v6072_v38 = vld [vmem:[%s6225_s24 + $0x78] sm:$0xff]   ;;  %v6074_v40 = vld [vmem:[%s6225_s24 + $0x80] sm:$0xff]   ;;  %v6076_v42 = vld [vmem:[%s6225_s24 + $0x88] sm:$0xff]  }
  0x1b   : > { %5749 = vmatpush3.bf16.msra.mxu0 %v6039_v7  ;;  %6023 = vmatpush3.bf16.msra.mxu1 %v6039_v7  ;;  %v6073_v39 = vld [vmem:[%s6225_s24 + $0x278] sm:$0xff]   ;;  %v6075_v41 = vld [vmem:[%s6225_s24 + $0x280] sm:$0xff]   ;;  %v6077_v43 = vld [vmem:[%s6225_s24 + $0x288] sm:$0xff]  }
  0x1c   : > { %5750 = vmatprep.subr.bf16.mxu0 %v6040_v8  ;;  %6016 = vmatprep.subr.bf16.mxu1 %v6040_v8  ;;  %v6078_v44 = vld [vmem:[%s6225_s24 + $0x90] sm:$0xff]   ;;  %v6080_v46 = vld [vmem:[%s6225_s24 + $0x98] sm:$0xff]   ;;  %v6082_v48 = vld [vmem:[%s6225_s24 + $0xa0] sm:$0xff]  }
  0x1d   : > { %v6079_v45 = vld [vmem:[%s6225_s24 + $0x290] sm:$0xff]   ;;  %v6081_v47 = vld [vmem:[%s6225_s24 + $0x298] sm:$0xff]   ;;  %v6083_v49 = vld [vmem:[%s6225_s24 + $0x2a0] sm:$0xff]  }
  0x1e   : > { %v6084_v50 = vld [vmem:[%s6225_s24 + $0xa8] sm:$0xff]   ;;  %v6086_v52 = vld [vmem:[%s6225_s24 + $0xb0] sm:$0xff]   ;;  %v6088_v54 = vld [vmem:[%s6225_s24 + $0xb8] sm:$0xff]  }
  0x1f   : > { %5751 = vmatpush3.bf16.msra.mxu0 %v6040_v8  ;;  %6024 = vmatpush3.bf16.msra.mxu1 %v6040_v8  ;;  %v6085_v51 = vld [vmem:[%s6225_s24 + $0x2a8] sm:$0xff]   ;;  %v6087_v53 = vld [vmem:[%s6225_s24 + $0x2b0] sm:$0xff]   ;;  %v6089_v55 = vld [vmem:[%s6225_s24 + $0x2b8] sm:$0xff]  }
  0x20   : > { %5752 = vmatprep.subr.bf16.mxu0 %v6041_v9  ;;  %6017 = vmatprep.subr.bf16.mxu1 %v6041_v9  ;;  %v6090_v56 = vld [vmem:[%s6225_s24 + $0xc0] sm:$0xff]   ;;  %v6092_v58 = vld [vmem:[%s6225_s24 + $0xc8] sm:$0xff]   ;;  %v6094_v60 = vld [vmem:[%s6225_s24 + $0xd0] sm:$0xff]  }
  0x21   : > { %v6091_v57 = vld [vmem:[%s6225_s24 + $0x2c0] sm:$0xff]   ;;  %v6093_v59 = vld [vmem:[%s6225_s24 + $0x2c8] sm:$0xff]   ;;  %v6095_v61 = vld [vmem:[%s6225_s24 + $0x2d0] sm:$0xff]  }
  0x22   : > { %v6096_v62 = vld [vmem:[%s6225_s24 + $0xd8] sm:$0xff]   ;;  %v6098_v0 = vld [vmem:[%s6225_s24 + $0xe0] sm:$0xff]   ;;  %v6100_v2 = vld [vmem:[%s6225_s24 + $0xe8] sm:$0xff]  }
  0x23   : > { %5753 = vmatpush3.bf16.msra.mxu0 %v6041_v9  ;;  %6025 = vmatpush3.bf16.msra.mxu1 %v6041_v9  ;;  %v6097_v63 = vld [vmem:[%s6225_s24 + $0x2d8] sm:$0xff]   ;;  %v6099_v1 = vld [vmem:[%s6225_s24 + $0x2e0] sm:$0xff]   ;;  %v6101_v3 = vld [vmem:[%s6225_s24 + $0x2e8] sm:$0xff]  }
  0x24   : > { %v6102_v4 = vld [vmem:[%s6225_s24 + $0xf0] sm:$0xff]   ;;  %v6104_v6 = vld [vmem:[%s6225_s24 + $0xf8] sm:$0xff]   ;;  %v6106_v8 = vld [vmem:[%s6225_s24 + $0x100] sm:$0xff]  }
  0x25   : > { %v6103_v5 = vld [vmem:[%s6225_s24 + $0x2f0] sm:$0xff]   ;;  %v6105_v7 = vld [vmem:[%s6225_s24 + $0x2f8] sm:$0xff]   ;;  %v6107_v9 = vld [vmem:[%s6225_s24 + $0x300] sm:$0xff]  }
  0x26   : > { %5755 = vmatmul.mubr.bf16.vlgmr.msra.gmra.mrb[0].mxu0 %v6044_v10  ;;  %5883 = vmatmul.mubr.bf16.vlgmr.msra.gmra.mrb[0].mxu1 %v6045_v11  ;;  %v6108_v10 = vld [vmem:[%s6225_s24 + $0x108] sm:$0xff]  }
  0x27   : > { %5758 = vmatprep.mubr.bf16.mxu0 %v6046_v12  ;;  %5886 = vmatprep.mubr.bf16.mxu1 %v6047_v13  ;;  %v6109_v11 = vld [vmem:[%s6225_s24 + $0x308] sm:$0xff]   ;;  %v6110_v12 = vld [vmem:[%s6225_s24 + $0x110] sm:$0xff]  }
  0x28   : > { %v6111_v13 = vld [vmem:[%s6225_s24 + $0x310] sm:$0xff]  }
  0x2e   : > { %5759 = vmatmul.mubr.bf16.gmra.mrb[4].mxu0 %v6048_v14  ;;  %5887 = vmatmul.mubr.bf16.gmra.mrb[4].mxu1 %v6049_v15  ;;  %v6112_v14 = vld [vmem:[%s6225_s24 + $0x118] sm:$0xff]  }
  0x2f   : > { %5762 = vmatprep.mubr.bf16.mxu0 %v6050_v16  ;;  %5890 = vmatprep.mubr.bf16.mxu1 %v6051_v17  ;;  %v6113_v15 = vld [vmem:[%s6225_s24 + $0x318] sm:$0xff]   ;;  %v6114_v16 = vld [vmem:[%s6225_s24 + $0x120] sm:$0xff]  }
  0x30   : > { %v6115_v17 = vld [vmem:[%s6225_s24 + $0x320] sm:$0xff]  }
  0x36   : > { %5763 = vmatmul.mubr.bf16.gmra.mrb[8].mxu0 %v6052_v18  ;;  %5891 = vmatmul.mubr.bf16.gmra.mrb[8].mxu1 %v6053_v19  ;;  %v6116_v18 = vld [vmem:[%s6225_s24 + $0x128] sm:$0xff]  }
  0x37   : > { %5766 = vmatprep.mubr.bf16.mxu0 %v6054_v20  ;;  %5894 = vmatprep.mubr.bf16.mxu1 %v6055_v21  ;;  %v6117_v19 = vld [vmem:[%s6225_s24 + $0x328] sm:$0xff]   ;;  %v6118_v20 = vld [vmem:[%s6225_s24 + $0x130] sm:$0xff]  }
  0x38   : > { %v6119_v21 = vld [vmem:[%s6225_s24 + $0x330] sm:$0xff]  }
  0x3e   : > { %5767 = vmatmul.mubr.bf16.gmra.mrb[12].mxu0 %v6056_v22  ;;  %5895 = vmatmul.mubr.bf16.gmra.mrb[12].mxu1 %v6057_v23  ;;  %v6120_v22 = vld [vmem:[%s6225_s24 + $0x138] sm:$0xff]  }
  0x3f   : > { %5770 = vmatprep.mubr.bf16.mxu0 %v6058_v24  ;;  %5898 = vmatprep.mubr.bf16.mxu1 %v6059_v25  ;;  %v6121_v23 = vld [vmem:[%s6225_s24 + $0x338] sm:$0xff]   ;;  %v6122_v24 = vld [vmem:[%s6225_s24 + $0x140] sm:$0xff]  }
  0x40   : > { %v6123_v25 = vld [vmem:[%s6225_s24 + $0x340] sm:$0xff]  }
  0x46   : > { %5771 = vmatmul.mubr.bf16.gmra.mrb[16].mxu0 %v6060_v26  ;;  %5899 = vmatmul.mubr.bf16.gmra.mrb[16].mxu1 %v6061_v27  ;;  %v6124_v26 = vld [vmem:[%s6225_s24 + $0x148] sm:$0xff]  }
  0x47   : > { %5774 = vmatprep.mubr.bf16.mxu0 %v6062_v28  ;;  %5902 = vmatprep.mubr.bf16.mxu1 %v6063_v29  ;;  %v6125_v27 = vld [vmem:[%s6225_s24 + $0x348] sm:$0xff]   ;;  %v6126_v28 = vld [vmem:[%s6225_s24 + $0x150] sm:$0xff]  }
  0x48   : > { %v6127_v29 = vld [vmem:[%s6225_s24 + $0x350] sm:$0xff]  }
  0x4e   : > { %5775 = vmatmul.mubr.bf16.gmra.mrb[20].mxu0 %v6064_v30  ;;  %5903 = vmatmul.mubr.bf16.gmra.mrb[20].mxu1 %v6065_v31  ;;  %v6128_v30 = vld [vmem:[%s6225_s24 + $0x158] sm:$0xff]  }
  0x4f   : > { %5778 = vmatprep.mubr.bf16.mxu0 %v6066_v32  ;;  %5906 = vmatprep.mubr.bf16.mxu1 %v6067_v33  ;;  %v6129_v31 = vld [vmem:[%s6225_s24 + $0x358] sm:$0xff]   ;;  %v6130_v32 = vld [vmem:[%s6225_s24 + $0x160] sm:$0xff]  }
  0x50   : > { %v6131_v33 = vld [vmem:[%s6225_s24 + $0x360] sm:$0xff]  }
  0x56   : > { %5779 = vmatmul.mubr.bf16.gmra.mrb[24].mxu0 %v6068_v34  ;;  %5907 = vmatmul.mubr.bf16.gmra.mrb[24].mxu1 %v6069_v35  ;;  %v6132_v34 = vld [vmem:[%s6225_s24 + $0x168] sm:$0xff]  }
  0x57   : > { %5782 = vmatprep.mubr.bf16.mxu0 %v6070_v36  ;;  %5910 = vmatprep.mubr.bf16.mxu1 %v6071_v37  ;;  %v6133_v35 = vld [vmem:[%s6225_s24 + $0x368] sm:$0xff]   ;;  %v6134_v36 = vld [vmem:[%s6225_s24 + $0x170] sm:$0xff]  }
  0x58   : > { %v6135_v37 = vld [vmem:[%s6225_s24 + $0x370] sm:$0xff]  }
  0x5e   : > { %5783 = vmatmul.mubr.bf16.gmra.mrb[28].mxu0 %v6072_v38  ;;  %5911 = vmatmul.mubr.bf16.gmra.mrb[28].mxu1 %v6073_v39  ;;  %v6136_v38 = vld [vmem:[%s6225_s24 + $0x178] sm:$0xff]  }
  0x5f   : > { %5786 = vmatprep.mubr.bf16.mxu0 %v6074_v40  ;;  %5914 = vmatprep.mubr.bf16.mxu1 %v6075_v41  ;;  %v6137_v39 = vld [vmem:[%s6225_s24 + $0x378] sm:$0xff]   ;;  %v6138_v40 = vld [vmem:[%s6225_s24 + $0x180] sm:$0xff]  }
  0x60   : > { %v6139_v41 = vld [vmem:[%s6225_s24 + $0x380] sm:$0xff]  }
  0x66   : > { %5787 = vmatmul.mubr.bf16.gmra.mrb[32].mxu0 %v6076_v42  ;;  %5915 = vmatmul.mubr.bf16.gmra.mrb[32].mxu1 %v6077_v43  ;;  %v6140_v42 = vld [vmem:[%s6225_s24 + $0x188] sm:$0xff]  }
  0x67   : > { %5790 = vmatprep.mubr.bf16.mxu0 %v6078_v44  ;;  %5918 = vmatprep.mubr.bf16.mxu1 %v6079_v45  ;;  %v6141_v43 = vld [vmem:[%s6225_s24 + $0x388] sm:$0xff]   ;;  %v6142_v44 = vld [vmem:[%s6225_s24 + $0x190] sm:$0xff]  }
  0x68   : > { %v6143_v45 = vld [vmem:[%s6225_s24 + $0x390] sm:$0xff]  }
  0x6e   : > { %5791 = vmatmul.mubr.bf16.gmra.mrb[36].mxu0 %v6080_v46  ;;  %5919 = vmatmul.mubr.bf16.gmra.mrb[36].mxu1 %v6081_v47  ;;  %v6144_v46 = vld [vmem:[%s6225_s24 + $0x198] sm:$0xff]  }
  0x6f   : > { %5794 = vmatprep.mubr.bf16.mxu0 %v6082_v48  ;;  %5922 = vmatprep.mubr.bf16.mxu1 %v6083_v49  ;;  %v6145_v47 = vld [vmem:[%s6225_s24 + $0x398] sm:$0xff]   ;;  %v6146_v48 = vld [vmem:[%s6225_s24 + $0x1a0] sm:$0xff]  }
  0x70   : > { %v6147_v49 = vld [vmem:[%s6225_s24 + $0x3a0] sm:$0xff]  }
  0x76   : > { %5795 = vmatmul.mubr.bf16.gmra.mrb[40].mxu0 %v6084_v50  ;;  %5923 = vmatmul.mubr.bf16.gmra.mrb[40].mxu1 %v6085_v51  ;;  %v6148_v50 = vld [vmem:[%s6225_s24 + $0x1a8] sm:$0xff]  }
  0x77   : > { %5798 = vmatprep.mubr.bf16.mxu0 %v6086_v52  ;;  %5926 = vmatprep.mubr.bf16.mxu1 %v6087_v53  ;;  %v6149_v51 = vld [vmem:[%s6225_s24 + $0x3a8] sm:$0xff]   ;;  %v6150_v52 = vld [vmem:[%s6225_s24 + $0x1b0] sm:$0xff]  }
  0x78   : > { %v6151_v53 = vld [vmem:[%s6225_s24 + $0x3b0] sm:$0xff]  }
  0x7e   : > { %5799 = vmatmul.mubr.bf16.gmra.mrb[44].mxu0 %v6088_v54  ;;  %5927 = vmatmul.mubr.bf16.gmra.mrb[44].mxu1 %v6089_v55  ;;  %v6355_v54 = vld [vmem:[%s6781_s2] ss:$0 sm:$0xff] }
  0x7f   : > { %5802 = vmatprep.mubr.bf16.mxu0 %v6090_v56  ;;  %5930 = vmatprep.mubr.bf16.mxu1 %v6091_v57 }
  0x86   : > { %5803 = vmatmul.mubr.bf16.gmra.mrb[48].mxu0 %v6092_v58  ;;  %5931 = vmatmul.mubr.bf16.gmra.mrb[48].mxu1 %v6093_v59 }
  0x87   : > { %5806 = vmatprep.mubr.bf16.mxu0 %v6094_v60  ;;  %5934 = vmatprep.mubr.bf16.mxu1 %v6095_v61  ;;  %v6152_v61 = vld [vmem:[%s6225_s24 + $0x1b8] sm:$0xff]  }
  0x8e   : > { %5807 = vmatmul.mubr.bf16.gmra.mrb[52].mxu0 %v6096_v62  ;;  %5935 = vmatmul.mubr.bf16.gmra.mrb[52].mxu1 %v6097_v63  ;;  %v6153_v62 = vld [vmem:[%s6225_s24 + $0x3b8] sm:$0xff]  }
  0x8f   : > { %5810 = vmatprep.mubr.bf16.mxu0 %v6098_v0  ;;  %5938 = vmatprep.mubr.bf16.mxu1 %v6099_v1 }
  0x96   : > { %5811 = vmatmul.mubr.bf16.gmra.mrb[56].mxu0 %v6100_v2  ;;  %5939 = vmatmul.mubr.bf16.gmra.mrb[56].mxu1 %v6101_v3  ;;  %v6154_v3 = vld [vmem:[%s6225_s24 + $0x1c0] sm:$0xff]  }
  0x97   : > { %5814 = vmatprep.mubr.bf16.mxu0 %v6102_v4  ;;  %5942 = vmatprep.mubr.bf16.mxu1 %v6103_v5  ;;  %v6155_v4 = vld [vmem:[%s6225_s24 + $0x3c0] sm:$0xff]  }
  0x9e   : > { %5815 = vmatmul.mubr.bf16.gmra.mrb[60].mxu0 %v6104_v6  ;;  %5943 = vmatmul.mubr.bf16.gmra.mrb[60].mxu1 %v6105_v7 }
  0x9f   : > { %5818 = vmatprep.mubr.bf16.mxu0 %v6106_v8  ;;  %5946 = vmatprep.mubr.bf16.mxu1 %v6107_v9 }
  0xa6   : > { %5819 = vmatmul.mubr.bf16.gmra.mrb[64].mxu0 %v6108_v10  ;;  %5947 = vmatmul.mubr.bf16.gmra.mrb[64].mxu1 %v6109_v11 }
  0xa7   : > { %5822 = vmatprep.mubr.bf16.mxu0 %v6110_v12  ;;  %5950 = vmatprep.mubr.bf16.mxu1 %v6111_v13 }
  0xae   : > { %5823 = vmatmul.mubr.bf16.gmra.mrb[68].mxu0 %v6112_v14  ;;  %5951 = vmatmul.mubr.bf16.gmra.mrb[68].mxu1 %v6113_v15 }
  0xaf   : > { %5826 = vmatprep.mubr.bf16.mxu0 %v6114_v16  ;;  %5954 = vmatprep.mubr.bf16.mxu1 %v6115_v17 }
  0xb6   : > { %5827 = vmatmul.mubr.bf16.gmra.mrb[72].mxu0 %v6116_v18  ;;  %5955 = vmatmul.mubr.bf16.gmra.mrb[72].mxu1 %v6117_v19 }
  0xb7   : > { %5830 = vmatprep.mubr.bf16.mxu0 %v6118_v20  ;;  %5958 = vmatprep.mubr.bf16.mxu1 %v6119_v21 }
  0xbe   : > { %5831 = vmatmul.mubr.bf16.gmra.mrb[76].mxu0 %v6120_v22  ;;  %5959 = vmatmul.mubr.bf16.gmra.mrb[76].mxu1 %v6121_v23 }
  0xbf   : > { %5834 = vmatprep.mubr.bf16.mxu0 %v6122_v24  ;;  %5962 = vmatprep.mubr.bf16.mxu1 %v6123_v25 }
  0xc6   : > { %5835 = vmatmul.mubr.bf16.gmra.mrb[80].mxu0 %v6124_v26  ;;  %5963 = vmatmul.mubr.bf16.gmra.mrb[80].mxu1 %v6125_v27 }
  0xc7   : > { %5838 = vmatprep.mubr.bf16.mxu0 %v6126_v28  ;;  %5966 = vmatprep.mubr.bf16.mxu1 %v6127_v29 }
  0xce   : > { %5839 = vmatmul.mubr.bf16.gmra.mrb[84].mxu0 %v6128_v30  ;;  %5967 = vmatmul.mubr.bf16.gmra.mrb[84].mxu1 %v6129_v31 }
  0xcf   : > { %5842 = vmatprep.mubr.bf16.mxu0 %v6130_v32  ;;  %5970 = vmatprep.mubr.bf16.mxu1 %v6131_v33 }
  0xd6   : > { %5843 = vmatmul.mubr.bf16.gmra.mrb[88].mxu0 %v6132_v34  ;;  %5971 = vmatmul.mubr.bf16.gmra.mrb[88].mxu1 %v6133_v35  ;;  %v6156_v35 = vld [vmem:[%s6225_s24 + $0x1c8] sm:$0xff]  }
  0xd7   : > { %5846 = vmatprep.mubr.bf16.mxu0 %v6134_v36  ;;  %5974 = vmatprep.mubr.bf16.mxu1 %v6135_v37  ;;  %v6157_v36 = vld [vmem:[%s6225_s24 + $0x3c8] sm:$0xff]  }
  0xde   : > { %5847 = vmatmul.mubr.bf16.gmra.mrb[92].mxu0 %v6136_v38  ;;  %5975 = vmatmul.mubr.bf16.gmra.mrb[92].mxu1 %v6137_v39 }
  0xdf   : > { %5850 = vmatprep.mubr.bf16.mxu0 %v6138_v40  ;;  %5978 = vmatprep.mubr.bf16.mxu1 %v6139_v41 }
  0xe6   : > { %5851 = vmatmul.mubr.bf16.gmra.mrb[96].mxu0 %v6140_v42  ;;  %5979 = vmatmul.mubr.bf16.gmra.mrb[96].mxu1 %v6141_v43  ;;  %v6158_v43 = vld [vmem:[%s6225_s24 + $0x1d0] sm:$0xff]  }
  0xe7   : > { %5854 = vmatprep.mubr.bf16.mxu0 %v6142_v44  ;;  %5982 = vmatprep.mubr.bf16.mxu1 %v6143_v45  ;;  %v6159_v44 = vld [vmem:[%s6225_s24 + $0x3d0] sm:$0xff]  }
  0xee   : > { %5855 = vmatmul.mubr.bf16.gmra.mrb[100].mxu0 %v6144_v46  ;;  %5983 = vmatmul.mubr.bf16.gmra.mrb[100].mxu1 %v6145_v47 }
  0xef   : > { %5858 = vmatprep.mubr.bf16.mxu0 %v6146_v48  ;;  %5986 = vmatprep.mubr.bf16.mxu1 %v6147_v49 }
  0xf6   : > { %5859 = vmatmul.mubr.bf16.gmra.mrb[104].mxu0 %v6148_v50  ;;  %5987 = vmatmul.mubr.bf16.gmra.mrb[104].mxu1 %v6149_v51 }
  0xf7   : > { %5862 = vmatprep.mubr.bf16.mxu0 %v6150_v52  ;;  %5990 = vmatprep.mubr.bf16.mxu1 %v6151_v53 }
  0xf9   : > { %v5756_v55 = vpop.f32.mrb[0].mxu0  ;;  %v5884_v56 = vpop.f32.mrb[0].mxu1 }
  0xfa   : > { %v1313_v57 = vadd.f32 %v5756_v55, %v6355_v54  ;;  %v1825_v58 = vadd.f32 %v5884_v56, %v6355_v54  ;;  %v1304_v59 = vpop.f32.mrb[1].mxu0  ;;  %v1816_v60 = vpop.f32.mrb[1].mxu1 }
  0xfb   : > { %v1305_v63 = vadd.f32 %v6355_v54, %v1304_v59  ;;  %v1817_v0 = vadd.f32 %v6355_v54, %v1816_v60  ;;  %v5757_v1 = vpop.f32.mrb[2].mxu0  ;;  %v5885_v2 = vpop.f32.mrb[2].mxu1 }
  0xfc   : > { %v2329_v5 = vmul.f32 0.2, %v1313_v57  ;;  %v2457_v6 = vmul.f32 0.2, %v1825_v58  ;;  %v1316_v7 = vadd.f32 %v5757_v1, %v6355_v54  ;;  %v1828_v8 = vadd.f32 %v5885_v2, %v6355_v54  ;;  %v1307_v9 = vpop.f32.mrb[3].mxu0  ;;  %v1819_v10 = vpop.f32.mrb[3].mxu1 }
  0xfd   : > { %v2327_v11 = vmul.f32 0.2, %v1305_v63  ;;  %v2455_v12 = vmul.f32 0.2, %v1817_v0  ;;  %v1308_v13 = vadd.f32 %v6355_v54, %v1307_v9  ;;  %v1820_v14 = vadd.f32 %v6355_v54, %v1819_v10 }
  0xfe   : > { %v2330_v15 = vmul.f32 0.2, %v1316_v7  ;;  %v2458_v16 = vmul.f32 0.2, %v1828_v8  ;;  %5863 = vmatmul.mubr.bf16.gmra.mrb[108].mxu0 %v6152_v61  ;;  %5991 = vmatmul.mubr.bf16.gmra.mrb[108].mxu1 %v6153_v62  ;;  %v2585_v19 = vmax.f32 %v1313_v57, %v2329_v5  ;;  %v2713_v20 = vmax.f32 %v1825_v58, %v2457_v6 }
  0xff   : > { %v2328_v17 = vmul.f32 0.2, %v1308_v13  ;;  %v2456_v18 = vmul.f32 0.2, %v1820_v14  ;;  %5866 = vmatprep.mubr.bf16.mxu0 %v6154_v3  ;;  %5994 = vmatprep.mubr.bf16.mxu1 %v6155_v4  ;;  %v2583_v23 = vmax.f32 %v1305_v63, %v2327_v11  ;;  %v2711_v24 = vmax.f32 %v1817_v0, %v2455_v12  ;;  %v6160_v12 = vld [vmem:[%s6225_s24 + $0x1d8] sm:$0xff]  }
 0x100   : > { %v2586_v21 = vmax.f32 %v1316_v7, %v2330_v15  ;;  %v2714_v22 = vmax.f32 %v1828_v8, %v2458_v16 }
 0x101   : > { %v2584_v25 = vmax.f32 %v1308_v13, %v2328_v17  ;;  %v2712_v26 = vmax.f32 %v1820_v14, %v2456_v18  ;;  %v5760_v27 = vpop.f32.mrb[4].mxu0  ;;  %v5888_v28 = vpop.f32.mrb[4].mxu1  ;;  %v6161_v13 = vld [vmem:[%s6225_s24 + $0x3d8] sm:$0xff]  }
 0x102   : > { %v4843_v29 = vpack.c.bf16 %v2586_v21, %v2585_v19  ;;  %v5163_v30 = vpack.c.bf16 %v2714_v22, %v2713_v20  ;;  %v1329_v31 = vadd.f32 %v5760_v27, %v6355_v54  ;;  %v1841_v32 = vadd.f32 %v5888_v28, %v6355_v54  ;;  %v1320_v33 = vpop.f32.mrb[5].mxu0  ;;  %v1832_v34 = vpop.f32.mrb[5].mxu1  ;;  %v6162_v20 = vld [vmem:[%s6225_s24 + $0x1e0] sm:$0xff]  }
 0x103   : > { %v4838_v37 = vpack.c.bf16 %v2584_v25, %v2583_v23  ;;  %v5158_v38 = vpack.c.bf16 %v2712_v26, %v2711_v24  ;;  %v1321_v39 = vadd.f32 %v6355_v54, %v1320_v33  ;;  %v1833_v40 = vadd.f32 %v6355_v54, %v1832_v34  ;;  %v5761_v41 = vpop.f32.mrb[6].mxu0  ;;  %v5889_v42 = vpop.f32.mrb[6].mxu1  ;;  %v6163_v21 = vld [vmem:[%s6225_s24 + $0x3e0] sm:$0xff]  }
 0x104   : > { %5475 = vst [vmem:[%s6374_s13 + $0x8] sm:$0xff] %v4843_v29   ;;  %5539 = vst [vmem:[%s6374_s13 + $0x208] sm:$0xff] %v5163_v30   ;;  %v2333_v45 = vmul.f32 0.2, %v1329_v31  ;;  %v2461_v46 = vmul.f32 0.2, %v1841_v32  ;;  %v1332_v47 = vadd.f32 %v5761_v41, %v6355_v54  ;;  %v1844_v48 = vadd.f32 %v5889_v42, %v6355_v54 }
 0x105   : > { %v1323_v49 = vpop.f32.mrb[7].mxu0  ;;  %v1835_v50 = vpop.f32.mrb[7].mxu1  ;;  %4839 = vst [vmem:[%s6374_s13] sm:$0xff] %v4838_v37   ;;  %5538 = vst [vmem:[%s6374_s13 + $0x200] sm:$0xff] %v5158_v38   ;;  %v2331_v51 = vmul.f32 0.2, %v1321_v39 }
 0x106   : > { %v2459_v52 = vmul.f32 0.2, %v1833_v40  ;;  %v1324_v53 = vadd.f32 %v6355_v54, %v1323_v49  ;;  %v1836_v55 = vadd.f32 %v6355_v54, %v1835_v50  ;;  %v2334_v56 = vmul.f32 0.2, %v1332_v47  ;;  %5867 = vmatmul.mubr.bf16.gmra.mrb[112].mxu0 %v6156_v35  ;;  %5995 = vmatmul.mubr.bf16.gmra.mrb[112].mxu1 %v6157_v36 }
 0x107   : > { %v2462_v57 = vmul.f32 0.2, %v1844_v48  ;;  %5870 = vmatprep.mubr.bf16.mxu0 %v6158_v43  ;;  %5998 = vmatprep.mubr.bf16.mxu1 %v6159_v44  ;;  %v2589_v60 = vmax.f32 %v1329_v31, %v2333_v45  ;;  %v2717_v61 = vmax.f32 %v1841_v32, %v2461_v46  ;;  %v2587_v0 = vmax.f32 %v1321_v39, %v2331_v51 }
 0x108   : > { %v2332_v58 = vmul.f32 0.2, %v1324_v53  ;;  %v2460_v59 = vmul.f32 0.2, %v1836_v55  ;;  %v2590_v62 = vmax.f32 %v1332_v47, %v2334_v56  ;;  %v2715_v1 = vmax.f32 %v1833_v40, %v2459_v52  ;;  %v6164_v52 = vld [vmem:[%s6225_s24 + $0x1e8] sm:$0xff]  }
 0x109   : > { %v2718_v63 = vmax.f32 %v1844_v48, %v2462_v57  ;;  %v5764_v4 = vpop.f32.mrb[8].mxu0  ;;  %v5892_v5 = vpop.f32.mrb[8].mxu1 }
 0x10a   : > { %v2588_v2 = vmax.f32 %v1324_v53, %v2332_v58  ;;  %v2716_v3 = vmax.f32 %v1836_v55, %v2460_v59  ;;  %v4853_v6 = vpack.c.bf16 %v2590_v62, %v2589_v60  ;;  %v1345_v8 = vadd.f32 %v5764_v4, %v6355_v54  ;;  %v1336_v10 = vpop.f32.mrb[9].mxu0  ;;  %v1848_v11 = vpop.f32.mrb[9].mxu1  ;;  %v6165_v53 = vld [vmem:[%s6225_s24 + $0x3e8] sm:$0xff]   ;;  %v6167_v62 = vld [vmem:[%s6225_s24 + $0x3f0] sm:$0xff]  }
 0x10b   : > { %v5173_v7 = vpack.c.bf16 %v2718_v63, %v2717_v61  ;;  %v1857_v9 = vadd.f32 %v5892_v5, %v6355_v54  ;;  %v1337_v16 = vadd.f32 %v6355_v54, %v1336_v10  ;;  %v1849_v17 = vadd.f32 %v6355_v54, %v1848_v11  ;;  %v5765_v18 = vpop.f32.mrb[10].mxu0  ;;  %v5893_v19 = vpop.f32.mrb[10].mxu1  ;;  %v6166_v61 = vld [vmem:[%s6225_s24 + $0x1f0] sm:$0xff]  }
 0x10c   : > { %v4848_v14 = vpack.c.bf16 %v2588_v2, %v2587_v0  ;;  %v5168_v15 = vpack.c.bf16 %v2716_v3, %v2715_v1  ;;  %5477 = vst [vmem:[%s6374_s13 + $0x18] sm:$0xff] %v4853_v6   ;;  %v2337_v22 = vmul.f32 0.2, %v1345_v8  ;;  %v1348_v24 = vadd.f32 %v5765_v18, %v6355_v54  ;;  %v1339_v26 = vpop.f32.mrb[11].mxu0  ;;  %v1851_v27 = vpop.f32.mrb[11].mxu1 }
 0x10d   : > { %5541 = vst [vmem:[%s6374_s13 + $0x218] sm:$0xff] %v5173_v7   ;;  %v2465_v23 = vmul.f32 0.2, %v1857_v9  ;;  %v1860_v25 = vadd.f32 %v5893_v19, %v6355_v54  ;;  %v2335_v28 = vmul.f32 0.2, %v1337_v16  ;;  %v1340_v30 = vadd.f32 %v6355_v54, %v1339_v26 }
 0x10e   : > { %5476 = vst [vmem:[%s6374_s13 + $0x10] sm:$0xff] %v4848_v14   ;;  %5540 = vst [vmem:[%s6374_s13 + $0x210] sm:$0xff] %v5168_v15   ;;  %v2463_v29 = vmul.f32 0.2, %v1849_v17  ;;  %v1852_v31 = vadd.f32 %v6355_v54, %v1851_v27  ;;  %v2338_v32 = vmul.f32 0.2, %v1348_v24  ;;  %5871 = vmatmul.mubr.bf16.gmra.mrb[116].mxu0 %v6160_v12  ;;  %5999 = vmatmul.mubr.bf16.gmra.mrb[116].mxu1 %v6161_v13 }
 0x10f   : > { %v2466_v33 = vmul.f32 0.2, %v1860_v25  ;;  %v2336_v34 = vmul.f32 0.2, %v1340_v30  ;;  %5874 = vmatprep.mubr.bf16.mxu0 %v6162_v20  ;;  %6002 = vmatprep.mubr.bf16.mxu1 %v6163_v21  ;;  %v2593_v36 = vmax.f32 %v1345_v8, %v2337_v22  ;;  %v2721_v37 = vmax.f32 %v1857_v9, %v2465_v23 }
 0x110   : > { %v2464_v35 = vmul.f32 0.2, %v1852_v31  ;;  %v2594_v38 = vmax.f32 %v1348_v24, %v2338_v32  ;;  %v2591_v40 = vmax.f32 %v1337_v16, %v2335_v28  ;;  %v2719_v41 = vmax.f32 %v1849_v17, %v2463_v29  ;;  %v6168_v29 = vld [vmem:[%s6225_s24 + $0x1f8] sm:$0xff]  }
 0x111   : > { %v2722_v39 = vmax.f32 %v1860_v25, %v2466_v33  ;;  %v2592_v42 = vmax.f32 %v1340_v30, %v2336_v34  ;;  %v5768_v44 = vpop.f32.mrb[12].mxu0  ;;  %v5896_v45 = vpop.f32.mrb[12].mxu1  ;;  %v6169_v30 = vld [vmem:[%s6225_s24 + $0x3f8] sm:$0xff]  }
 0x112   : > { %v2720_v43 = vmax.f32 %v1852_v31, %v2464_v35  ;;  %v4863_v46 = vpack.c.bf16 %v2594_v38, %v2593_v36  ;;  %v1361_v48 = vadd.f32 %v5768_v44, %v6355_v54  ;;  %v1873_v49 = vadd.f32 %v5896_v45, %v6355_v54  ;;  %v1352_v50 = vpop.f32.mrb[13].mxu0  ;;  %v1864_v51 = vpop.f32.mrb[13].mxu1 }
 0x113   : > { %v5183_v47 = vpack.c.bf16 %v2722_v39, %v2721_v37  ;;  %v4858_v55 = vpack.c.bf16 %v2592_v42, %v2591_v40  ;;  %v1353_v57 = vadd.f32 %v6355_v54, %v1352_v50  ;;  %v1865_v58 = vadd.f32 %v6355_v54, %v1864_v51  ;;  %v5769_v59 = vpop.f32.mrb[14].mxu0  ;;  %v5897_v60 = vpop.f32.mrb[14].mxu1 }
 0x114   : > { %v5178_v56 = vpack.c.bf16 %v2720_v43, %v2719_v41  ;;  %5479 = vst [vmem:[%s6374_s13 + $0x28] sm:$0xff] %v4863_v46   ;;  %v2341_v63 = vmul.f32 0.2, %v1361_v48  ;;  %v2469_v0 = vmul.f32 0.2, %v1873_v49  ;;  %v1364_v1 = vadd.f32 %v5769_v59, %v6355_v54  ;;  %v1355_v3 = vpop.f32.mrb[15].mxu0 }
 0x115   : > { %5543 = vst [vmem:[%s6374_s13 + $0x228] sm:$0xff] %v5183_v47   ;;  %v1876_v2 = vadd.f32 %v5897_v60, %v6355_v54  ;;  %v1867_v4 = vpop.f32.mrb[15].mxu1  ;;  %5478 = vst [vmem:[%s6374_s13 + $0x20] sm:$0xff] %v4858_v55   ;;  %v2339_v5 = vmul.f32 0.2, %v1353_v57  ;;  %v1356_v7 = vadd.f32 %v6355_v54, %v1355_v3 }
 0x116   : > { %5542 = vst [vmem:[%s6374_s13 + $0x220] sm:$0xff] %v5178_v56   ;;  %v2467_v6 = vmul.f32 0.2, %v1865_v58  ;;  %v1868_v8 = vadd.f32 %v6355_v54, %v1867_v4  ;;  %v2342_v9 = vmul.f32 0.2, %v1364_v1  ;;  %5875 = vmatmul.mubr.bf16.gmra.mrb[120].mxu0 %v6164_v52  ;;  %6003 = vmatmul.mubr.bf16.gmra.mrb[120].mxu1 %v6165_v53  ;;  %v2597_v13 = vmax.f32 %v1361_v48, %v2341_v63 }
 0x117   : > { %v2470_v10 = vmul.f32 0.2, %v1876_v2  ;;  %v2340_v11 = vmul.f32 0.2, %v1356_v7  ;;  %5878 = vmatprep.mubr.bf16.mxu0 %v6166_v61  ;;  %6006 = vmatprep.mubr.bf16.mxu1 %v6167_v62  ;;  %v2725_v14 = vmax.f32 %v1873_v49, %v2469_v0  ;;  %v2595_v17 = vmax.f32 %v1353_v57, %v2339_v5 }
 0x118   : > { %v2468_v12 = vmul.f32 0.2, %v1868_v8  ;;  %v2598_v15 = vmax.f32 %v1364_v1, %v2342_v9  ;;  %v2723_v18 = vmax.f32 %v1865_v58, %v2467_v6 }
 0x119   : > { %v2726_v16 = vmax.f32 %v1876_v2, %v2470_v10  ;;  %v2596_v19 = vmax.f32 %v1356_v7, %v2340_v11  ;;  %v5772_v21 = vpop.f32.mrb[16].mxu0  ;;  %v5900_v22 = vpop.f32.mrb[16].mxu1 }
 0x11a   : > { %v2724_v20 = vmax.f32 %v1868_v8, %v2468_v12  ;;  %v4873_v23 = vpack.c.bf16 %v2598_v15, %v2597_v13  ;;  %v1377_v25 = vadd.f32 %v5772_v21, %v6355_v54  ;;  %v1889_v26 = vadd.f32 %v5900_v22, %v6355_v54  ;;  %v1368_v27 = vpop.f32.mrb[17].mxu0  ;;  %v1880_v28 = vpop.f32.mrb[17].mxu1 }
 0x11b   : > { %v5193_v24 = vpack.c.bf16 %v2726_v16, %v2725_v14  ;;  %v4868_v31 = vpack.c.bf16 %v2596_v19, %v2595_v17  ;;  %v1369_v33 = vadd.f32 %v6355_v54, %v1368_v27  ;;  %v1881_v34 = vadd.f32 %v6355_v54, %v1880_v28  ;;  %v5773_v35 = vpop.f32.mrb[18].mxu0  ;;  %v5901_v36 = vpop.f32.mrb[18].mxu1 }
 0x11c   : > { %v5188_v32 = vpack.c.bf16 %v2724_v20, %v2723_v18  ;;  %5481 = vst [vmem:[%s6374_s13 + $0x38] sm:$0xff] %v4873_v23   ;;  %v2345_v37 = vmul.f32 0.2, %v1377_v25  ;;  %v2473_v38 = vmul.f32 0.2, %v1889_v26  ;;  %v1380_v39 = vadd.f32 %v5773_v35, %v6355_v54  ;;  %v1371_v41 = vpop.f32.mrb[19].mxu0 }
 0x11d   : > { %5545 = vst [vmem:[%s6374_s13 + $0x238] sm:$0xff] %v5193_v24   ;;  %v1892_v40 = vadd.f32 %v5901_v36, %v6355_v54  ;;  %v1883_v42 = vpop.f32.mrb[19].mxu1  ;;  %5480 = vst [vmem:[%s6374_s13 + $0x30] sm:$0xff] %v4868_v31   ;;  %v2343_v43 = vmul.f32 0.2, %v1369_v33  ;;  %v1372_v45 = vadd.f32 %v6355_v54, %v1371_v41 }
 0x11e   : > { %5544 = vst [vmem:[%s6374_s13 + $0x230] sm:$0xff] %v5188_v32   ;;  %v2471_v44 = vmul.f32 0.2, %v1881_v34  ;;  %v1884_v46 = vadd.f32 %v6355_v54, %v1883_v42  ;;  %v2346_v47 = vmul.f32 0.2, %v1380_v39  ;;  %5879 = vmatmul.mubr.bf16.gmra.mrb[124].mxu0 %v6168_v29  ;;  %6007 = vmatmul.mubr.bf16.gmra.mrb[124].mxu1 %v6169_v30  ;;  %v2601_v51 = vmax.f32 %v1377_v25, %v2345_v37 }
 0x11f   : > { %v2474_v48 = vmul.f32 0.2, %v1892_v40  ;;  %v2344_v49 = vmul.f32 0.2, %v1372_v45  ;;  %v2729_v52 = vmax.f32 %v1889_v26, %v2473_v38  ;;  %v2599_v56 = vmax.f32 %v1369_v33, %v2343_v43 }
 0x120   : > { %v2472_v50 = vmul.f32 0.2, %v1884_v46  ;;  %v2602_v53 = vmax.f32 %v1380_v39, %v2346_v47  ;;  %v2727_v57 = vmax.f32 %v1881_v34, %v2471_v44 }
 0x121   : > { %v2730_v55 = vmax.f32 %v1892_v40, %v2474_v48  ;;  %v2600_v58 = vmax.f32 %v1372_v45, %v2344_v49  ;;  %v5776_v60 = vpop.f32.mrb[20].mxu0  ;;  %v5904_v61 = vpop.f32.mrb[20].mxu1 }
 0x122   : > { %v2728_v59 = vmax.f32 %v1884_v46, %v2472_v50  ;;  %v4883_v62 = vpack.c.bf16 %v2602_v53, %v2601_v51  ;;  %v1393_v0 = vadd.f32 %v5776_v60, %v6355_v54  ;;  %v1905_v1 = vadd.f32 %v5904_v61, %v6355_v54  ;;  %v1384_v2 = vpop.f32.mrb[21].mxu0  ;;  %v1896_v3 = vpop.f32.mrb[21].mxu1 }
 0x123   : > { %v5203_v63 = vpack.c.bf16 %v2730_v55, %v2729_v52  ;;  %v4878_v4 = vpack.c.bf16 %v2600_v58, %v2599_v56  ;;  %v1385_v6 = vadd.f32 %v6355_v54, %v1384_v2  ;;  %v1897_v7 = vadd.f32 %v6355_v54, %v1896_v3  ;;  %v5777_v8 = vpop.f32.mrb[22].mxu0  ;;  %v5905_v9 = vpop.f32.mrb[22].mxu1 }
 0x124   : > { %v5198_v5 = vpack.c.bf16 %v2728_v59, %v2727_v57  ;;  %5483 = vst [vmem:[%s6374_s13 + $0x48] sm:$0xff] %v4883_v62   ;;  %v2349_v10 = vmul.f32 0.2, %v1393_v0  ;;  %v2477_v11 = vmul.f32 0.2, %v1905_v1  ;;  %v1396_v12 = vadd.f32 %v5777_v8, %v6355_v54  ;;  %v1387_v14 = vpop.f32.mrb[23].mxu0 }
 0x125   : > { %5547 = vst [vmem:[%s6374_s13 + $0x248] sm:$0xff] %v5203_v63   ;;  %v1908_v13 = vadd.f32 %v5905_v9, %v6355_v54  ;;  %v1899_v15 = vpop.f32.mrb[23].mxu1  ;;  %5482 = vst [vmem:[%s6374_s13 + $0x40] sm:$0xff] %v4878_v4   ;;  %v2347_v16 = vmul.f32 0.2, %v1385_v6  ;;  %v1388_v18 = vadd.f32 %v6355_v54, %v1387_v14 }
 0x126   : > { %5546 = vst [vmem:[%s6374_s13 + $0x240] sm:$0xff] %v5198_v5   ;;  %v2475_v17 = vmul.f32 0.2, %v1897_v7  ;;  %v1900_v19 = vadd.f32 %v6355_v54, %v1899_v15  ;;  %v2350_v20 = vmul.f32 0.2, %v1396_v12  ;;  %v2605_v24 = vmax.f32 %v1393_v0, %v2349_v10 }
 0x127   : > { %v2478_v21 = vmul.f32 0.2, %v1908_v13  ;;  %v2348_v22 = vmul.f32 0.2, %v1388_v18  ;;  %v2733_v25 = vmax.f32 %v1905_v1, %v2477_v11  ;;  %v2603_v28 = vmax.f32 %v1385_v6, %v2347_v16 }
 0x128   : > { %v2476_v23 = vmul.f32 0.2, %v1900_v19  ;;  %v2606_v26 = vmax.f32 %v1396_v12, %v2350_v20  ;;  %v2731_v29 = vmax.f32 %v1897_v7, %v2475_v17 }
 0x129   : > { %v2734_v27 = vmax.f32 %v1908_v13, %v2478_v21  ;;  %v2604_v30 = vmax.f32 %v1388_v18, %v2348_v22  ;;  %v5780_v32 = vpop.f32.mrb[24].mxu0  ;;  %v5908_v33 = vpop.f32.mrb[24].mxu1 }
 0x12a   : > { %v2732_v31 = vmax.f32 %v1900_v19, %v2476_v23  ;;  %v4893_v34 = vpack.c.bf16 %v2606_v26, %v2605_v24  ;;  %v1409_v36 = vadd.f32 %v5780_v32, %v6355_v54  ;;  %v1921_v37 = vadd.f32 %v5908_v33, %v6355_v54  ;;  %v1400_v38 = vpop.f32.mrb[25].mxu0  ;;  %v1912_v39 = vpop.f32.mrb[25].mxu1 }
 0x12b   : > { %v5213_v35 = vpack.c.bf16 %v2734_v27, %v2733_v25  ;;  %v4888_v40 = vpack.c.bf16 %v2604_v30, %v2603_v28  ;;  %v1401_v42 = vadd.f32 %v6355_v54, %v1400_v38  ;;  %v1913_v43 = vadd.f32 %v6355_v54, %v1912_v39  ;;  %v5781_v44 = vpop.f32.mrb[26].mxu0  ;;  %v5909_v45 = vpop.f32.mrb[26].mxu1 }
 0x12c   : > { %v5208_v41 = vpack.c.bf16 %v2732_v31, %v2731_v29  ;;  %5485 = vst [vmem:[%s6374_s13 + $0x58] sm:$0xff] %v4893_v34   ;;  %v2353_v46 = vmul.f32 0.2, %v1409_v36  ;;  %v2481_v47 = vmul.f32 0.2, %v1921_v37  ;;  %v1412_v48 = vadd.f32 %v5781_v44, %v6355_v54  ;;  %v1403_v50 = vpop.f32.mrb[27].mxu0 }
 0x12d   : > { %5549 = vst [vmem:[%s6374_s13 + $0x258] sm:$0xff] %v5213_v35   ;;  %v1924_v49 = vadd.f32 %v5909_v45, %v6355_v54  ;;  %v1915_v51 = vpop.f32.mrb[27].mxu1  ;;  %5484 = vst [vmem:[%s6374_s13 + $0x50] sm:$0xff] %v4888_v40   ;;  %v2351_v52 = vmul.f32 0.2, %v1401_v42  ;;  %v1404_v55 = vadd.f32 %v6355_v54, %v1403_v50 }
 0x12e   : > { %5548 = vst [vmem:[%s6374_s13 + $0x250] sm:$0xff] %v5208_v41   ;;  %v2479_v53 = vmul.f32 0.2, %v1913_v43  ;;  %v1916_v56 = vadd.f32 %v6355_v54, %v1915_v51  ;;  %v2354_v57 = vmul.f32 0.2, %v1412_v48  ;;  %v2609_v61 = vmax.f32 %v1409_v36, %v2353_v46 }
 0x12f   : > { %v2482_v58 = vmul.f32 0.2, %v1924_v49  ;;  %v2352_v59 = vmul.f32 0.2, %v1404_v55  ;;  %v2737_v62 = vmax.f32 %v1921_v37, %v2481_v47  ;;  %v2607_v1 = vmax.f32 %v1401_v42, %v2351_v52 }
 0x130   : > { %v2480_v60 = vmul.f32 0.2, %v1916_v56  ;;  %v2610_v63 = vmax.f32 %v1412_v48, %v2354_v57  ;;  %v2735_v2 = vmax.f32 %v1913_v43, %v2479_v53 }
 0x131   : > { %v2738_v0 = vmax.f32 %v1924_v49, %v2482_v58  ;;  %v2608_v3 = vmax.f32 %v1404_v55, %v2352_v59  ;;  %v5784_v5 = vpop.f32.mrb[28].mxu0  ;;  %v5912_v6 = vpop.f32.mrb[28].mxu1 }
 0x132   : > { %v2736_v4 = vmax.f32 %v1916_v56, %v2480_v60  ;;  %v4903_v7 = vpack.c.bf16 %v2610_v63, %v2609_v61  ;;  %v1425_v9 = vadd.f32 %v5784_v5, %v6355_v54  ;;  %v1937_v10 = vadd.f32 %v5912_v6, %v6355_v54  ;;  %v1416_v11 = vpop.f32.mrb[29].mxu0  ;;  %v1928_v12 = vpop.f32.mrb[29].mxu1 }
 0x133   : > { %v5223_v8 = vpack.c.bf16 %v2738_v0, %v2737_v62  ;;  %v4898_v13 = vpack.c.bf16 %v2608_v3, %v2607_v1  ;;  %v1417_v15 = vadd.f32 %v6355_v54, %v1416_v11  ;;  %v1929_v16 = vadd.f32 %v6355_v54, %v1928_v12  ;;  %v5785_v17 = vpop.f32.mrb[30].mxu0  ;;  %v5913_v18 = vpop.f32.mrb[30].mxu1 }
 0x134   : > { %v5218_v14 = vpack.c.bf16 %v2736_v4, %v2735_v2  ;;  %5487 = vst [vmem:[%s6374_s13 + $0x68] sm:$0xff] %v4903_v7   ;;  %v2357_v19 = vmul.f32 0.2, %v1425_v9  ;;  %v2485_v20 = vmul.f32 0.2, %v1937_v10  ;;  %v1428_v21 = vadd.f32 %v5785_v17, %v6355_v54  ;;  %v1419_v23 = vpop.f32.mrb[31].mxu0 }
 0x135   : > { %5551 = vst [vmem:[%s6374_s13 + $0x268] sm:$0xff] %v5223_v8   ;;  %v1940_v22 = vadd.f32 %v5913_v18, %v6355_v54  ;;  %v1931_v24 = vpop.f32.mrb[31].mxu1  ;;  %5486 = vst [vmem:[%s6374_s13 + $0x60] sm:$0xff] %v4898_v13   ;;  %v2355_v25 = vmul.f32 0.2, %v1417_v15  ;;  %v1420_v27 = vadd.f32 %v6355_v54, %v1419_v23 }
 0x136   : > { %5550 = vst [vmem:[%s6374_s13 + $0x260] sm:$0xff] %v5218_v14   ;;  %v2483_v26 = vmul.f32 0.2, %v1929_v16  ;;  %v1932_v28 = vadd.f32 %v6355_v54, %v1931_v24  ;;  %v2358_v29 = vmul.f32 0.2, %v1428_v21  ;;  %v2613_v33 = vmax.f32 %v1425_v9, %v2357_v19 }
 0x137   : > { %v2486_v30 = vmul.f32 0.2, %v1940_v22  ;;  %v2356_v31 = vmul.f32 0.2, %v1420_v27  ;;  %v2741_v34 = vmax.f32 %v1937_v10, %v2485_v20  ;;  %v2611_v37 = vmax.f32 %v1417_v15, %v2355_v25 }
 0x138   : > { %v2484_v32 = vmul.f32 0.2, %v1932_v28  ;;  %v2614_v35 = vmax.f32 %v1428_v21, %v2358_v29  ;;  %v2739_v38 = vmax.f32 %v1929_v16, %v2483_v26 }
 0x139   : > { %v2742_v36 = vmax.f32 %v1940_v22, %v2486_v30  ;;  %v2612_v39 = vmax.f32 %v1420_v27, %v2356_v31  ;;  %v5788_v41 = vpop.f32.mrb[32].mxu0  ;;  %v5916_v42 = vpop.f32.mrb[32].mxu1 }
 0x13a   : > { %v2740_v40 = vmax.f32 %v1932_v28, %v2484_v32  ;;  %v4913_v43 = vpack.c.bf16 %v2614_v35, %v2613_v33  ;;  %v1441_v45 = vadd.f32 %v5788_v41, %v6355_v54  ;;  %v1953_v46 = vadd.f32 %v5916_v42, %v6355_v54  ;;  %v1432_v47 = vpop.f32.mrb[33].mxu0  ;;  %v1944_v48 = vpop.f32.mrb[33].mxu1 }
 0x13b   : > { %v5233_v44 = vpack.c.bf16 %v2742_v36, %v2741_v34  ;;  %v4908_v49 = vpack.c.bf16 %v2612_v39, %v2611_v37  ;;  %v1433_v51 = vadd.f32 %v6355_v54, %v1432_v47  ;;  %v1945_v52 = vadd.f32 %v6355_v54, %v1944_v48  ;;  %v5789_v53 = vpop.f32.mrb[34].mxu0  ;;  %v5917_v55 = vpop.f32.mrb[34].mxu1 }
 0x13c   : > { %v5228_v50 = vpack.c.bf16 %v2740_v40, %v2739_v38  ;;  %5489 = vst [vmem:[%s6374_s13 + $0x78] sm:$0xff] %v4913_v43   ;;  %v2361_v56 = vmul.f32 0.2, %v1441_v45  ;;  %v2489_v57 = vmul.f32 0.2, %v1953_v46  ;;  %v1444_v58 = vadd.f32 %v5789_v53, %v6355_v54  ;;  %v1435_v60 = vpop.f32.mrb[35].mxu0 }
 0x13d   : > { %5553 = vst [vmem:[%s6374_s13 + $0x278] sm:$0xff] %v5233_v44   ;;  %v1956_v59 = vadd.f32 %v5917_v55, %v6355_v54  ;;  %v1947_v61 = vpop.f32.mrb[35].mxu1  ;;  %5488 = vst [vmem:[%s6374_s13 + $0x70] sm:$0xff] %v4908_v49   ;;  %v2359_v62 = vmul.f32 0.2, %v1433_v51  ;;  %v1436_v0 = vadd.f32 %v6355_v54, %v1435_v60 }
 0x13e   : > { %5552 = vst [vmem:[%s6374_s13 + $0x270] sm:$0xff] %v5228_v50   ;;  %v2487_v63 = vmul.f32 0.2, %v1945_v52  ;;  %v1948_v1 = vadd.f32 %v6355_v54, %v1947_v61  ;;  %v2362_v2 = vmul.f32 0.2, %v1444_v58  ;;  %v2617_v6 = vmax.f32 %v1441_v45, %v2361_v56 }
 0x13f   : > { %v2490_v3 = vmul.f32 0.2, %v1956_v59  ;;  %v2360_v4 = vmul.f32 0.2, %v1436_v0  ;;  %v2745_v7 = vmax.f32 %v1953_v46, %v2489_v57  ;;  %v2615_v10 = vmax.f32 %v1433_v51, %v2359_v62 }
 0x140   : > { %v2488_v5 = vmul.f32 0.2, %v1948_v1  ;;  %v2618_v8 = vmax.f32 %v1444_v58, %v2362_v2  ;;  %v2743_v11 = vmax.f32 %v1945_v52, %v2487_v63 }
 0x141   : > { %v2746_v9 = vmax.f32 %v1956_v59, %v2490_v3  ;;  %v2616_v12 = vmax.f32 %v1436_v0, %v2360_v4  ;;  %v5792_v14 = vpop.f32.mrb[36].mxu0  ;;  %v5920_v15 = vpop.f32.mrb[36].mxu1 }
 0x142   : > { %v2744_v13 = vmax.f32 %v1948_v1, %v2488_v5  ;;  %v4923_v16 = vpack.c.bf16 %v2618_v8, %v2617_v6  ;;  %v1457_v18 = vadd.f32 %v5792_v14, %v6355_v54  ;;  %v1969_v19 = vadd.f32 %v5920_v15, %v6355_v54  ;;  %v1448_v20 = vpop.f32.mrb[37].mxu0  ;;  %v1960_v21 = vpop.f32.mrb[37].mxu1 }
 0x143   : > { %v5243_v17 = vpack.c.bf16 %v2746_v9, %v2745_v7  ;;  %v4918_v22 = vpack.c.bf16 %v2616_v12, %v2615_v10  ;;  %v1449_v24 = vadd.f32 %v6355_v54, %v1448_v20  ;;  %v1961_v25 = vadd.f32 %v6355_v54, %v1960_v21  ;;  %v5793_v26 = vpop.f32.mrb[38].mxu0  ;;  %v5921_v27 = vpop.f32.mrb[38].mxu1 }
 0x144   : > { %v5238_v23 = vpack.c.bf16 %v2744_v13, %v2743_v11  ;;  %5491 = vst [vmem:[%s6374_s13 + $0x88] sm:$0xff] %v4923_v16   ;;  %v2365_v28 = vmul.f32 0.2, %v1457_v18  ;;  %v2493_v29 = vmul.f32 0.2, %v1969_v19  ;;  %v1460_v30 = vadd.f32 %v5793_v26, %v6355_v54  ;;  %v1451_v32 = vpop.f32.mrb[39].mxu0 }
 0x145   : > { %5555 = vst [vmem:[%s6374_s13 + $0x288] sm:$0xff] %v5243_v17   ;;  %v1972_v31 = vadd.f32 %v5921_v27, %v6355_v54  ;;  %v1963_v33 = vpop.f32.mrb[39].mxu1  ;;  %5490 = vst [vmem:[%s6374_s13 + $0x80] sm:$0xff] %v4918_v22   ;;  %v2363_v34 = vmul.f32 0.2, %v1449_v24  ;;  %v1452_v36 = vadd.f32 %v6355_v54, %v1451_v32 }
 0x146   : > { %5554 = vst [vmem:[%s6374_s13 + $0x280] sm:$0xff] %v5238_v23   ;;  %v2491_v35 = vmul.f32 0.2, %v1961_v25  ;;  %v1964_v37 = vadd.f32 %v6355_v54, %v1963_v33  ;;  %v2366_v38 = vmul.f32 0.2, %v1460_v30  ;;  %v2621_v42 = vmax.f32 %v1457_v18, %v2365_v28 }
 0x147   : > { %v2494_v39 = vmul.f32 0.2, %v1972_v31  ;;  %v2364_v40 = vmul.f32 0.2, %v1452_v36  ;;  %v2749_v43 = vmax.f32 %v1969_v19, %v2493_v29  ;;  %v2619_v46 = vmax.f32 %v1449_v24, %v2363_v34 }
 0x148   : > { %v2492_v41 = vmul.f32 0.2, %v1964_v37  ;;  %v2622_v44 = vmax.f32 %v1460_v30, %v2366_v38  ;;  %v2747_v47 = vmax.f32 %v1961_v25, %v2491_v35 }
 0x149   : > { %v2750_v45 = vmax.f32 %v1972_v31, %v2494_v39  ;;  %v2620_v48 = vmax.f32 %v1452_v36, %v2364_v40  ;;  %v5796_v50 = vpop.f32.mrb[40].mxu0  ;;  %v5924_v51 = vpop.f32.mrb[40].mxu1 }
 0x14a   : > { %v2748_v49 = vmax.f32 %v1964_v37, %v2492_v41  ;;  %v4933_v52 = vpack.c.bf16 %v2622_v44, %v2621_v42  ;;  %v1473_v55 = vadd.f32 %v5796_v50, %v6355_v54  ;;  %v1985_v56 = vadd.f32 %v5924_v51, %v6355_v54  ;;  %v1464_v57 = vpop.f32.mrb[41].mxu0  ;;  %v1976_v58 = vpop.f32.mrb[41].mxu1 }
 0x14b   : > { %v5253_v53 = vpack.c.bf16 %v2750_v45, %v2749_v43  ;;  %v4928_v59 = vpack.c.bf16 %v2620_v48, %v2619_v46  ;;  %v1465_v61 = vadd.f32 %v6355_v54, %v1464_v57  ;;  %v1977_v62 = vadd.f32 %v6355_v54, %v1976_v58  ;;  %v5797_v63 = vpop.f32.mrb[42].mxu0  ;;  %v5925_v0 = vpop.f32.mrb[42].mxu1 }
 0x14c   : > { %v5248_v60 = vpack.c.bf16 %v2748_v49, %v2747_v47  ;;  %5493 = vst [vmem:[%s6374_s13 + $0x98] sm:$0xff] %v4933_v52   ;;  %v2369_v1 = vmul.f32 0.2, %v1473_v55  ;;  %v2497_v2 = vmul.f32 0.2, %v1985_v56  ;;  %v1476_v3 = vadd.f32 %v5797_v63, %v6355_v54  ;;  %v1467_v5 = vpop.f32.mrb[43].mxu0 }
 0x14d   : > { %5557 = vst [vmem:[%s6374_s13 + $0x298] sm:$0xff] %v5253_v53   ;;  %v1988_v4 = vadd.f32 %v5925_v0, %v6355_v54  ;;  %v1979_v6 = vpop.f32.mrb[43].mxu1  ;;  %5492 = vst [vmem:[%s6374_s13 + $0x90] sm:$0xff] %v4928_v59   ;;  %v2367_v7 = vmul.f32 0.2, %v1465_v61  ;;  %v1468_v9 = vadd.f32 %v6355_v54, %v1467_v5 }
 0x14e   : > { %5556 = vst [vmem:[%s6374_s13 + $0x290] sm:$0xff] %v5248_v60   ;;  %v2495_v8 = vmul.f32 0.2, %v1977_v62  ;;  %v1980_v10 = vadd.f32 %v6355_v54, %v1979_v6  ;;  %v2370_v11 = vmul.f32 0.2, %v1476_v3  ;;  %v2625_v15 = vmax.f32 %v1473_v55, %v2369_v1 }
 0x14f   : > { %v2498_v12 = vmul.f32 0.2, %v1988_v4  ;;  %v2368_v13 = vmul.f32 0.2, %v1468_v9  ;;  %v2753_v16 = vmax.f32 %v1985_v56, %v2497_v2  ;;  %v2623_v19 = vmax.f32 %v1465_v61, %v2367_v7 }
 0x150   : > { %v2496_v14 = vmul.f32 0.2, %v1980_v10  ;;  %v2626_v17 = vmax.f32 %v1476_v3, %v2370_v11  ;;  %v2751_v20 = vmax.f32 %v1977_v62, %v2495_v8 }
 0x151   : > { %v2754_v18 = vmax.f32 %v1988_v4, %v2498_v12  ;;  %v2624_v21 = vmax.f32 %v1468_v9, %v2368_v13  ;;  %v5800_v23 = vpop.f32.mrb[44].mxu0  ;;  %v5928_v24 = vpop.f32.mrb[44].mxu1 }
 0x152   : > { %v2752_v22 = vmax.f32 %v1980_v10, %v2496_v14  ;;  %v4943_v25 = vpack.c.bf16 %v2626_v17, %v2625_v15  ;;  %v1489_v27 = vadd.f32 %v5800_v23, %v6355_v54  ;;  %v2001_v28 = vadd.f32 %v5928_v24, %v6355_v54  ;;  %v1480_v29 = vpop.f32.mrb[45].mxu0  ;;  %v1992_v30 = vpop.f32.mrb[45].mxu1 }
 0x153   : > { %v5263_v26 = vpack.c.bf16 %v2754_v18, %v2753_v16  ;;  %v4938_v31 = vpack.c.bf16 %v2624_v21, %v2623_v19  ;;  %v1481_v33 = vadd.f32 %v6355_v54, %v1480_v29  ;;  %v1993_v34 = vadd.f32 %v6355_v54, %v1992_v30  ;;  %v5801_v35 = vpop.f32.mrb[46].mxu0  ;;  %v5929_v36 = vpop.f32.mrb[46].mxu1 }
 0x154   : > { %v5258_v32 = vpack.c.bf16 %v2752_v22, %v2751_v20  ;;  %5495 = vst [vmem:[%s6374_s13 + $0xa8] sm:$0xff] %v4943_v25   ;;  %v2373_v37 = vmul.f32 0.2, %v1489_v27  ;;  %v2501_v38 = vmul.f32 0.2, %v2001_v28  ;;  %v1492_v39 = vadd.f32 %v5801_v35, %v6355_v54  ;;  %v1483_v41 = vpop.f32.mrb[47].mxu0 }
 0x155   : > { %5559 = vst [vmem:[%s6374_s13 + $0x2a8] sm:$0xff] %v5263_v26   ;;  %v2004_v40 = vadd.f32 %v5929_v36, %v6355_v54  ;;  %v1995_v42 = vpop.f32.mrb[47].mxu1  ;;  %5494 = vst [vmem:[%s6374_s13 + $0xa0] sm:$0xff] %v4938_v31   ;;  %v2371_v43 = vmul.f32 0.2, %v1481_v33  ;;  %v1484_v45 = vadd.f32 %v6355_v54, %v1483_v41 }
 0x156   : > { %5558 = vst [vmem:[%s6374_s13 + $0x2a0] sm:$0xff] %v5258_v32   ;;  %v2499_v44 = vmul.f32 0.2, %v1993_v34  ;;  %v1996_v46 = vadd.f32 %v6355_v54, %v1995_v42  ;;  %v2374_v47 = vmul.f32 0.2, %v1492_v39  ;;  %v2629_v51 = vmax.f32 %v1489_v27, %v2373_v37 }
 0x157   : > { %v2502_v48 = vmul.f32 0.2, %v2004_v40  ;;  %v2372_v49 = vmul.f32 0.2, %v1484_v45  ;;  %v2757_v52 = vmax.f32 %v2001_v28, %v2501_v38  ;;  %v2627_v56 = vmax.f32 %v1481_v33, %v2371_v43  ;;  %v6525_v54 = vld [vmem:[%s6781_s2] ss:$0 sm:$0xff] }
 0x158   : > { %v2500_v50 = vmul.f32 0.2, %v1996_v46  ;;  %v2630_v53 = vmax.f32 %v1492_v39, %v2374_v47  ;;  %v2755_v57 = vmax.f32 %v1993_v34, %v2499_v44 }
 0x159   : > { %v2758_v55 = vmax.f32 %v2004_v40, %v2502_v48  ;;  %v2628_v58 = vmax.f32 %v1484_v45, %v2372_v49  ;;  %v5804_v60 = vpop.f32.mrb[48].mxu0  ;;  %v5932_v61 = vpop.f32.mrb[48].mxu1 }
 0x15a   : > { %v2756_v59 = vmax.f32 %v1996_v46, %v2500_v50  ;;  %v4953_v62 = vpack.c.bf16 %v2630_v53, %v2629_v51  ;;  %v1505_v0 = vadd.f32 %v6525_v54, %v5804_v60  ;;  %v2017_v1 = vadd.f32 %v6525_v54, %v5932_v61  ;;  %v1496_v2 = vpop.f32.mrb[49].mxu0  ;;  %v2008_v3 = vpop.f32.mrb[49].mxu1 }
 0x15b   : > { %v5273_v63 = vpack.c.bf16 %v2758_v55, %v2757_v52  ;;  %v4948_v4 = vpack.c.bf16 %v2628_v58, %v2627_v56  ;;  %v1497_v6 = vadd.f32 %v6525_v54, %v1496_v2  ;;  %v2009_v7 = vadd.f32 %v6525_v54, %v2008_v3  ;;  %v5805_v8 = vpop.f32.mrb[50].mxu0  ;;  %v5933_v9 = vpop.f32.mrb[50].mxu1 }
 0x15c   : > { %v5268_v5 = vpack.c.bf16 %v2756_v59, %v2755_v57  ;;  %5497 = vst [vmem:[%s6374_s13 + $0xb8] sm:$0xff] %v4953_v62   ;;  %v2377_v10 = vmul.f32 0.2, %v1505_v0  ;;  %v2505_v11 = vmul.f32 0.2, %v2017_v1  ;;  %v1508_v12 = vadd.f32 %v6525_v54, %v5805_v8  ;;  %v1499_v14 = vpop.f32.mrb[51].mxu0 }
 0x15d   : > { %5561 = vst [vmem:[%s6374_s13 + $0x2b8] sm:$0xff] %v5273_v63   ;;  %v2020_v13 = vadd.f32 %v6525_v54, %v5933_v9  ;;  %v2011_v15 = vpop.f32.mrb[51].mxu1  ;;  %5496 = vst [vmem:[%s6374_s13 + $0xb0] sm:$0xff] %v4948_v4   ;;  %v2375_v16 = vmul.f32 0.2, %v1497_v6  ;;  %v1500_v18 = vadd.f32 %v6525_v54, %v1499_v14 }
 0x15e   : > { %5560 = vst [vmem:[%s6374_s13 + $0x2b0] sm:$0xff] %v5268_v5   ;;  %v2503_v17 = vmul.f32 0.2, %v2009_v7  ;;  %v2012_v19 = vadd.f32 %v6525_v54, %v2011_v15  ;;  %v2378_v20 = vmul.f32 0.2, %v1508_v12  ;;  %v2633_v24 = vmax.f32 %v1505_v0, %v2377_v10 }
 0x15f   : > { %v2506_v21 = vmul.f32 0.2, %v2020_v13  ;;  %v2376_v22 = vmul.f32 0.2, %v1500_v18  ;;  %v2761_v25 = vmax.f32 %v2017_v1, %v2505_v11  ;;  %v2631_v28 = vmax.f32 %v1497_v6, %v2375_v16 }
 0x160   : > { %v2504_v23 = vmul.f32 0.2, %v2012_v19  ;;  %v2634_v26 = vmax.f32 %v1508_v12, %v2378_v20  ;;  %v2759_v29 = vmax.f32 %v2009_v7, %v2503_v17 }
 0x161   : > { %v2762_v27 = vmax.f32 %v2020_v13, %v2506_v21  ;;  %v2632_v30 = vmax.f32 %v1500_v18, %v2376_v22  ;;  %v5808_v32 = vpop.f32.mrb[52].mxu0  ;;  %v5936_v33 = vpop.f32.mrb[52].mxu1 }
 0x162   : > { %v2760_v31 = vmax.f32 %v2012_v19, %v2504_v23  ;;  %v4963_v34 = vpack.c.bf16 %v2634_v26, %v2633_v24  ;;  %v1521_v36 = vadd.f32 %v6525_v54, %v5808_v32  ;;  %v2033_v37 = vadd.f32 %v6525_v54, %v5936_v33  ;;  %v1512_v38 = vpop.f32.mrb[53].mxu0  ;;  %v2024_v39 = vpop.f32.mrb[53].mxu1 }
 0x163   : > { %v5283_v35 = vpack.c.bf16 %v2762_v27, %v2761_v25  ;;  %v4958_v40 = vpack.c.bf16 %v2632_v30, %v2631_v28  ;;  %v1513_v42 = vadd.f32 %v6525_v54, %v1512_v38  ;;  %v2025_v43 = vadd.f32 %v6525_v54, %v2024_v39  ;;  %v5809_v44 = vpop.f32.mrb[54].mxu0  ;;  %v5937_v45 = vpop.f32.mrb[54].mxu1 }
 0x164   : > { %v5278_v41 = vpack.c.bf16 %v2760_v31, %v2759_v29  ;;  %5499 = vst [vmem:[%s6374_s13 + $0xc8] sm:$0xff] %v4963_v34   ;;  %v2381_v46 = vmul.f32 0.2, %v1521_v36  ;;  %v2509_v47 = vmul.f32 0.2, %v2033_v37  ;;  %v1524_v48 = vadd.f32 %v6525_v54, %v5809_v44  ;;  %v1515_v50 = vpop.f32.mrb[55].mxu0 }
 0x165   : > { %5563 = vst [vmem:[%s6374_s13 + $0x2c8] sm:$0xff] %v5283_v35   ;;  %v2036_v49 = vadd.f32 %v6525_v54, %v5937_v45  ;;  %v2027_v51 = vpop.f32.mrb[55].mxu1  ;;  %5498 = vst [vmem:[%s6374_s13 + $0xc0] sm:$0xff] %v4958_v40   ;;  %v2379_v52 = vmul.f32 0.2, %v1513_v42  ;;  %v1516_v55 = vadd.f32 %v6525_v54, %v1515_v50 }
 0x166   : > { %5562 = vst [vmem:[%s6374_s13 + $0x2c0] sm:$0xff] %v5278_v41   ;;  %v2507_v53 = vmul.f32 0.2, %v2025_v43  ;;  %v2028_v56 = vadd.f32 %v6525_v54, %v2027_v51  ;;  %v2382_v57 = vmul.f32 0.2, %v1524_v48  ;;  %v2637_v61 = vmax.f32 %v1521_v36, %v2381_v46 }
 0x167   : > { %v2510_v58 = vmul.f32 0.2, %v2036_v49  ;;  %v2380_v59 = vmul.f32 0.2, %v1516_v55  ;;  %v2765_v62 = vmax.f32 %v2033_v37, %v2509_v47  ;;  %v2635_v1 = vmax.f32 %v1513_v42, %v2379_v52 }
 0x168   : > { %v2508_v60 = vmul.f32 0.2, %v2028_v56  ;;  %v2638_v63 = vmax.f32 %v1524_v48, %v2382_v57  ;;  %v2763_v2 = vmax.f32 %v2025_v43, %v2507_v53 }
 0x169   : > { %v2766_v0 = vmax.f32 %v2036_v49, %v2510_v58  ;;  %v2636_v3 = vmax.f32 %v1516_v55, %v2380_v59  ;;  %v5812_v5 = vpop.f32.mrb[56].mxu0  ;;  %v5940_v6 = vpop.f32.mrb[56].mxu1 }
 0x16a   : > { %v2764_v4 = vmax.f32 %v2028_v56, %v2508_v60  ;;  %v4973_v7 = vpack.c.bf16 %v2638_v63, %v2637_v61  ;;  %v1537_v9 = vadd.f32 %v6525_v54, %v5812_v5  ;;  %v2049_v10 = vadd.f32 %v6525_v54, %v5940_v6  ;;  %v1528_v11 = vpop.f32.mrb[57].mxu0  ;;  %v2040_v12 = vpop.f32.mrb[57].mxu1 }
 0x16b   : > { %v5293_v8 = vpack.c.bf16 %v2766_v0, %v2765_v62  ;;  %v4968_v13 = vpack.c.bf16 %v2636_v3, %v2635_v1  ;;  %v1529_v15 = vadd.f32 %v6525_v54, %v1528_v11  ;;  %v2041_v16 = vadd.f32 %v6525_v54, %v2040_v12  ;;  %v5813_v17 = vpop.f32.mrb[58].mxu0  ;;  %v5941_v18 = vpop.f32.mrb[58].mxu1 }
 0x16c   : > { %v5288_v14 = vpack.c.bf16 %v2764_v4, %v2763_v2  ;;  %5501 = vst [vmem:[%s6374_s13 + $0xd8] sm:$0xff] %v4973_v7   ;;  %v2385_v19 = vmul.f32 0.2, %v1537_v9  ;;  %v2513_v20 = vmul.f32 0.2, %v2049_v10  ;;  %v1540_v21 = vadd.f32 %v6525_v54, %v5813_v17  ;;  %v1531_v23 = vpop.f32.mrb[59].mxu0 }
 0x16d   : > { %5565 = vst [vmem:[%s6374_s13 + $0x2d8] sm:$0xff] %v5293_v8   ;;  %v2052_v22 = vadd.f32 %v6525_v54, %v5941_v18  ;;  %v2043_v24 = vpop.f32.mrb[59].mxu1  ;;  %5500 = vst [vmem:[%s6374_s13 + $0xd0] sm:$0xff] %v4968_v13   ;;  %v2383_v25 = vmul.f32 0.2, %v1529_v15  ;;  %v1532_v27 = vadd.f32 %v6525_v54, %v1531_v23 }
 0x16e   : > { %5564 = vst [vmem:[%s6374_s13 + $0x2d0] sm:$0xff] %v5288_v14   ;;  %v2511_v26 = vmul.f32 0.2, %v2041_v16  ;;  %v2044_v28 = vadd.f32 %v6525_v54, %v2043_v24  ;;  %v2386_v29 = vmul.f32 0.2, %v1540_v21  ;;  %v2641_v33 = vmax.f32 %v1537_v9, %v2385_v19 }
 0x16f   : > { %v2514_v30 = vmul.f32 0.2, %v2052_v22  ;;  %v2384_v31 = vmul.f32 0.2, %v1532_v27  ;;  %v2769_v34 = vmax.f32 %v2049_v10, %v2513_v20  ;;  %v2639_v37 = vmax.f32 %v1529_v15, %v2383_v25 }
 0x170   : > { %v2512_v32 = vmul.f32 0.2, %v2044_v28  ;;  %v2642_v35 = vmax.f32 %v1540_v21, %v2386_v29  ;;  %v2767_v38 = vmax.f32 %v2041_v16, %v2511_v26 }
 0x171   : > { %v2770_v36 = vmax.f32 %v2052_v22, %v2514_v30  ;;  %v2640_v39 = vmax.f32 %v1532_v27, %v2384_v31  ;;  %v5816_v41 = vpop.f32.mrb[60].mxu0  ;;  %v5944_v42 = vpop.f32.mrb[60].mxu1 }
 0x172   : > { %v2768_v40 = vmax.f32 %v2044_v28, %v2512_v32  ;;  %v4983_v43 = vpack.c.bf16 %v2642_v35, %v2641_v33  ;;  %v1553_v45 = vadd.f32 %v6525_v54, %v5816_v41  ;;  %v2065_v46 = vadd.f32 %v6525_v54, %v5944_v42  ;;  %v1544_v47 = vpop.f32.mrb[61].mxu0  ;;  %v2056_v48 = vpop.f32.mrb[61].mxu1 }
 0x173   : > { %v5303_v44 = vpack.c.bf16 %v2770_v36, %v2769_v34  ;;  %v4978_v49 = vpack.c.bf16 %v2640_v39, %v2639_v37  ;;  %v1545_v51 = vadd.f32 %v6525_v54, %v1544_v47  ;;  %v2057_v52 = vadd.f32 %v6525_v54, %v2056_v48  ;;  %v5817_v53 = vpop.f32.mrb[62].mxu0  ;;  %v5945_v55 = vpop.f32.mrb[62].mxu1 }
 0x174   : > { %v5298_v50 = vpack.c.bf16 %v2768_v40, %v2767_v38  ;;  %5503 = vst [vmem:[%s6374_s13 + $0xe8] sm:$0xff] %v4983_v43   ;;  %v2389_v56 = vmul.f32 0.2, %v1553_v45  ;;  %v2517_v57 = vmul.f32 0.2, %v2065_v46  ;;  %v1556_v58 = vadd.f32 %v6525_v54, %v5817_v53  ;;  %v1547_v60 = vpop.f32.mrb[63].mxu0 }
 0x175   : > { %5567 = vst [vmem:[%s6374_s13 + $0x2e8] sm:$0xff] %v5303_v44   ;;  %v2068_v59 = vadd.f32 %v6525_v54, %v5945_v55  ;;  %v2059_v61 = vpop.f32.mrb[63].mxu1  ;;  %5502 = vst [vmem:[%s6374_s13 + $0xe0] sm:$0xff] %v4978_v49   ;;  %v2387_v62 = vmul.f32 0.2, %v1545_v51  ;;  %v1548_v0 = vadd.f32 %v6525_v54, %v1547_v60 }
 0x176   : > { %5566 = vst [vmem:[%s6374_s13 + $0x2e0] sm:$0xff] %v5298_v50   ;;  %v2515_v63 = vmul.f32 0.2, %v2057_v52  ;;  %v2060_v1 = vadd.f32 %v6525_v54, %v2059_v61  ;;  %v2390_v2 = vmul.f32 0.2, %v1556_v58  ;;  %v2645_v6 = vmax.f32 %v1553_v45, %v2389_v56 }
 0x177   : > { %v2518_v3 = vmul.f32 0.2, %v2068_v59  ;;  %v2388_v4 = vmul.f32 0.2, %v1548_v0  ;;  %v2773_v7 = vmax.f32 %v2065_v46, %v2517_v57  ;;  %v2643_v10 = vmax.f32 %v1545_v51, %v2387_v62 }
 0x178   : > { %v2516_v5 = vmul.f32 0.2, %v2060_v1  ;;  %v2646_v8 = vmax.f32 %v1556_v58, %v2390_v2  ;;  %v2771_v11 = vmax.f32 %v2057_v52, %v2515_v63 }
 0x179   : > { %v2774_v9 = vmax.f32 %v2068_v59, %v2518_v3  ;;  %v2644_v12 = vmax.f32 %v1548_v0, %v2388_v4  ;;  %v5820_v14 = vpop.f32.mrb[64].mxu0  ;;  %v5948_v15 = vpop.f32.mrb[64].mxu1 }
 0x17a   : > { %v2772_v13 = vmax.f32 %v2060_v1, %v2516_v5  ;;  %v4993_v16 = vpack.c.bf16 %v2646_v8, %v2645_v6  ;;  %v1569_v18 = vadd.f32 %v6525_v54, %v5820_v14  ;;  %v2081_v19 = vadd.f32 %v6525_v54, %v5948_v15  ;;  %v1560_v20 = vpop.f32.mrb[65].mxu0  ;;  %v2072_v21 = vpop.f32.mrb[65].mxu1 }
 0x17b   : > { %v5313_v17 = vpack.c.bf16 %v2774_v9, %v2773_v7  ;;  %v4988_v22 = vpack.c.bf16 %v2644_v12, %v2643_v10  ;;  %v1561_v24 = vadd.f32 %v6525_v54, %v1560_v20  ;;  %v2073_v25 = vadd.f32 %v6525_v54, %v2072_v21  ;;  %v5821_v26 = vpop.f32.mrb[66].mxu0  ;;  %v5949_v27 = vpop.f32.mrb[66].mxu1 }
 0x17c   : > { %v5308_v23 = vpack.c.bf16 %v2772_v13, %v2771_v11  ;;  %5505 = vst [vmem:[%s6374_s13 + $0xf8] sm:$0xff] %v4993_v16   ;;  %v2393_v28 = vmul.f32 0.2, %v1569_v18  ;;  %v2521_v29 = vmul.f32 0.2, %v2081_v19  ;;  %v1572_v30 = vadd.f32 %v6525_v54, %v5821_v26  ;;  %v1563_v32 = vpop.f32.mrb[67].mxu0 }
 0x17d   : > { %5569 = vst [vmem:[%s6374_s13 + $0x2f8] sm:$0xff] %v5313_v17   ;;  %v2084_v31 = vadd.f32 %v6525_v54, %v5949_v27  ;;  %v2075_v33 = vpop.f32.mrb[67].mxu1  ;;  %5504 = vst [vmem:[%s6374_s13 + $0xf0] sm:$0xff] %v4988_v22   ;;  %v2391_v34 = vmul.f32 0.2, %v1561_v24  ;;  %v1564_v36 = vadd.f32 %v6525_v54, %v1563_v32 }
 0x17e   : > { %5568 = vst [vmem:[%s6374_s13 + $0x2f0] sm:$0xff] %v5308_v23   ;;  %v2519_v35 = vmul.f32 0.2, %v2073_v25  ;;  %v2076_v37 = vadd.f32 %v6525_v54, %v2075_v33  ;;  %v2394_v38 = vmul.f32 0.2, %v1572_v30  ;;  %v2649_v42 = vmax.f32 %v1569_v18, %v2393_v28 }
 0x17f   : > { %v2522_v39 = vmul.f32 0.2, %v2084_v31  ;;  %v2392_v40 = vmul.f32 0.2, %v1564_v36  ;;  %v2777_v43 = vmax.f32 %v2081_v19, %v2521_v29  ;;  %v2647_v46 = vmax.f32 %v1561_v24, %v2391_v34 }
 0x180   : > { %v2520_v41 = vmul.f32 0.2, %v2076_v37  ;;  %v2650_v44 = vmax.f32 %v1572_v30, %v2394_v38  ;;  %v2775_v47 = vmax.f32 %v2073_v25, %v2519_v35 }
 0x181   : > { %v2778_v45 = vmax.f32 %v2084_v31, %v2522_v39  ;;  %v2648_v48 = vmax.f32 %v1564_v36, %v2392_v40  ;;  %v5824_v50 = vpop.f32.mrb[68].mxu0  ;;  %v5952_v51 = vpop.f32.mrb[68].mxu1 }
 0x182   : > { %v2776_v49 = vmax.f32 %v2076_v37, %v2520_v41  ;;  %v5003_v52 = vpack.c.bf16 %v2650_v44, %v2649_v42  ;;  %v1585_v55 = vadd.f32 %v6525_v54, %v5824_v50  ;;  %v2097_v56 = vadd.f32 %v6525_v54, %v5952_v51  ;;  %v1576_v57 = vpop.f32.mrb[69].mxu0  ;;  %v2088_v58 = vpop.f32.mrb[69].mxu1 }
 0x183   : > { %v5323_v53 = vpack.c.bf16 %v2778_v45, %v2777_v43  ;;  %v4998_v59 = vpack.c.bf16 %v2648_v48, %v2647_v46  ;;  %v1577_v61 = vadd.f32 %v6525_v54, %v1576_v57  ;;  %v2089_v62 = vadd.f32 %v6525_v54, %v2088_v58  ;;  %v5825_v63 = vpop.f32.mrb[70].mxu0  ;;  %v5953_v0 = vpop.f32.mrb[70].mxu1 }
 0x184   : > { %v5318_v60 = vpack.c.bf16 %v2776_v49, %v2775_v47  ;;  %5507 = vst [vmem:[%s6374_s13 + $0x108] sm:$0xff] %v5003_v52   ;;  %v2397_v1 = vmul.f32 0.2, %v1585_v55  ;;  %v2525_v2 = vmul.f32 0.2, %v2097_v56  ;;  %v1588_v3 = vadd.f32 %v6525_v54, %v5825_v63  ;;  %v1579_v5 = vpop.f32.mrb[71].mxu0 }
 0x185   : > { %5571 = vst [vmem:[%s6374_s13 + $0x308] sm:$0xff] %v5323_v53   ;;  %v2100_v4 = vadd.f32 %v6525_v54, %v5953_v0  ;;  %v2091_v6 = vpop.f32.mrb[71].mxu1  ;;  %5506 = vst [vmem:[%s6374_s13 + $0x100] sm:$0xff] %v4998_v59   ;;  %v2395_v7 = vmul.f32 0.2, %v1577_v61  ;;  %v1580_v9 = vadd.f32 %v6525_v54, %v1579_v5 }
 0x186   : > { %5570 = vst [vmem:[%s6374_s13 + $0x300] sm:$0xff] %v5318_v60   ;;  %v2523_v8 = vmul.f32 0.2, %v2089_v62  ;;  %v2092_v10 = vadd.f32 %v6525_v54, %v2091_v6  ;;  %v2398_v11 = vmul.f32 0.2, %v1588_v3  ;;  %v2653_v15 = vmax.f32 %v1585_v55, %v2397_v1 }
 0x187   : > { %v2526_v12 = vmul.f32 0.2, %v2100_v4  ;;  %v2396_v13 = vmul.f32 0.2, %v1580_v9  ;;  %v2781_v16 = vmax.f32 %v2097_v56, %v2525_v2  ;;  %v2651_v19 = vmax.f32 %v1577_v61, %v2395_v7 }
 0x188   : > { %v2524_v14 = vmul.f32 0.2, %v2092_v10  ;;  %v2654_v17 = vmax.f32 %v1588_v3, %v2398_v11  ;;  %v2779_v20 = vmax.f32 %v2089_v62, %v2523_v8 }
 0x189   : > { %v2782_v18 = vmax.f32 %v2100_v4, %v2526_v12  ;;  %v2652_v21 = vmax.f32 %v1580_v9, %v2396_v13  ;;  %v5828_v23 = vpop.f32.mrb[72].mxu0  ;;  %v5956_v24 = vpop.f32.mrb[72].mxu1 }
 0x18a   : > { %v2780_v22 = vmax.f32 %v2092_v10, %v2524_v14  ;;  %v5013_v25 = vpack.c.bf16 %v2654_v17, %v2653_v15  ;;  %v1601_v27 = vadd.f32 %v6525_v54, %v5828_v23  ;;  %v2113_v28 = vadd.f32 %v6525_v54, %v5956_v24  ;;  %v1592_v29 = vpop.f32.mrb[73].mxu0  ;;  %v2104_v30 = vpop.f32.mrb[73].mxu1 }
 0x18b   : > { %v5333_v26 = vpack.c.bf16 %v2782_v18, %v2781_v16  ;;  %v5008_v31 = vpack.c.bf16 %v2652_v21, %v2651_v19  ;;  %v1593_v33 = vadd.f32 %v6525_v54, %v1592_v29  ;;  %v2105_v34 = vadd.f32 %v6525_v54, %v2104_v30  ;;  %v5829_v35 = vpop.f32.mrb[74].mxu0  ;;  %v5957_v36 = vpop.f32.mrb[74].mxu1 }
 0x18c   : > { %v5328_v32 = vpack.c.bf16 %v2780_v22, %v2779_v20  ;;  %5509 = vst [vmem:[%s6374_s13 + $0x118] sm:$0xff] %v5013_v25   ;;  %v2401_v37 = vmul.f32 0.2, %v1601_v27  ;;  %v2529_v38 = vmul.f32 0.2, %v2113_v28  ;;  %v1604_v39 = vadd.f32 %v6525_v54, %v5829_v35  ;;  %v1595_v41 = vpop.f32.mrb[75].mxu0 }
 0x18d   : > { %5573 = vst [vmem:[%s6374_s13 + $0x318] sm:$0xff] %v5333_v26   ;;  %v2116_v40 = vadd.f32 %v6525_v54, %v5957_v36  ;;  %v2107_v42 = vpop.f32.mrb[75].mxu1  ;;  %5508 = vst [vmem:[%s6374_s13 + $0x110] sm:$0xff] %v5008_v31   ;;  %v2399_v43 = vmul.f32 0.2, %v1593_v33  ;;  %v1596_v45 = vadd.f32 %v6525_v54, %v1595_v41 }
 0x18e   : > { %5572 = vst [vmem:[%s6374_s13 + $0x310] sm:$0xff] %v5328_v32   ;;  %v2527_v44 = vmul.f32 0.2, %v2105_v34  ;;  %v2108_v46 = vadd.f32 %v6525_v54, %v2107_v42  ;;  %v2402_v47 = vmul.f32 0.2, %v1604_v39  ;;  %v2657_v51 = vmax.f32 %v1601_v27, %v2401_v37 }
 0x18f   : > { %v2530_v48 = vmul.f32 0.2, %v2116_v40  ;;  %v2400_v49 = vmul.f32 0.2, %v1596_v45  ;;  %v2785_v52 = vmax.f32 %v2113_v28, %v2529_v38  ;;  %v2655_v56 = vmax.f32 %v1593_v33, %v2399_v43 }
 0x190   : > { %v2528_v50 = vmul.f32 0.2, %v2108_v46  ;;  %v2658_v53 = vmax.f32 %v1604_v39, %v2402_v47  ;;  %v2783_v57 = vmax.f32 %v2105_v34, %v2527_v44 }
 0x191   : > { %v2786_v55 = vmax.f32 %v2116_v40, %v2530_v48  ;;  %v2656_v58 = vmax.f32 %v1596_v45, %v2400_v49  ;;  %v5832_v60 = vpop.f32.mrb[76].mxu0  ;;  %v5960_v61 = vpop.f32.mrb[76].mxu1 }
 0x192   : > { %v2784_v59 = vmax.f32 %v2108_v46, %v2528_v50  ;;  %v5023_v62 = vpack.c.bf16 %v2658_v53, %v2657_v51  ;;  %v1617_v0 = vadd.f32 %v6525_v54, %v5832_v60  ;;  %v2129_v1 = vadd.f32 %v6525_v54, %v5960_v61  ;;  %v1608_v2 = vpop.f32.mrb[77].mxu0  ;;  %v2120_v3 = vpop.f32.mrb[77].mxu1 }
 0x193   : > { %v5343_v63 = vpack.c.bf16 %v2786_v55, %v2785_v52  ;;  %v5018_v4 = vpack.c.bf16 %v2656_v58, %v2655_v56  ;;  %v1609_v6 = vadd.f32 %v6525_v54, %v1608_v2  ;;  %v2121_v7 = vadd.f32 %v6525_v54, %v2120_v3  ;;  %v5833_v8 = vpop.f32.mrb[78].mxu0  ;;  %v5961_v9 = vpop.f32.mrb[78].mxu1 }
 0x194   : > { %v5338_v5 = vpack.c.bf16 %v2784_v59, %v2783_v57  ;;  %5511 = vst [vmem:[%s6374_s13 + $0x128] sm:$0xff] %v5023_v62   ;;  %v2405_v10 = vmul.f32 0.2, %v1617_v0  ;;  %v2533_v11 = vmul.f32 0.2, %v2129_v1  ;;  %v1620_v12 = vadd.f32 %v6525_v54, %v5833_v8  ;;  %v1611_v14 = vpop.f32.mrb[79].mxu0 }
 0x195   : > { %5575 = vst [vmem:[%s6374_s13 + $0x328] sm:$0xff] %v5343_v63   ;;  %v2132_v13 = vadd.f32 %v6525_v54, %v5961_v9  ;;  %v2123_v15 = vpop.f32.mrb[79].mxu1  ;;  %5510 = vst [vmem:[%s6374_s13 + $0x120] sm:$0xff] %v5018_v4   ;;  %v2403_v16 = vmul.f32 0.2, %v1609_v6  ;;  %v1612_v18 = vadd.f32 %v6525_v54, %v1611_v14 }
 0x196   : > { %5574 = vst [vmem:[%s6374_s13 + $0x320] sm:$0xff] %v5338_v5   ;;  %v2531_v17 = vmul.f32 0.2, %v2121_v7  ;;  %v2124_v19 = vadd.f32 %v6525_v54, %v2123_v15  ;;  %v2406_v20 = vmul.f32 0.2, %v1620_v12  ;;  %v2661_v24 = vmax.f32 %v1617_v0, %v2405_v10 }
 0x197   : > { %v2534_v21 = vmul.f32 0.2, %v2132_v13  ;;  %v2404_v22 = vmul.f32 0.2, %v1612_v18  ;;  %v2789_v25 = vmax.f32 %v2129_v1, %v2533_v11  ;;  %v2659_v28 = vmax.f32 %v1609_v6, %v2403_v16 }
 0x198   : > { %v2532_v23 = vmul.f32 0.2, %v2124_v19  ;;  %v2662_v26 = vmax.f32 %v1620_v12, %v2406_v20  ;;  %v2787_v29 = vmax.f32 %v2121_v7, %v2531_v17 }
 0x199   : > { %v2790_v27 = vmax.f32 %v2132_v13, %v2534_v21  ;;  %v2660_v30 = vmax.f32 %v1612_v18, %v2404_v22  ;;  %v5836_v32 = vpop.f32.mrb[80].mxu0  ;;  %v5964_v33 = vpop.f32.mrb[80].mxu1 }
 0x19a   : > { %v2788_v31 = vmax.f32 %v2124_v19, %v2532_v23  ;;  %v5033_v34 = vpack.c.bf16 %v2662_v26, %v2661_v24  ;;  %v1633_v36 = vadd.f32 %v6525_v54, %v5836_v32  ;;  %v2145_v37 = vadd.f32 %v6525_v54, %v5964_v33  ;;  %v1624_v38 = vpop.f32.mrb[81].mxu0  ;;  %v2136_v39 = vpop.f32.mrb[81].mxu1 }
 0x19b   : > { %v5353_v35 = vpack.c.bf16 %v2790_v27, %v2789_v25  ;;  %v5028_v40 = vpack.c.bf16 %v2660_v30, %v2659_v28  ;;  %v1625_v42 = vadd.f32 %v6525_v54, %v1624_v38  ;;  %v2137_v43 = vadd.f32 %v6525_v54, %v2136_v39  ;;  %v5837_v44 = vpop.f32.mrb[82].mxu0  ;;  %v5965_v45 = vpop.f32.mrb[82].mxu1 }
 0x19c   : > { %v5348_v41 = vpack.c.bf16 %v2788_v31, %v2787_v29  ;;  %5513 = vst [vmem:[%s6374_s13 + $0x138] sm:$0xff] %v5033_v34   ;;  %v2409_v46 = vmul.f32 0.2, %v1633_v36  ;;  %v2537_v47 = vmul.f32 0.2, %v2145_v37  ;;  %v1636_v48 = vadd.f32 %v6525_v54, %v5837_v44  ;;  %v1627_v50 = vpop.f32.mrb[83].mxu0 }
 0x19d   : > { %5577 = vst [vmem:[%s6374_s13 + $0x338] sm:$0xff] %v5353_v35   ;;  %v2148_v49 = vadd.f32 %v6525_v54, %v5965_v45  ;;  %v2139_v51 = vpop.f32.mrb[83].mxu1  ;;  %5512 = vst [vmem:[%s6374_s13 + $0x130] sm:$0xff] %v5028_v40   ;;  %v2407_v52 = vmul.f32 0.2, %v1625_v42  ;;  %v1628_v55 = vadd.f32 %v6525_v54, %v1627_v50 }
 0x19e   : > { %5576 = vst [vmem:[%s6374_s13 + $0x330] sm:$0xff] %v5348_v41   ;;  %v2535_v53 = vmul.f32 0.2, %v2137_v43  ;;  %v2140_v56 = vadd.f32 %v6525_v54, %v2139_v51  ;;  %v2410_v57 = vmul.f32 0.2, %v1636_v48  ;;  %v2665_v61 = vmax.f32 %v1633_v36, %v2409_v46 }
 0x19f   : > { %v2538_v58 = vmul.f32 0.2, %v2148_v49  ;;  %v2408_v59 = vmul.f32 0.2, %v1628_v55  ;;  %v2793_v62 = vmax.f32 %v2145_v37, %v2537_v47  ;;  %v2663_v1 = vmax.f32 %v1625_v42, %v2407_v52 }
 0x1a0   : > { %v2536_v60 = vmul.f32 0.2, %v2140_v56  ;;  %v2666_v63 = vmax.f32 %v1636_v48, %v2410_v57  ;;  %v2791_v2 = vmax.f32 %v2137_v43, %v2535_v53 }
 0x1a1   : > { %v2794_v0 = vmax.f32 %v2148_v49, %v2538_v58  ;;  %v2664_v3 = vmax.f32 %v1628_v55, %v2408_v59  ;;  %v5840_v5 = vpop.f32.mrb[84].mxu0  ;;  %v5968_v6 = vpop.f32.mrb[84].mxu1 }
 0x1a2   : > { %v2792_v4 = vmax.f32 %v2140_v56, %v2536_v60  ;;  %v5043_v7 = vpack.c.bf16 %v2666_v63, %v2665_v61  ;;  %v1649_v9 = vadd.f32 %v6525_v54, %v5840_v5  ;;  %v2161_v10 = vadd.f32 %v6525_v54, %v5968_v6  ;;  %v1640_v11 = vpop.f32.mrb[85].mxu0  ;;  %v2152_v12 = vpop.f32.mrb[85].mxu1 }
 0x1a3   : > { %v5363_v8 = vpack.c.bf16 %v2794_v0, %v2793_v62  ;;  %v5038_v13 = vpack.c.bf16 %v2664_v3, %v2663_v1  ;;  %v1641_v15 = vadd.f32 %v6525_v54, %v1640_v11  ;;  %v2153_v16 = vadd.f32 %v6525_v54, %v2152_v12  ;;  %v5841_v17 = vpop.f32.mrb[86].mxu0  ;;  %v5969_v18 = vpop.f32.mrb[86].mxu1 }
 0x1a4   : > { %v5358_v14 = vpack.c.bf16 %v2792_v4, %v2791_v2  ;;  %5515 = vst [vmem:[%s6374_s13 + $0x148] sm:$0xff] %v5043_v7   ;;  %v2413_v19 = vmul.f32 0.2, %v1649_v9  ;;  %v2541_v20 = vmul.f32 0.2, %v2161_v10  ;;  %v1652_v21 = vadd.f32 %v6525_v54, %v5841_v17  ;;  %v1643_v23 = vpop.f32.mrb[87].mxu0 }
 0x1a5   : > { %5579 = vst [vmem:[%s6374_s13 + $0x348] sm:$0xff] %v5363_v8   ;;  %v2164_v22 = vadd.f32 %v6525_v54, %v5969_v18  ;;  %v2155_v24 = vpop.f32.mrb[87].mxu1  ;;  %5514 = vst [vmem:[%s6374_s13 + $0x140] sm:$0xff] %v5038_v13   ;;  %v2411_v25 = vmul.f32 0.2, %v1641_v15  ;;  %v1644_v27 = vadd.f32 %v6525_v54, %v1643_v23 }
 0x1a6   : > { %5578 = vst [vmem:[%s6374_s13 + $0x340] sm:$0xff] %v5358_v14   ;;  %v2539_v26 = vmul.f32 0.2, %v2153_v16  ;;  %v2156_v28 = vadd.f32 %v6525_v54, %v2155_v24  ;;  %v2414_v29 = vmul.f32 0.2, %v1652_v21  ;;  %v2669_v33 = vmax.f32 %v1649_v9, %v2413_v19 }
 0x1a7   : > { %v2542_v30 = vmul.f32 0.2, %v2164_v22  ;;  %v2412_v31 = vmul.f32 0.2, %v1644_v27  ;;  %v2797_v34 = vmax.f32 %v2161_v10, %v2541_v20  ;;  %v2667_v37 = vmax.f32 %v1641_v15, %v2411_v25 }
 0x1a8   : > { %v2540_v32 = vmul.f32 0.2, %v2156_v28  ;;  %v2670_v35 = vmax.f32 %v1652_v21, %v2414_v29  ;;  %v2795_v38 = vmax.f32 %v2153_v16, %v2539_v26 }
 0x1a9   : > { %v2798_v36 = vmax.f32 %v2164_v22, %v2542_v30  ;;  %v2668_v39 = vmax.f32 %v1644_v27, %v2412_v31  ;;  %v5844_v41 = vpop.f32.mrb[88].mxu0  ;;  %v5972_v42 = vpop.f32.mrb[88].mxu1 }
 0x1aa   : > { %v2796_v40 = vmax.f32 %v2156_v28, %v2540_v32  ;;  %v5053_v43 = vpack.c.bf16 %v2670_v35, %v2669_v33  ;;  %v1665_v45 = vadd.f32 %v6525_v54, %v5844_v41  ;;  %v2177_v46 = vadd.f32 %v6525_v54, %v5972_v42  ;;  %v1656_v47 = vpop.f32.mrb[89].mxu0  ;;  %v2168_v48 = vpop.f32.mrb[89].mxu1 }
 0x1ab   : > { %v5373_v44 = vpack.c.bf16 %v2798_v36, %v2797_v34  ;;  %v5048_v49 = vpack.c.bf16 %v2668_v39, %v2667_v37  ;;  %v1657_v51 = vadd.f32 %v6525_v54, %v1656_v47  ;;  %v2169_v52 = vadd.f32 %v6525_v54, %v2168_v48  ;;  %v5845_v53 = vpop.f32.mrb[90].mxu0  ;;  %v5973_v55 = vpop.f32.mrb[90].mxu1 }
 0x1ac   : > { %v5368_v50 = vpack.c.bf16 %v2796_v40, %v2795_v38  ;;  %5517 = vst [vmem:[%s6374_s13 + $0x158] sm:$0xff] %v5053_v43   ;;  %v2417_v56 = vmul.f32 0.2, %v1665_v45  ;;  %v2545_v57 = vmul.f32 0.2, %v2177_v46  ;;  %v1668_v58 = vadd.f32 %v6525_v54, %v5845_v53  ;;  %v1659_v60 = vpop.f32.mrb[91].mxu0 }
 0x1ad   : > { %5581 = vst [vmem:[%s6374_s13 + $0x358] sm:$0xff] %v5373_v44   ;;  %v2180_v59 = vadd.f32 %v6525_v54, %v5973_v55  ;;  %v2171_v61 = vpop.f32.mrb[91].mxu1  ;;  %5516 = vst [vmem:[%s6374_s13 + $0x150] sm:$0xff] %v5048_v49   ;;  %v2415_v62 = vmul.f32 0.2, %v1657_v51  ;;  %v1660_v0 = vadd.f32 %v6525_v54, %v1659_v60 }
 0x1ae   : > { %5580 = vst [vmem:[%s6374_s13 + $0x350] sm:$0xff] %v5368_v50   ;;  %v2543_v63 = vmul.f32 0.2, %v2169_v52  ;;  %v2172_v1 = vadd.f32 %v6525_v54, %v2171_v61  ;;  %v2418_v2 = vmul.f32 0.2, %v1668_v58  ;;  %v2673_v6 = vmax.f32 %v1665_v45, %v2417_v56 }
 0x1af   : > { %v2546_v3 = vmul.f32 0.2, %v2180_v59  ;;  %v2416_v4 = vmul.f32 0.2, %v1660_v0  ;;  %v2801_v7 = vmax.f32 %v2177_v46, %v2545_v57  ;;  %v2671_v10 = vmax.f32 %v1657_v51, %v2415_v62 }
 0x1b0   : > { %v2544_v5 = vmul.f32 0.2, %v2172_v1  ;;  %v2674_v8 = vmax.f32 %v1668_v58, %v2418_v2  ;;  %v2799_v11 = vmax.f32 %v2169_v52, %v2543_v63 }
 0x1b1   : > { %v2802_v9 = vmax.f32 %v2180_v59, %v2546_v3  ;;  %v2672_v12 = vmax.f32 %v1660_v0, %v2416_v4  ;;  %v5848_v14 = vpop.f32.mrb[92].mxu0  ;;  %v5976_v15 = vpop.f32.mrb[92].mxu1 }
 0x1b2   : > { %v2800_v13 = vmax.f32 %v2172_v1, %v2544_v5  ;;  %v5063_v16 = vpack.c.bf16 %v2674_v8, %v2673_v6  ;;  %v1681_v18 = vadd.f32 %v6525_v54, %v5848_v14  ;;  %v2193_v19 = vadd.f32 %v6525_v54, %v5976_v15  ;;  %v1672_v20 = vpop.f32.mrb[93].mxu0  ;;  %v2184_v21 = vpop.f32.mrb[93].mxu1 }
 0x1b3   : > { %v5383_v17 = vpack.c.bf16 %v2802_v9, %v2801_v7  ;;  %v5058_v22 = vpack.c.bf16 %v2672_v12, %v2671_v10  ;;  %v1673_v24 = vadd.f32 %v6525_v54, %v1672_v20  ;;  %v2185_v25 = vadd.f32 %v6525_v54, %v2184_v21  ;;  %v5849_v26 = vpop.f32.mrb[94].mxu0  ;;  %v5977_v27 = vpop.f32.mrb[94].mxu1 }
 0x1b4   : > { %v5378_v23 = vpack.c.bf16 %v2800_v13, %v2799_v11  ;;  %5519 = vst [vmem:[%s6374_s13 + $0x168] sm:$0xff] %v5063_v16   ;;  %v2421_v28 = vmul.f32 0.2, %v1681_v18  ;;  %v2549_v29 = vmul.f32 0.2, %v2193_v19  ;;  %v1684_v30 = vadd.f32 %v6525_v54, %v5849_v26  ;;  %v1675_v32 = vpop.f32.mrb[95].mxu0 }
 0x1b5   : > { %5583 = vst [vmem:[%s6374_s13 + $0x368] sm:$0xff] %v5383_v17   ;;  %v2196_v31 = vadd.f32 %v6525_v54, %v5977_v27  ;;  %v2187_v33 = vpop.f32.mrb[95].mxu1  ;;  %5518 = vst [vmem:[%s6374_s13 + $0x160] sm:$0xff] %v5058_v22   ;;  %v2419_v34 = vmul.f32 0.2, %v1673_v24  ;;  %v1676_v36 = vadd.f32 %v6525_v54, %v1675_v32 }
 0x1b6   : > { %5582 = vst [vmem:[%s6374_s13 + $0x360] sm:$0xff] %v5378_v23   ;;  %v2547_v35 = vmul.f32 0.2, %v2185_v25  ;;  %v2188_v37 = vadd.f32 %v6525_v54, %v2187_v33  ;;  %v2422_v38 = vmul.f32 0.2, %v1684_v30  ;;  %v2677_v42 = vmax.f32 %v1681_v18, %v2421_v28 }
 0x1b7   : > { %v2550_v39 = vmul.f32 0.2, %v2196_v31  ;;  %v2420_v40 = vmul.f32 0.2, %v1676_v36  ;;  %v2805_v43 = vmax.f32 %v2193_v19, %v2549_v29  ;;  %v2675_v46 = vmax.f32 %v1673_v24, %v2419_v34 }
 0x1b8   : > { %v2548_v41 = vmul.f32 0.2, %v2188_v37  ;;  %v2678_v44 = vmax.f32 %v1684_v30, %v2422_v38  ;;  %v2803_v47 = vmax.f32 %v2185_v25, %v2547_v35 }
 0x1b9   : > { %v2806_v45 = vmax.f32 %v2196_v31, %v2550_v39  ;;  %v2676_v48 = vmax.f32 %v1676_v36, %v2420_v40  ;;  %v5852_v50 = vpop.f32.mrb[96].mxu0  ;;  %v5980_v51 = vpop.f32.mrb[96].mxu1 }
 0x1ba   : > { %v2804_v49 = vmax.f32 %v2188_v37, %v2548_v41  ;;  %v5073_v52 = vpack.c.bf16 %v2678_v44, %v2677_v42  ;;  %v1697_v55 = vadd.f32 %v6525_v54, %v5852_v50  ;;  %v2209_v56 = vadd.f32 %v6525_v54, %v5980_v51  ;;  %v1688_v57 = vpop.f32.mrb[97].mxu0  ;;  %v2200_v58 = vpop.f32.mrb[97].mxu1 }
 0x1bb   : > { %v5393_v53 = vpack.c.bf16 %v2806_v45, %v2805_v43  ;;  %v5068_v59 = vpack.c.bf16 %v2676_v48, %v2675_v46  ;;  %v1689_v61 = vadd.f32 %v6525_v54, %v1688_v57  ;;  %v2201_v62 = vadd.f32 %v6525_v54, %v2200_v58  ;;  %v5853_v63 = vpop.f32.mrb[98].mxu0  ;;  %v5981_v0 = vpop.f32.mrb[98].mxu1 }
 0x1bc   : > { %v5388_v60 = vpack.c.bf16 %v2804_v49, %v2803_v47  ;;  %5521 = vst [vmem:[%s6374_s13 + $0x178] sm:$0xff] %v5073_v52   ;;  %v2425_v1 = vmul.f32 0.2, %v1697_v55  ;;  %v2553_v2 = vmul.f32 0.2, %v2209_v56  ;;  %v1700_v3 = vadd.f32 %v6525_v54, %v5853_v63  ;;  %v1691_v5 = vpop.f32.mrb[99].mxu0 }
 0x1bd   : > { %5585 = vst [vmem:[%s6374_s13 + $0x378] sm:$0xff] %v5393_v53   ;;  %v2212_v4 = vadd.f32 %v6525_v54, %v5981_v0  ;;  %v2203_v6 = vpop.f32.mrb[99].mxu1  ;;  %5520 = vst [vmem:[%s6374_s13 + $0x170] sm:$0xff] %v5068_v59   ;;  %v2423_v7 = vmul.f32 0.2, %v1689_v61  ;;  %v1692_v9 = vadd.f32 %v6525_v54, %v1691_v5 }
 0x1be   : > { %5584 = vst [vmem:[%s6374_s13 + $0x370] sm:$0xff] %v5388_v60   ;;  %v2551_v8 = vmul.f32 0.2, %v2201_v62  ;;  %v2204_v10 = vadd.f32 %v6525_v54, %v2203_v6  ;;  %v2426_v11 = vmul.f32 0.2, %v1700_v3  ;;  %v2681_v15 = vmax.f32 %v1697_v55, %v2425_v1 }
 0x1bf   : > { %v2554_v12 = vmul.f32 0.2, %v2212_v4  ;;  %v2424_v13 = vmul.f32 0.2, %v1692_v9  ;;  %v2809_v16 = vmax.f32 %v2209_v56, %v2553_v2  ;;  %v2679_v19 = vmax.f32 %v1689_v61, %v2423_v7  ;;  %v6686_v54 = vld [vmem:[%s6781_s2] ss:$0 sm:$0xff] }
 0x1c0   : > { %v2552_v14 = vmul.f32 0.2, %v2204_v10  ;;  %v2682_v17 = vmax.f32 %v1700_v3, %v2426_v11  ;;  %v2807_v20 = vmax.f32 %v2201_v62, %v2551_v8 }
 0x1c1   : > { %v2810_v18 = vmax.f32 %v2212_v4, %v2554_v12  ;;  %v2680_v21 = vmax.f32 %v1692_v9, %v2424_v13  ;;  %v5856_v23 = vpop.f32.mrb[100].mxu0  ;;  %v5984_v24 = vpop.f32.mrb[100].mxu1 }
 0x1c2   : > { %v2808_v22 = vmax.f32 %v2204_v10, %v2552_v14  ;;  %v5083_v25 = vpack.c.bf16 %v2682_v17, %v2681_v15  ;;  %v1713_v27 = vadd.f32 %v6686_v54, %v5856_v23  ;;  %v2225_v28 = vadd.f32 %v6686_v54, %v5984_v24  ;;  %v1704_v29 = vpop.f32.mrb[101].mxu0  ;;  %v2216_v30 = vpop.f32.mrb[101].mxu1 }
 0x1c3   : > { %v5403_v26 = vpack.c.bf16 %v2810_v18, %v2809_v16  ;;  %v5078_v31 = vpack.c.bf16 %v2680_v21, %v2679_v19  ;;  %v1705_v33 = vadd.f32 %v6686_v54, %v1704_v29  ;;  %v2217_v34 = vadd.f32 %v6686_v54, %v2216_v30  ;;  %v5857_v35 = vpop.f32.mrb[102].mxu0  ;;  %v5985_v36 = vpop.f32.mrb[102].mxu1 }
 0x1c4   : > { %v5398_v32 = vpack.c.bf16 %v2808_v22, %v2807_v20  ;;  %5523 = vst [vmem:[%s6374_s13 + $0x188] sm:$0xff] %v5083_v25   ;;  %v2429_v37 = vmul.f32 0.2, %v1713_v27  ;;  %v2557_v38 = vmul.f32 0.2, %v2225_v28  ;;  %v1716_v39 = vadd.f32 %v6686_v54, %v5857_v35  ;;  %v1707_v41 = vpop.f32.mrb[103].mxu0 }
 0x1c5   : > { %5587 = vst [vmem:[%s6374_s13 + $0x388] sm:$0xff] %v5403_v26   ;;  %v2228_v40 = vadd.f32 %v6686_v54, %v5985_v36  ;;  %v2219_v42 = vpop.f32.mrb[103].mxu1  ;;  %5522 = vst [vmem:[%s6374_s13 + $0x180] sm:$0xff] %v5078_v31   ;;  %v2427_v43 = vmul.f32 0.2, %v1705_v33  ;;  %v1708_v45 = vadd.f32 %v6686_v54, %v1707_v41 }
 0x1c6   : > { %5586 = vst [vmem:[%s6374_s13 + $0x380] sm:$0xff] %v5398_v32   ;;  %v2555_v44 = vmul.f32 0.2, %v2217_v34  ;;  %v2220_v46 = vadd.f32 %v6686_v54, %v2219_v42  ;;  %v2430_v47 = vmul.f32 0.2, %v1716_v39  ;;  %v2685_v51 = vmax.f32 %v1713_v27, %v2429_v37 }
 0x1c7   : > { %v2558_v48 = vmul.f32 0.2, %v2228_v40  ;;  %v2428_v49 = vmul.f32 0.2, %v1708_v45  ;;  %v2813_v52 = vmax.f32 %v2225_v28, %v2557_v38  ;;  %v2683_v56 = vmax.f32 %v1705_v33, %v2427_v43 }
 0x1c8   : > { %v2556_v50 = vmul.f32 0.2, %v2220_v46  ;;  %v2686_v53 = vmax.f32 %v1716_v39, %v2430_v47  ;;  %v2811_v57 = vmax.f32 %v2217_v34, %v2555_v44 }
 0x1c9   : > { %v2814_v55 = vmax.f32 %v2228_v40, %v2558_v48  ;;  %v2684_v58 = vmax.f32 %v1708_v45, %v2428_v49  ;;  %v5860_v60 = vpop.f32.mrb[104].mxu0  ;;  %v5988_v61 = vpop.f32.mrb[104].mxu1 }
 0x1ca   : > { %v2812_v59 = vmax.f32 %v2220_v46, %v2556_v50  ;;  %v5093_v62 = vpack.c.bf16 %v2686_v53, %v2685_v51  ;;  %v1729_v0 = vadd.f32 %v6686_v54, %v5860_v60  ;;  %v2241_v1 = vadd.f32 %v6686_v54, %v5988_v61  ;;  %v1720_v2 = vpop.f32.mrb[105].mxu0  ;;  %v2232_v3 = vpop.f32.mrb[105].mxu1 }
 0x1cb   : > { %v5413_v63 = vpack.c.bf16 %v2814_v55, %v2813_v52  ;;  %v5088_v4 = vpack.c.bf16 %v2684_v58, %v2683_v56  ;;  %v1721_v6 = vadd.f32 %v6686_v54, %v1720_v2  ;;  %v2233_v7 = vadd.f32 %v6686_v54, %v2232_v3  ;;  %v5861_v8 = vpop.f32.mrb[106].mxu0  ;;  %v5989_v9 = vpop.f32.mrb[106].mxu1 }
 0x1cc   : > { %v5408_v5 = vpack.c.bf16 %v2812_v59, %v2811_v57  ;;  %5525 = vst [vmem:[%s6374_s13 + $0x198] sm:$0xff] %v5093_v62   ;;  %v2433_v10 = vmul.f32 0.2, %v1729_v0  ;;  %v2561_v11 = vmul.f32 0.2, %v2241_v1  ;;  %v1732_v12 = vadd.f32 %v6686_v54, %v5861_v8  ;;  %v1723_v14 = vpop.f32.mrb[107].mxu0 }
 0x1cd   : > { %5589 = vst [vmem:[%s6374_s13 + $0x398] sm:$0xff] %v5413_v63   ;;  %v2244_v13 = vadd.f32 %v6686_v54, %v5989_v9  ;;  %v2235_v15 = vpop.f32.mrb[107].mxu1  ;;  %5524 = vst [vmem:[%s6374_s13 + $0x190] sm:$0xff] %v5088_v4   ;;  %v2431_v16 = vmul.f32 0.2, %v1721_v6  ;;  %v1724_v18 = vadd.f32 %v6686_v54, %v1723_v14 }
 0x1ce   : > { %5588 = vst [vmem:[%s6374_s13 + $0x390] sm:$0xff] %v5408_v5   ;;  %v2559_v17 = vmul.f32 0.2, %v2233_v7  ;;  %v2236_v19 = vadd.f32 %v6686_v54, %v2235_v15  ;;  %v2434_v20 = vmul.f32 0.2, %v1732_v12  ;;  %v2689_v24 = vmax.f32 %v1729_v0, %v2433_v10 }
 0x1cf   : > { %v2562_v21 = vmul.f32 0.2, %v2244_v13  ;;  %v2432_v22 = vmul.f32 0.2, %v1724_v18  ;;  %v2817_v25 = vmax.f32 %v2241_v1, %v2561_v11  ;;  %v2687_v28 = vmax.f32 %v1721_v6, %v2431_v16 }
 0x1d0   : > { %v2560_v23 = vmul.f32 0.2, %v2236_v19  ;;  %v2690_v26 = vmax.f32 %v1732_v12, %v2434_v20  ;;  %v2815_v29 = vmax.f32 %v2233_v7, %v2559_v17 }
 0x1d1   : > { %v2818_v27 = vmax.f32 %v2244_v13, %v2562_v21  ;;  %v2688_v30 = vmax.f32 %v1724_v18, %v2432_v22  ;;  %v5864_v32 = vpop.f32.mrb[108].mxu0  ;;  %v5992_v33 = vpop.f32.mrb[108].mxu1 }
 0x1d2   : > { %v2816_v31 = vmax.f32 %v2236_v19, %v2560_v23  ;;  %v5103_v34 = vpack.c.bf16 %v2690_v26, %v2689_v24  ;;  %v1745_v36 = vadd.f32 %v6686_v54, %v5864_v32  ;;  %v2257_v37 = vadd.f32 %v6686_v54, %v5992_v33  ;;  %v1736_v38 = vpop.f32.mrb[109].mxu0  ;;  %v2248_v39 = vpop.f32.mrb[109].mxu1 }
 0x1d3   : > { %v5423_v35 = vpack.c.bf16 %v2818_v27, %v2817_v25  ;;  %v5098_v40 = vpack.c.bf16 %v2688_v30, %v2687_v28  ;;  %v1737_v42 = vadd.f32 %v6686_v54, %v1736_v38  ;;  %v2249_v43 = vadd.f32 %v6686_v54, %v2248_v39  ;;  %v5865_v44 = vpop.f32.mrb[110].mxu0  ;;  %v5993_v45 = vpop.f32.mrb[110].mxu1 }
 0x1d4   : > { %v5418_v41 = vpack.c.bf16 %v2816_v31, %v2815_v29  ;;  %5527 = vst [vmem:[%s6374_s13 + $0x1a8] sm:$0xff] %v5103_v34   ;;  %v2437_v46 = vmul.f32 0.2, %v1745_v36  ;;  %v2565_v47 = vmul.f32 0.2, %v2257_v37  ;;  %v1748_v48 = vadd.f32 %v6686_v54, %v5865_v44  ;;  %v1739_v50 = vpop.f32.mrb[111].mxu0 }
 0x1d5   : > { %5591 = vst [vmem:[%s6374_s13 + $0x3a8] sm:$0xff] %v5423_v35   ;;  %v2260_v49 = vadd.f32 %v6686_v54, %v5993_v45  ;;  %v2251_v51 = vpop.f32.mrb[111].mxu1  ;;  %5526 = vst [vmem:[%s6374_s13 + $0x1a0] sm:$0xff] %v5098_v40   ;;  %v2435_v52 = vmul.f32 0.2, %v1737_v42  ;;  %v1740_v55 = vadd.f32 %v6686_v54, %v1739_v50 }
 0x1d6   : > { %5590 = vst [vmem:[%s6374_s13 + $0x3a0] sm:$0xff] %v5418_v41   ;;  %v2563_v53 = vmul.f32 0.2, %v2249_v43  ;;  %v2252_v56 = vadd.f32 %v6686_v54, %v2251_v51  ;;  %v2438_v57 = vmul.f32 0.2, %v1748_v48  ;;  %v2693_v61 = vmax.f32 %v1745_v36, %v2437_v46 }
 0x1d7   : > { %v2566_v58 = vmul.f32 0.2, %v2260_v49  ;;  %v2436_v59 = vmul.f32 0.2, %v1740_v55  ;;  %v2821_v62 = vmax.f32 %v2257_v37, %v2565_v47  ;;  %v2691_v1 = vmax.f32 %v1737_v42, %v2435_v52 }
 0x1d8   : > { %v2564_v60 = vmul.f32 0.2, %v2252_v56  ;;  %v2694_v63 = vmax.f32 %v1748_v48, %v2438_v57  ;;  %v2819_v2 = vmax.f32 %v2249_v43, %v2563_v53 }
 0x1d9   : > { %v2822_v0 = vmax.f32 %v2260_v49, %v2566_v58  ;;  %v2692_v3 = vmax.f32 %v1740_v55, %v2436_v59  ;;  %v5868_v5 = vpop.f32.mrb[112].mxu0  ;;  %v5996_v6 = vpop.f32.mrb[112].mxu1 }
 0x1da   : > { %v2820_v4 = vmax.f32 %v2252_v56, %v2564_v60  ;;  %v5113_v7 = vpack.c.bf16 %v2694_v63, %v2693_v61  ;;  %v1761_v9 = vadd.f32 %v6686_v54, %v5868_v5  ;;  %v2273_v10 = vadd.f32 %v6686_v54, %v5996_v6  ;;  %v1752_v11 = vpop.f32.mrb[113].mxu0  ;;  %v2264_v12 = vpop.f32.mrb[113].mxu1 }
 0x1db   : > { %v5433_v8 = vpack.c.bf16 %v2822_v0, %v2821_v62  ;;  %v5108_v13 = vpack.c.bf16 %v2692_v3, %v2691_v1  ;;  %v1753_v15 = vadd.f32 %v6686_v54, %v1752_v11  ;;  %v2265_v16 = vadd.f32 %v6686_v54, %v2264_v12  ;;  %v5869_v17 = vpop.f32.mrb[114].mxu0  ;;  %v5997_v18 = vpop.f32.mrb[114].mxu1 }
 0x1dc   : > { %v5428_v14 = vpack.c.bf16 %v2820_v4, %v2819_v2  ;;  %5529 = vst [vmem:[%s6374_s13 + $0x1b8] sm:$0xff] %v5113_v7   ;;  %v2441_v19 = vmul.f32 0.2, %v1761_v9  ;;  %v2569_v20 = vmul.f32 0.2, %v2273_v10  ;;  %v1764_v21 = vadd.f32 %v6686_v54, %v5869_v17  ;;  %v1755_v23 = vpop.f32.mrb[115].mxu0 }
 0x1dd   : > { %5593 = vst [vmem:[%s6374_s13 + $0x3b8] sm:$0xff] %v5433_v8   ;;  %v2276_v22 = vadd.f32 %v6686_v54, %v5997_v18  ;;  %v2267_v24 = vpop.f32.mrb[115].mxu1  ;;  %5528 = vst [vmem:[%s6374_s13 + $0x1b0] sm:$0xff] %v5108_v13   ;;  %v2439_v25 = vmul.f32 0.2, %v1753_v15  ;;  %v1756_v27 = vadd.f32 %v6686_v54, %v1755_v23 }
 0x1de   : > { %5592 = vst [vmem:[%s6374_s13 + $0x3b0] sm:$0xff] %v5428_v14   ;;  %v2567_v26 = vmul.f32 0.2, %v2265_v16  ;;  %v2268_v28 = vadd.f32 %v6686_v54, %v2267_v24  ;;  %v2442_v29 = vmul.f32 0.2, %v1764_v21  ;;  %v2697_v33 = vmax.f32 %v1761_v9, %v2441_v19 }
 0x1df   : > { %v2570_v30 = vmul.f32 0.2, %v2276_v22  ;;  %v2440_v31 = vmul.f32 0.2, %v1756_v27  ;;  %v2825_v34 = vmax.f32 %v2273_v10, %v2569_v20  ;;  %v2695_v37 = vmax.f32 %v1753_v15, %v2439_v25 }
 0x1e0   : > { %v2568_v32 = vmul.f32 0.2, %v2268_v28  ;;  %v2698_v35 = vmax.f32 %v1764_v21, %v2442_v29  ;;  %v2823_v38 = vmax.f32 %v2265_v16, %v2567_v26 }
 0x1e1   : > { %v2826_v36 = vmax.f32 %v2276_v22, %v2570_v30  ;;  %v2696_v39 = vmax.f32 %v1756_v27, %v2440_v31  ;;  %v5872_v41 = vpop.f32.mrb[116].mxu0  ;;  %v6000_v42 = vpop.f32.mrb[116].mxu1 }
 0x1e2   : > { %v2824_v40 = vmax.f32 %v2268_v28, %v2568_v32  ;;  %v5123_v43 = vpack.c.bf16 %v2698_v35, %v2697_v33  ;;  %v1777_v45 = vadd.f32 %v6686_v54, %v5872_v41  ;;  %v2289_v46 = vadd.f32 %v6686_v54, %v6000_v42  ;;  %v1768_v47 = vpop.f32.mrb[117].mxu0  ;;  %v2280_v48 = vpop.f32.mrb[117].mxu1 }
 0x1e3   : > { %v5443_v44 = vpack.c.bf16 %v2826_v36, %v2825_v34  ;;  %v5118_v49 = vpack.c.bf16 %v2696_v39, %v2695_v37  ;;  %v1769_v51 = vadd.f32 %v6686_v54, %v1768_v47  ;;  %v2281_v52 = vadd.f32 %v6686_v54, %v2280_v48  ;;  %v5873_v53 = vpop.f32.mrb[118].mxu0  ;;  %v6001_v55 = vpop.f32.mrb[118].mxu1 }
 0x1e4   : > { %v5438_v50 = vpack.c.bf16 %v2824_v40, %v2823_v38  ;;  %5531 = vst [vmem:[%s6374_s13 + $0x1c8] sm:$0xff] %v5123_v43   ;;  %v2445_v56 = vmul.f32 0.2, %v1777_v45  ;;  %v2573_v57 = vmul.f32 0.2, %v2289_v46  ;;  %v1780_v58 = vadd.f32 %v6686_v54, %v5873_v53  ;;  %v1771_v60 = vpop.f32.mrb[119].mxu0 }
 0x1e5   : > { %5595 = vst [vmem:[%s6374_s13 + $0x3c8] sm:$0xff] %v5443_v44   ;;  %v2292_v59 = vadd.f32 %v6686_v54, %v6001_v55  ;;  %v2283_v61 = vpop.f32.mrb[119].mxu1  ;;  %5530 = vst [vmem:[%s6374_s13 + $0x1c0] sm:$0xff] %v5118_v49   ;;  %v2443_v62 = vmul.f32 0.2, %v1769_v51  ;;  %v1772_v0 = vadd.f32 %v6686_v54, %v1771_v60 }
 0x1e6   : > { %5594 = vst [vmem:[%s6374_s13 + $0x3c0] sm:$0xff] %v5438_v50   ;;  %v2571_v63 = vmul.f32 0.2, %v2281_v52  ;;  %v2284_v1 = vadd.f32 %v6686_v54, %v2283_v61  ;;  %v2446_v2 = vmul.f32 0.2, %v1780_v58  ;;  %v2701_v6 = vmax.f32 %v1777_v45, %v2445_v56 }
 0x1e7   : > { %v2574_v3 = vmul.f32 0.2, %v2292_v59  ;;  %v2444_v4 = vmul.f32 0.2, %v1772_v0  ;;  %v2829_v7 = vmax.f32 %v2289_v46, %v2573_v57  ;;  %v2699_v10 = vmax.f32 %v1769_v51, %v2443_v62 }
 0x1e8   : > { %v2572_v5 = vmul.f32 0.2, %v2284_v1  ;;  %v2702_v8 = vmax.f32 %v1780_v58, %v2446_v2  ;;  %v2827_v11 = vmax.f32 %v2281_v52, %v2571_v63 }
 0x1e9   : > { %v2830_v9 = vmax.f32 %v2292_v59, %v2574_v3  ;;  %v2700_v12 = vmax.f32 %v1772_v0, %v2444_v4  ;;  %v5876_v14 = vpop.f32.mrb[120].mxu0  ;;  %v6004_v15 = vpop.f32.mrb[120].mxu1 }
 0x1ea   : > { %v2828_v13 = vmax.f32 %v2284_v1, %v2572_v5  ;;  %v5133_v16 = vpack.c.bf16 %v2702_v8, %v2701_v6  ;;  %v1793_v18 = vadd.f32 %v6686_v54, %v5876_v14  ;;  %v2305_v19 = vadd.f32 %v6686_v54, %v6004_v15  ;;  %v1784_v20 = vpop.f32.mrb[121].mxu0  ;;  %v2296_v21 = vpop.f32.mrb[121].mxu1 }
 0x1eb   : > { %v5453_v17 = vpack.c.bf16 %v2830_v9, %v2829_v7  ;;  %v5128_v22 = vpack.c.bf16 %v2700_v12, %v2699_v10  ;;  %v1785_v24 = vadd.f32 %v6686_v54, %v1784_v20  ;;  %v2297_v25 = vadd.f32 %v6686_v54, %v2296_v21  ;;  %v5877_v26 = vpop.f32.mrb[122].mxu0  ;;  %v6005_v27 = vpop.f32.mrb[122].mxu1 }
 0x1ec   : > { %v5448_v23 = vpack.c.bf16 %v2828_v13, %v2827_v11  ;;  %5533 = vst [vmem:[%s6374_s13 + $0x1d8] sm:$0xff] %v5133_v16   ;;  %v2449_v28 = vmul.f32 0.2, %v1793_v18  ;;  %v2577_v29 = vmul.f32 0.2, %v2305_v19  ;;  %v1796_v30 = vadd.f32 %v6686_v54, %v5877_v26  ;;  %v1787_v32 = vpop.f32.mrb[123].mxu0 }
 0x1ed   : > { %5597 = vst [vmem:[%s6374_s13 + $0x3d8] sm:$0xff] %v5453_v17   ;;  %v2308_v31 = vadd.f32 %v6686_v54, %v6005_v27  ;;  %v2299_v33 = vpop.f32.mrb[123].mxu1  ;;  %5532 = vst [vmem:[%s6374_s13 + $0x1d0] sm:$0xff] %v5128_v22   ;;  %v2447_v34 = vmul.f32 0.2, %v1785_v24  ;;  %v1788_v36 = vadd.f32 %v6686_v54, %v1787_v32 }
 0x1ee   : > { %5596 = vst [vmem:[%s6374_s13 + $0x3d0] sm:$0xff] %v5448_v23   ;;  %v2575_v35 = vmul.f32 0.2, %v2297_v25  ;;  %v2300_v37 = vadd.f32 %v6686_v54, %v2299_v33  ;;  %v2450_v38 = vmul.f32 0.2, %v1796_v30  ;;  %v2705_v42 = vmax.f32 %v1793_v18, %v2449_v28 }
 0x1ef   : > { %v2578_v39 = vmul.f32 0.2, %v2308_v31  ;;  %v2448_v40 = vmul.f32 0.2, %v1788_v36  ;;  %v2833_v43 = vmax.f32 %v2305_v19, %v2577_v29  ;;  %v2703_v46 = vmax.f32 %v1785_v24, %v2447_v34 }
 0x1f0   : > { %v2576_v41 = vmul.f32 0.2, %v2300_v37  ;;  %v2706_v44 = vmax.f32 %v1796_v30, %v2450_v38  ;;  %v2831_v47 = vmax.f32 %v2297_v25, %v2575_v35 }
 0x1f1   : > { %v2834_v45 = vmax.f32 %v2308_v31, %v2578_v39  ;;  %v2704_v48 = vmax.f32 %v1788_v36, %v2448_v40  ;;  %v5880_v50 = vpop.f32.mrb[124].mxu0  ;;  %v6008_v51 = vpop.f32.mrb[124].mxu1 }
 0x1f2   : > { %v2832_v49 = vmax.f32 %v2300_v37, %v2576_v41  ;;  %v5143_v52 = vpack.c.bf16 %v2706_v44, %v2705_v42  ;;  %v1809_v55 = vadd.f32 %v6686_v54, %v5880_v50  ;;  %v2321_v56 = vadd.f32 %v6686_v54, %v6008_v51  ;;  %v1800_v57 = vpop.f32.mrb[125].mxu0  ;;  %v2312_v58 = vpop.f32.mrb[125].mxu1 }
 0x1f3   : > { %v5463_v53 = vpack.c.bf16 %v2834_v45, %v2833_v43  ;;  %v5138_v59 = vpack.c.bf16 %v2704_v48, %v2703_v46  ;;  %v1801_v61 = vadd.f32 %v6686_v54, %v1800_v57  ;;  %v2313_v62 = vadd.f32 %v6686_v54, %v2312_v58  ;;  %v5881_v63 = vpop.f32.mrb[126].mxu0  ;;  %v6009_v0 = vpop.f32.mrb[126].mxu1 }
 0x1f4   : > { %v5458_v60 = vpack.c.bf16 %v2832_v49, %v2831_v47  ;;  %5535 = vst [vmem:[%s6374_s13 + $0x1e8] sm:$0xff] %v5143_v52   ;;  %v2453_v1 = vmul.f32 0.2, %v1809_v55  ;;  %v2581_v2 = vmul.f32 0.2, %v2321_v56  ;;  %v1812_v3 = vadd.f32 %v6686_v54, %v5881_v63  ;;  %v1803_v5 = vpop.f32.mrb[127].mxu0 }
 0x1f5   : > { %5599 = vst [vmem:[%s6374_s13 + $0x3e8] sm:$0xff] %v5463_v53   ;;  %v2324_v4 = vadd.f32 %v6686_v54, %v6009_v0  ;;  %v2315_v6 = vpop.f32.mrb[127].mxu1  ;;  %5534 = vst [vmem:[%s6374_s13 + $0x1e0] sm:$0xff] %v5138_v59   ;;  %v2451_v7 = vmul.f32 0.2, %v1801_v61  ;;  %v1804_v9 = vadd.f32 %v6686_v54, %v1803_v5 }
 0x1f6   : > { %5598 = vst [vmem:[%s6374_s13 + $0x3e0] sm:$0xff] %v5458_v60   ;;  %v2579_v8 = vmul.f32 0.2, %v2313_v62  ;;  %v2316_v10 = vadd.f32 %v6686_v54, %v2315_v6  ;;  %v2454_v11 = vmul.f32 0.2, %v1812_v3  ;;  %v2709_v15 = vmax.f32 %v1809_v55, %v2453_v1 }
 0x1f7   : > { %v2582_v12 = vmul.f32 0.2, %v2324_v4  ;;  %v2452_v13 = vmul.f32 0.2, %v1804_v9  ;;  %v2837_v16 = vmax.f32 %v2321_v56, %v2581_v2  ;;  %v2707_v19 = vmax.f32 %v1801_v61, %v2451_v7 }
 0x1f8   : > { %v2580_v14 = vmul.f32 0.2, %v2316_v10  ;;  %v2710_v17 = vmax.f32 %v1812_v3, %v2454_v11  ;;  %v2835_v20 = vmax.f32 %v2313_v62, %v2579_v8 }
 0x1f9   : > { %v2838_v18 = vmax.f32 %v2324_v4, %v2582_v12  ;;  %v2708_v21 = vmax.f32 %v1804_v9, %v2452_v13 }
 0x1fa   : > { %v2836_v22 = vmax.f32 %v2316_v10, %v2580_v14  ;;  %v5153_v23 = vpack.c.bf16 %v2710_v17, %v2709_v15 }
 0x1fb   : > { %v5473_v24 = vpack.c.bf16 %v2838_v18, %v2837_v16  ;;  %v5148_v25 = vpack.c.bf16 %v2708_v21, %v2707_v19 }
 0x1fc   : > { %v5468_v54 = vpack.c.bf16 %v2836_v22, %v2835_v20  ;;  %5537 = vst [vmem:[%s6374_s13 + $0x1f8] sm:$0xff] %v5153_v23  }
 0x1fd   : > { %5601 = vst [vmem:[%s6374_s13 + $0x3f8] sm:$0xff] %v5473_v24   ;;  %5536 = vst [vmem:[%s6374_s13 + $0x1f0] sm:$0xff] %v5148_v25  }
 0x1fe   : > { %5600 = vst [vmem:[%s6374_s13 + $0x3f0] sm:$0xff] %v5468_v54  }
 0x1ff PF: > { %s13_s12 = sadd.s32 1, %s6178_s12  }
 0x200   : > { %p10_p4 = scmp.ge.s32.totalorder %s13_s12, 4  }
 0x202   :  { %12 = sbr.rel (!%p10_p4) target bundleno = 1 (0x1), region = 62 }

// kernel: _lambda_.8
= control target key start
LH: loop header
LB: loop body
LE: loop exit
PB: predicated region body
PF: predicated region fallthrough
CT: control target
= control target key end

     0   :  { %s2209_s12 = smov 0   ;;  %s3534_s0 = inlined_call_operand.vmem [shape: bf16[1024,128], index: 0, kind: input, shape index: {}]   ;;  %s3535_s1 = inlined_call_operand.vmem [shape: bf16[128,128], index: 1, kind: input, shape index: {}]   ;;  %s3536_s2 = inlined_call_operand.vmem [shape: f32[1,128], index: 2, kind: input, shape index: {}]   ;;  %s3537_s3 = inlined_call_operand.vmem [shape: bf16[1024,128], index: 3, kind: output, shape index: {}]  }
   0x1 LB: > { %s1625_s13 = sadd.s32 4294967295, %s2187_s12   ;;  %p1629_p0 = scmp.ge.s32.totalorder %s2187_s12, 1  ;;  %s2187_s12 = sphi %s2209_s12, %s13_s12  }
   0x2   : > { %p138_p1 = scmp.lt.s32.totalorder %s2187_s12, 3 }
   0x4   : > { %p139_p2 = pnand %p1629_p0, %p138_p1 }
   0x6   : > { %142 = sbr.rel (%p139_p2) target bundleno = 530 (0x212), region = 32 }
   0xd   : > { %v2139_v0 = vld [vmem:[%s3535_s1] sm:$0xff]   ;;  %s1630_s15 = sshll.u32 %s1625_s13, 6  ;;  %v2140_v1 = vld [vmem:[%s3535_s1 + $0x8] sm:$0xff]   ;;  %v2141_v2 = vld [vmem:[%s3535_s1 + $0x10] sm:$0xff]  }
   0xe   : > { %p163_p3 = scmp.lt.s32.totalorder %s1630_s15, 127  ;;  %2035 = vmatprep.subr.bf16.mxu0 %v2139_v0  ;;  %2115 = vmatprep.subr.bf16.mxu1 %v2139_v0  ;;  %v2142_v3 = vld [vmem:[%s3535_s1 + $0x18] sm:$0xff]   ;;  %v2143_v5 = vld [vmem:[%s3535_s1 + $0x20] sm:$0xff]   ;;  %v2144_v6 = vld [vmem:[%s3535_s1 + $0x28] sm:$0xff]  }
   0xf   : > { %2036 = vmatpush3.bf16.msra.mxu0 %v2139_v0  ;;  %2123 = vmatpush3.bf16.msra.mxu1 %v2139_v0  ;;  %v2145_v7 = vld [vmem:[%s3535_s1 + $0x30] sm:$0xff]   ;;  %v2146_v8 = vld [vmem:[%s3535_s1 + $0x38] sm:$0xff]  }
  0x10   : > { %s3960_s15 = smov (!%p163_p3, %s1630_s15), 127  ;;  %2037 = vmatprep.subr.bf16.mxu0 %v2140_v1  ;;  %2116 = vmatprep.subr.bf16.mxu1 %v2140_v1 }
  0x11   : > { %s1631_s20 = sshll.u32 %s3960_s15, 2 }
  0x12   : > { %s2234_s23 = scalar_lea.vmem %s3534_s0, %s1631_s20  ;;  %s3434_s9 = scalar_lea.vmem %s3537_s3, %s1631_s20 }
  0x13   : > { %2038 = vmatpush3.bf16.msra.mxu0 %v2140_v1  ;;  %2124 = vmatpush3.bf16.msra.mxu1 %v2140_v1  ;;  %v2147_v4 = vld [vmem:[%s2234_s23] sm:$0xff]   ;;  %v2148_v10 = vld [vmem:[%s2234_s23 + $0x8] sm:$0xff]   ;;  %v2149_v11 = vld [vmem:[%s2234_s23 + $0x10] sm:$0xff]  }
  0x14   : > { %2039 = vmatprep.subr.bf16.mxu0 %v2141_v2  ;;  %2117 = vmatprep.subr.bf16.mxu1 %v2141_v2  ;;  %v2163_v9 = vld [vmem:[%s2234_s23 + $0x80] sm:$0xff]   ;;  %v2164_v12 = vld [vmem:[%s2234_s23 + $0x88] sm:$0xff]   ;;  %v2165_v13 = vld [vmem:[%s2234_s23 + $0x90] sm:$0xff]  }
  0x15   : > { %2051 = vmatprep.mubr.bf16.mxu0 %v2147_v4  ;;  %2083 = vmatprep.mubr.bf16.mxu1 %v2163_v9  ;;  %v2150_v14 = vld [vmem:[%s2234_s23 + $0x18] sm:$0xff]   ;;  %v2151_v15 = vld [vmem:[%s2234_s23 + $0x20] sm:$0xff]   ;;  %v2152_v18 = vld [vmem:[%s2234_s23 + $0x28] sm:$0xff]  }
  0x16   : > { %v2166_v16 = vld [vmem:[%s2234_s23 + $0x98] sm:$0xff]   ;;  %v2167_v17 = vld [vmem:[%s2234_s23 + $0xa0] sm:$0xff]   ;;  %v2168_v19 = vld [vmem:[%s2234_s23 + $0xa8] sm:$0xff]  }
  0x17   : > { %2040 = vmatpush3.bf16.msra.mxu0 %v2141_v2  ;;  %2125 = vmatpush3.bf16.msra.mxu1 %v2141_v2  ;;  %v2153_v20 = vld [vmem:[%s2234_s23 + $0x30] sm:$0xff]   ;;  %v2154_v22 = vld [vmem:[%s2234_s23 + $0x38] sm:$0xff]   ;;  %v2155_v24 = vld [vmem:[%s2234_s23 + $0x40] sm:$0xff]  }
  0x18   : > { %2041 = vmatprep.subr.bf16.mxu0 %v2142_v3  ;;  %2118 = vmatprep.subr.bf16.mxu1 %v2142_v3  ;;  %v2169_v21 = vld [vmem:[%s2234_s23 + $0xb0] sm:$0xff]   ;;  %v2170_v23 = vld [vmem:[%s2234_s23 + $0xb8] sm:$0xff]   ;;  %v2171_v25 = vld [vmem:[%s2234_s23 + $0xc0] sm:$0xff]  }
  0x19   : > { %v2156_v26 = vld [vmem:[%s2234_s23 + $0x48] sm:$0xff]   ;;  %v2157_v28 = vld [vmem:[%s2234_s23 + $0x50] sm:$0xff]   ;;  %v2158_v30 = vld [vmem:[%s2234_s23 + $0x58] sm:$0xff]  }
  0x1a   : > { %v2172_v27 = vld [vmem:[%s2234_s23 + $0xc8] sm:$0xff]   ;;  %v2173_v29 = vld [vmem:[%s2234_s23 + $0xd0] sm:$0xff]   ;;  %v2174_v31 = vld [vmem:[%s2234_s23 + $0xd8] sm:$0xff]  }
  0x1b   : > { %2042 = vmatpush3.bf16.msra.mxu0 %v2142_v3  ;;  %2126 = vmatpush3.bf16.msra.mxu1 %v2142_v3  ;;  %v2159_v32 = vld [vmem:[%s2234_s23 + $0x60] sm:$0xff]   ;;  %v2160_v34 = vld [vmem:[%s2234_s23 + $0x68] sm:$0xff]   ;;  %v2161_v36 = vld [vmem:[%s2234_s23 + $0x70] sm:$0xff]  }
  0x1c   : > { %2043 = vmatprep.subr.bf16.mxu0 %v2143_v5  ;;  %2119 = vmatprep.subr.bf16.mxu1 %v2143_v5  ;;  %v2175_v33 = vld [vmem:[%s2234_s23 + $0xe0] sm:$0xff]   ;;  %v2176_v35 = vld [vmem:[%s2234_s23 + $0xe8] sm:$0xff]   ;;  %v2177_v37 = vld [vmem:[%s2234_s23 + $0xf0] sm:$0xff]  }
  0x1d   : > { %v2162_v38 = vld [vmem:[%s2234_s23 + $0x78] sm:$0xff]  }
  0x1e   : > { %v2178_v39 = vld [vmem:[%s2234_s23 + $0xf8] sm:$0xff]  }
  0x1f   : > { %2044 = vmatpush3.bf16.msra.mxu0 %v2143_v5  ;;  %2127 = vmatpush3.bf16.msra.mxu1 %v2143_v5 }
  0x20   : > { %2045 = vmatprep.subr.bf16.mxu0 %v2144_v6  ;;  %2120 = vmatprep.subr.bf16.mxu1 %v2144_v6 }
  0x23   : > { %2046 = vmatpush3.bf16.msra.mxu0 %v2144_v6  ;;  %2128 = vmatpush3.bf16.msra.mxu1 %v2144_v6 }
  0x24   : > { %2047 = vmatprep.subr.bf16.mxu0 %v2145_v7  ;;  %2121 = vmatprep.subr.bf16.mxu1 %v2145_v7 }
  0x27   : > { %2048 = vmatpush3.bf16.msra.mxu0 %v2145_v7  ;;  %2129 = vmatpush3.bf16.msra.mxu1 %v2145_v7 }
  0x28   : > { %2049 = vmatprep.subr.bf16.mxu0 %v2146_v8  ;;  %2122 = vmatprep.subr.bf16.mxu1 %v2146_v8 }
  0x2b   : > { %2050 = vmatpush3.bf16.msra.mxu0 %v2146_v8  ;;  %2130 = vmatpush3.bf16.msra.mxu1 %v2146_v8 }
  0x2e   : > { %2052 = vmatmul.mubr.bf16.vlgmr.msra.gmra.mrb[0].mxu0 %v2148_v10  ;;  %2084 = vmatmul.mubr.bf16.vlgmr.msra.gmra.mrb[0].mxu1 %v2164_v12 }
  0x2f   : > { %2055 = vmatprep.mubr.bf16.mxu0 %v2149_v11  ;;  %2087 = vmatprep.mubr.bf16.mxu1 %v2165_v13 }
  0x36   : > { %2056 = vmatmul.mubr.bf16.gmra.mrb[4].mxu0 %v2150_v14  ;;  %2088 = vmatmul.mubr.bf16.gmra.mrb[4].mxu1 %v2166_v16 }
  0x37   : > { %2059 = vmatprep.mubr.bf16.mxu0 %v2151_v15  ;;  %2091 = vmatprep.mubr.bf16.mxu1 %v2167_v17 }
  0x3e   : > { %2060 = vmatmul.mubr.bf16.gmra.mrb[8].mxu0 %v2152_v18  ;;  %2092 = vmatmul.mubr.bf16.gmra.mrb[8].mxu1 %v2168_v19 }
  0x3f   : > { %2063 = vmatprep.mubr.bf16.mxu0 %v2153_v20  ;;  %2095 = vmatprep.mubr.bf16.mxu1 %v2169_v21 }
  0x46   : > { %2064 = vmatmul.mubr.bf16.gmra.mrb[12].mxu0 %v2154_v22  ;;  %2096 = vmatmul.mubr.bf16.gmra.mrb[12].mxu1 %v2170_v23 }
  0x47   : > { %2067 = vmatprep.mubr.bf16.mxu0 %v2155_v24  ;;  %2099 = vmatprep.mubr.bf16.mxu1 %v2171_v25 }
  0x4e   : > { %2068 = vmatmul.mubr.bf16.gmra.mrb[16].mxu0 %v2156_v26  ;;  %2100 = vmatmul.mubr.bf16.gmra.mrb[16].mxu1 %v2172_v27 }
  0x4f   : > { %2071 = vmatprep.mubr.bf16.mxu0 %v2157_v28  ;;  %2103 = vmatprep.mubr.bf16.mxu1 %v2173_v29 }
  0x56   : > { %2072 = vmatmul.mubr.bf16.gmra.mrb[20].mxu0 %v2158_v30  ;;  %2104 = vmatmul.mubr.bf16.gmra.mrb[20].mxu1 %v2174_v31 }
  0x57   : > { %2075 = vmatprep.mubr.bf16.mxu0 %v2159_v32  ;;  %2107 = vmatprep.mubr.bf16.mxu1 %v2175_v33 }
  0x5e   : > { %2076 = vmatmul.mubr.bf16.gmra.mrb[24].mxu0 %v2160_v34  ;;  %2108 = vmatmul.mubr.bf16.gmra.mrb[24].mxu1 %v2176_v35 }
  0x5f   : > { %2079 = vmatprep.mubr.bf16.mxu0 %v2161_v36  ;;  %2111 = vmatprep.mubr.bf16.mxu1 %v2177_v37 }
  0x66   : > { %2080 = vmatmul.mubr.bf16.gmra.mrb[28].mxu0 %v2162_v38  ;;  %2112 = vmatmul.mubr.bf16.gmra.mrb[28].mxu1 %v2178_v39 }
 0x101   : > { %v2283_v40 = vpop.f32.mrb[0].mxu0  ;;  %v2285_v41 = vpop.f32.mrb[0].mxu1 }
 0x102   : > { %v2287_v42 = vpop.f32.mrb[1].mxu0  ;;  %v2289_v43 = vpop.f32.mrb[1].mxu1  ;;  %v856_v51 = vmul.f32 %v2283_v40, %v2283_v40 }
 0x103   : > { %v2291_v44 = vpop.f32.mrb[2].mxu0  ;;  %v2293_v45 = vpop.f32.mrb[2].mxu1  ;;  %v854_v48 = vmul.f32 %v2287_v42, %v2287_v42 }
 0x104   : > { %v2295_v46 = vpop.f32.mrb[3].mxu0  ;;  %v2297_v47 = vpop.f32.mrb[3].mxu1  ;;  %v857_v54 = vmul.f32 %v2291_v44, %v2291_v44 }
 0x105   : > { %v784_v49 = vadd.f32 %v2295_v46, %v2287_v42  ;;  %v855_v50 = vmul.f32 %v2295_v46, %v2295_v46 }
 0x107   : > { %v785_v52 = vadd.f32 %v2283_v40, %v784_v49  ;;  %v918_v53 = vadd.f32 %v855_v50, %v854_v48 }
 0x109   : > { %v919_v55 = vadd.f32 %v918_v53, %v856_v51  ;;  %v2310_v56 = vpop.f32.mrb[4].mxu0  ;;  %v786_v57 = vadd.f32 %v2291_v44, %v785_v52  ;;  %v2313_v58 = vpop.f32.mrb[4].mxu1 }
 0x10a   : > { %v2315_v59 = vpop.f32.mrb[5].mxu0  ;;  %v2317_v60 = vpop.f32.mrb[5].mxu1  ;;  %v860_v7 = vmul.f32 %v2310_v56, %v2310_v56 }
 0x10b   : > { %v787_v61 = vadd.f32 %v786_v57, %v2315_v59  ;;  %v858_v62 = vmul.f32 %v2315_v59, %v2315_v59  ;;  %v920_v63 = vadd.f32 %v919_v55, %v857_v54  ;;  %v2322_v0 = vpop.f32.mrb[6].mxu0  ;;  %v2324_v1 = vpop.f32.mrb[6].mxu1 }
 0x10c   : > { %v2326_v2 = vpop.f32.mrb[7].mxu0  ;;  %v2328_v3 = vpop.f32.mrb[7].mxu1  ;;  %v861_v10 = vmul.f32 %v2322_v0, %v2322_v0 }
 0x10d   : > { %v921_v4 = vadd.f32 %v920_v63, %v858_v62  ;;  %v788_v5 = vadd.f32 %v787_v61, %v2326_v2  ;;  %v859_v6 = vmul.f32 %v2326_v2, %v2326_v2 }
 0x10f   : > { %v789_v8 = vadd.f32 %v2310_v56, %v788_v5  ;;  %v922_v9 = vadd.f32 %v921_v4, %v859_v6 }
 0x111   : > { %v923_v11 = vadd.f32 %v922_v9, %v860_v7  ;;  %v2338_v12 = vpop.f32.mrb[8].mxu0  ;;  %v790_v13 = vadd.f32 %v2322_v0, %v789_v8  ;;  %v2341_v14 = vpop.f32.mrb[8].mxu1 }
 0x112   : > { %v2343_v15 = vpop.f32.mrb[9].mxu0  ;;  %v2345_v16 = vpop.f32.mrb[9].mxu1  ;;  %v864_v27 = vmul.f32 %v2338_v12, %v2338_v12 }
 0x113   : > { %v791_v17 = vadd.f32 %v790_v13, %v2343_v15  ;;  %v862_v18 = vmul.f32 %v2343_v15, %v2343_v15  ;;  %v924_v19 = vadd.f32 %v923_v11, %v861_v10  ;;  %v2350_v20 = vpop.f32.mrb[10].mxu0  ;;  %v2352_v21 = vpop.f32.mrb[10].mxu1 }
 0x114   : > { %v2354_v22 = vpop.f32.mrb[11].mxu0  ;;  %v2356_v23 = vpop.f32.mrb[11].mxu1  ;;  %v865_v30 = vmul.f32 %v2350_v20, %v2350_v20 }
 0x115   : > { %v925_v24 = vadd.f32 %v924_v19, %v862_v18  ;;  %v792_v25 = vadd.f32 %v791_v17, %v2354_v22  ;;  %v863_v26 = vmul.f32 %v2354_v22, %v2354_v22 }
 0x117   : > { %v793_v28 = vadd.f32 %v2338_v12, %v792_v25  ;;  %v926_v29 = vadd.f32 %v925_v24, %v863_v26 }
 0x119   : > { %v927_v31 = vadd.f32 %v926_v29, %v864_v27  ;;  %v2366_v32 = vpop.f32.mrb[12].mxu0  ;;  %v794_v33 = vadd.f32 %v2350_v20, %v793_v28  ;;  %v2369_v34 = vpop.f32.mrb[12].mxu1 }
 0x11a   : > { %v2371_v35 = vpop.f32.mrb[13].mxu0  ;;  %v2373_v36 = vpop.f32.mrb[13].mxu1  ;;  %v868_v55 = vmul.f32 %v2366_v32, %v2366_v32 }
 0x11b   : > { %v795_v37 = vadd.f32 %v794_v33, %v2371_v35  ;;  %v866_v38 = vmul.f32 %v2371_v35, %v2371_v35  ;;  %v928_v39 = vadd.f32 %v927_v31, %v865_v30  ;;  %v2378_v48 = vpop.f32.mrb[14].mxu0  ;;  %v2380_v49 = vpop.f32.mrb[14].mxu1 }
 0x11c   : > { %3651 = vst [vmem:[#allocation2_spill] sm:$0xff] %v2378_v48  ;;  %v2382_v50 = vpop.f32.mrb[15].mxu0  ;;  %v2384_v51 = vpop.f32.mrb[15].mxu1  ;;  %v869_v62 = vmul.f32 %v2378_v48, %v2378_v48 }
 0x11d   : > { %v929_v52 = vadd.f32 %v928_v39, %v866_v38  ;;  %v796_v53 = vadd.f32 %v795_v37, %v2382_v50  ;;  %v867_v54 = vmul.f32 %v2382_v50, %v2382_v50 }
 0x11f   : > { %v797_v57 = vadd.f32 %v2366_v32, %v796_v53  ;;  %v930_v61 = vadd.f32 %v929_v52, %v867_v54 }
 0x121   : > { %v931_v63 = vadd.f32 %v930_v61, %v868_v55  ;;  %v2394_v4 = vpop.f32.mrb[16].mxu0  ;;  %v798_v5 = vadd.f32 %v2378_v48, %v797_v57  ;;  %v2397_v6 = vpop.f32.mrb[16].mxu1  ;;  %v887_v48 = vmul.f32 %v2297_v47, %v2297_v47 }
 0x122   : > { %3652 = vst [vmem:[#allocation3_spill] sm:$0xff] %v2394_v4  ;;  %3653 = vst [vmem:[#allocation4_spill] sm:$0xff] %v2397_v6  ;;  %v2399_v7 = vpop.f32.mrb[17].mxu0  ;;  %v2401_v8 = vpop.f32.mrb[17].mxu1  ;;  %v872_v27 = vmul.f32 %v2394_v4, %v2394_v4 }
 0x123   : > { %3654 = vst [vmem:[#allocation5_spill] sm:$0xff] %v2399_v7  ;;  %v799_v9 = vadd.f32 %v798_v5, %v2399_v7  ;;  %v870_v10 = vmul.f32 %v2399_v7, %v2399_v7  ;;  %v932_v11 = vadd.f32 %v931_v63, %v869_v62  ;;  %v2406_v13 = vpop.f32.mrb[18].mxu0  ;;  %v2408_v17 = vpop.f32.mrb[18].mxu1 }
 0x124   : > { %3655 = vst [vmem:[#allocation6_spill] sm:$0xff] %v2406_v13  ;;  %3656 = vst [vmem:[#allocation7_spill] sm:$0xff] %v2408_v17  ;;  %v2410_v18 = vpop.f32.mrb[19].mxu0  ;;  %v2412_v19 = vpop.f32.mrb[19].mxu1  ;;  %v873_v30 = vmul.f32 %v2406_v13, %v2406_v13 }
 0x125   : > { %3657 = vst [vmem:[#allocation8_spill] sm:$0xff] %v2410_v18  ;;  %3658 = vst [vmem:[#allocation9_spill] sm:$0xff] %v2412_v19  ;;  %v933_v24 = vadd.f32 %v932_v11, %v870_v10  ;;  %v800_v25 = vadd.f32 %v799_v9, %v2410_v18  ;;  %v871_v26 = vmul.f32 %v2410_v18, %v2410_v18 }
 0x127   : > { %v801_v28 = vadd.f32 %v2394_v4, %v800_v25  ;;  %v934_v29 = vadd.f32 %v933_v24, %v871_v26 }
 0x129   : > { %v935_v31 = vadd.f32 %v934_v29, %v872_v27  ;;  %v2422_v33 = vpop.f32.mrb[20].mxu0  ;;  %v802_v37 = vadd.f32 %v2406_v13, %v801_v28  ;;  %v2425_v38 = vpop.f32.mrb[20].mxu1 }
 0x12a   : > { %3659 = vst [vmem:[#allocation10_spill] sm:$0xff] %v2422_v33  ;;  %3660 = vst [vmem:[#allocation11_spill] sm:$0xff] %v2425_v38  ;;  %v2427_v39 = vpop.f32.mrb[21].mxu0  ;;  %v2429_v52 = vpop.f32.mrb[21].mxu1  ;;  %v876_v11 = vmul.f32 %v2422_v33, %v2422_v33 }
 0x12b   : > { %3661 = vst [vmem:[#allocation12_spill] sm:$0xff] %v2427_v39  ;;  %3662 = vst [vmem:[#allocation13_spill] sm:$0xff] %v2429_v52  ;;  %v803_v53 = vadd.f32 %v802_v37, %v2427_v39  ;;  %v874_v54 = vmul.f32 %v2427_v39, %v2427_v39  ;;  %v936_v55 = vadd.f32 %v935_v31, %v873_v30  ;;  %v2434_v57 = vpop.f32.mrb[22].mxu0  ;;  %v2436_v61 = vpop.f32.mrb[22].mxu1 }
 0x12c   : > { %3663 = vst [vmem:[#allocation14_spill] sm:$0xff] %v2434_v57  ;;  %v2438_v62 = vpop.f32.mrb[23].mxu0  ;;  %v2440_v63 = vpop.f32.mrb[23].mxu1  ;;  %v877_v26 = vmul.f32 %v2434_v57, %v2434_v57 }
 0x12d   : > { %3664 = vst [vmem:[#allocation15_spill] sm:$0xff] %v2438_v62  ;;  %3665 = vst [vmem:[#allocation16_spill] sm:$0xff] %v2440_v63  ;;  %v937_v5 = vadd.f32 %v936_v55, %v874_v54  ;;  %v804_v9 = vadd.f32 %v803_v53, %v2438_v62  ;;  %v875_v10 = vmul.f32 %v2438_v62, %v2438_v62 }
 0x12f   : > { %v805_v24 = vadd.f32 %v2422_v33, %v804_v9  ;;  %v938_v25 = vadd.f32 %v937_v5, %v875_v10 }
 0x131   : > { %v939_v27 = vadd.f32 %v938_v25, %v876_v11  ;;  %v2450_v28 = vpop.f32.mrb[24].mxu0  ;;  %v806_v29 = vadd.f32 %v2434_v57, %v805_v24  ;;  %v2453_v30 = vpop.f32.mrb[24].mxu1 }
 0x132   : > { %3666 = vst [vmem:[#allocation17_spill] sm:$0xff] %v2450_v28  ;;  %3667 = vst [vmem:[#allocation18_spill] sm:$0xff] %v2453_v30  ;;  %v2455_v31 = vpop.f32.mrb[25].mxu0  ;;  %v2457_v37 = vpop.f32.mrb[25].mxu1 }
 0x133   : > { %3668 = vst [vmem:[#allocation19_spill] sm:$0xff] %v2455_v31  ;;  %3669 = vst [vmem:[#allocation20_spill] sm:$0xff] %v2457_v37  ;;  %v807_v53 = vadd.f32 %v806_v29, %v2455_v31  ;;  %v878_v54 = vmul.f32 %v2455_v31, %v2455_v31  ;;  %v940_v55 = vadd.f32 %v939_v27, %v877_v26  ;;  %v2462_v5 = vpop.f32.mrb[26].mxu0  ;;  %v2464_v9 = vpop.f32.mrb[26].mxu1 }
 0x134   : > { %3670 = vst [vmem:[#allocation21_spill] sm:$0xff] %v2462_v5  ;;  %3671 = vst [vmem:[#allocation22_spill] sm:$0xff] %v2464_v9  ;;  %v2466_v10 = vpop.f32.mrb[27].mxu0  ;;  %v2468_v11 = vpop.f32.mrb[27].mxu1  ;;  %v880_v29 = vmul.f32 %v2450_v28, %v2450_v28  ;;  %v881_v27 = vmul.f32 %v2462_v5, %v2462_v5 }
 0x135   : > { %3672 = vst [vmem:[#allocation23_spill] sm:$0xff] %v2466_v10  ;;  %3673 = vst [vmem:[#allocation24_spill] sm:$0xff] %v2468_v11  ;;  %v941_v24 = vadd.f32 %v940_v55, %v878_v54  ;;  %v808_v25 = vadd.f32 %v807_v53, %v2466_v10  ;;  %v879_v57 = vmul.f32 %v2466_v10, %v2466_v10 }
 0x137   : > { %v809_v31 = vadd.f32 %v2450_v28, %v808_v25  ;;  %v942_v26 = vadd.f32 %v941_v24, %v879_v57 }
 0x139   : > { %v943_v33 = vadd.f32 %v942_v26, %v880_v29  ;;  %v2478_v62 = vpop.f32.mrb[28].mxu0  ;;  %v810_v39 = vadd.f32 %v2462_v5, %v809_v31  ;;  %v2481_v54 = vpop.f32.mrb[28].mxu1 }
 0x13a   : > { %v2483_v53 = vpop.f32.mrb[29].mxu0  ;;  %v2485_v55 = vpop.f32.mrb[29].mxu1 }
 0x13b   : > { %3674 = vst [vmem:[#allocation25_spill] sm:$0xff] %v2483_v53  ;;  %3675 = vst [vmem:[#allocation26_spill] sm:$0xff] %v2485_v55  ;;  %v811_v10 = vadd.f32 %v810_v39, %v2483_v53  ;;  %v882_v25 = vmul.f32 %v2483_v53, %v2483_v53  ;;  %v944_v57 = vadd.f32 %v943_v33, %v881_v27  ;;  %v2490_v24 = vpop.f32.mrb[30].mxu0  ;;  %v2492_v28 = vpop.f32.mrb[30].mxu1 }
 0x13c   : > { %v2494_v29 = vpop.f32.mrb[31].mxu0  ;;  %v2496_v26 = vpop.f32.mrb[31].mxu1  ;;  %v884_v39 = vmul.f32 %v2478_v62, %v2478_v62  ;;  %v885_v27 = vmul.f32 %v2490_v24, %v2490_v24 }
 0x13d   : > { %3676 = vst [vmem:[#allocation27_spill] sm:$0xff] %v2494_v29  ;;  %3677 = vst [vmem:[#allocation28_spill] sm:$0xff] %v2496_v26  ;;  %v945_v31 = vadd.f32 %v944_v57, %v882_v25  ;;  %v812_v5 = vadd.f32 %v811_v10, %v2494_v29  ;;  %v883_v13 = vmul.f32 %v2494_v29, %v2494_v29 }
 0x13e   : > { %v886_v25 = vmul.f32 %v2289_v43, %v2289_v43 }
 0x13f   : > { %v813_v53 = vadd.f32 %v2478_v62, %v812_v5  ;;  %v946_v33 = vadd.f32 %v945_v31, %v883_v13  ;;  %v888_v13 = vmul.f32 %v2285_v41, %v2285_v41 }
 0x141   : > { %v947_v4 = vadd.f32 %v946_v33, %v884_v39  ;;  %v814_v18 = vadd.f32 %v2490_v24, %v813_v53  ;;  %v889_v53 = vmul.f32 %v2293_v45, %v2293_v45 }
 0x143   : > { %v815_v10 = vadd.f32 %v814_v18, %v2289_v43  ;;  %v948_v57 = vadd.f32 %v947_v4, %v885_v27  ;;  %v890_v4 = vmul.f32 %v2317_v60, %v2317_v60 }
 0x145   : > { %v949_v7 = vadd.f32 %v948_v57, %v886_v25  ;;  %v816_v29 = vadd.f32 %v815_v10, %v2297_v47  ;;  %v891_v57 = vmul.f32 %v2328_v3, %v2328_v3 }
 0x147   : > { %v817_v5 = vadd.f32 %v2285_v41, %v816_v29  ;;  %v950_v31 = vadd.f32 %v949_v7, %v887_v48  ;;  %v892_v48 = vmul.f32 %v2313_v58, %v2313_v58 }
 0x149   : > { %v951_v39 = vadd.f32 %v950_v31, %v888_v13  ;;  %v818_v33 = vadd.f32 %v2293_v45, %v817_v5  ;;  %v893_v13 = vmul.f32 %v2324_v1, %v2324_v1 }
 0x14b   : > { %v819_v18 = vadd.f32 %v818_v33, %v2317_v60  ;;  %v952_v27 = vadd.f32 %v951_v39, %v889_v53  ;;  %v894_v53 = vmul.f32 %v2345_v16, %v2345_v16 }
 0x14d   : > { %v953_v25 = vadd.f32 %v952_v27, %v890_v4  ;;  %v820_v10 = vadd.f32 %v819_v18, %v2328_v3  ;;  %v895_v27 = vmul.f32 %v2356_v23, %v2356_v23 }
 0x14f   : > { %v821_v7 = vadd.f32 %v2313_v58, %v820_v10  ;;  %v954_v29 = vadd.f32 %v953_v25, %v891_v57  ;;  %v896_v25 = vmul.f32 %v2341_v14, %v2341_v14 }
 0x151   : > { %v955_v5 = vadd.f32 %v954_v29, %v892_v48  ;;  %v822_v31 = vadd.f32 %v2324_v1, %v821_v7  ;;  %v897_v48 = vmul.f32 %v2352_v21, %v2352_v21 }
 0x153   : > { %v823_v39 = vadd.f32 %v822_v31, %v2345_v16  ;;  %v956_v33 = vadd.f32 %v955_v5, %v893_v13  ;;  %v898_v13 = vmul.f32 %v2373_v36, %v2373_v36 }
 0x155   : > { %v957_v4 = vadd.f32 %v956_v33, %v894_v53  ;;  %v824_v18 = vadd.f32 %v823_v39, %v2356_v23  ;;  %v899_v33 = vmul.f32 %v2384_v51, %v2384_v51 }
 0x157   : > { %v825_v10 = vadd.f32 %v2341_v14, %v824_v18  ;;  %v958_v57 = vadd.f32 %v957_v4, %v895_v27  ;;  %v900_v4 = vmul.f32 %v2369_v34, %v2369_v34 }
 0x159   : > { %v959_v7 = vadd.f32 %v958_v57, %v896_v25  ;;  %v826_v29 = vadd.f32 %v2352_v21, %v825_v10  ;;  %v901_v25 = vmul.f32 %v2380_v49, %v2380_v49 }
 0x15b   : > { %v827_v5 = vadd.f32 %v826_v29, %v2373_v36  ;;  %v960_v31 = vadd.f32 %v959_v7, %v897_v48  ;;  %v902_v48 = vmul.f32 %v2401_v8, %v2401_v8 }
 0x15d   : > { %v961_v53 = vadd.f32 %v960_v31, %v898_v13  ;;  %v828_v39 = vadd.f32 %v827_v5, %v2384_v51  ;;  %v903_v31 = vmul.f32 %v2412_v19, %v2412_v19 }
 0x15f   : > { %v829_v18 = vadd.f32 %v2369_v34, %v828_v39  ;;  %v962_v27 = vadd.f32 %v961_v53, %v899_v33  ;;  %v904_v53 = vmul.f32 %v2397_v6, %v2397_v6 }
 0x161   : > { %v963_v10 = vadd.f32 %v962_v27, %v900_v4  ;;  %v830_v57 = vadd.f32 %v2380_v49, %v829_v18  ;;  %v905_v4 = vmul.f32 %v2408_v17, %v2408_v17 }
 0x163   : > { %v831_v7 = vadd.f32 %v830_v57, %v2401_v8  ;;  %v964_v29 = vadd.f32 %v963_v10, %v901_v25  ;;  %v906_v25 = vmul.f32 %v2429_v52, %v2429_v52 }
 0x165   : > { %v965_v13 = vadd.f32 %v964_v29, %v902_v48  ;;  %v832_v5 = vadd.f32 %v831_v7, %v2412_v19  ;;  %v907_v29 = vmul.f32 %v2440_v63, %v2440_v63 }
 0x167   : > { %v833_v39 = vadd.f32 %v2397_v6, %v832_v5  ;;  %v966_v33 = vadd.f32 %v965_v13, %v903_v31  ;;  %v908_v13 = vmul.f32 %v2425_v38, %v2425_v38 }
 0x169   : > { %v967_v18 = vadd.f32 %v966_v33, %v904_v53  ;;  %v834_v27 = vadd.f32 %v2408_v17, %v833_v39  ;;  %v909_v53 = vmul.f32 %v2436_v61, %v2436_v61 }
 0x16b   : > { %v835_v10 = vadd.f32 %v834_v27, %v2429_v52  ;;  %v968_v57 = vadd.f32 %v967_v18, %v905_v4  ;;  %v910_v4 = vmul.f32 %v2457_v37, %v2457_v37 }
 0x16d   : > { %v969_v48 = vadd.f32 %v968_v57, %v906_v25  ;;  %v836_v7 = vadd.f32 %v835_v10, %v2440_v63  ;;  %v911_v57 = vmul.f32 %v2468_v11, %v2468_v11 }
 0x16f   : > { %v837_v5 = vadd.f32 %v2425_v38, %v836_v7  ;;  %v970_v31 = vadd.f32 %v969_v48, %v907_v29  ;;  %v912_v48 = vmul.f32 %v2453_v30, %v2453_v30 }
 0x171   : > { %v971_v39 = vadd.f32 %v970_v31, %v908_v13  ;;  %v838_v33 = vadd.f32 %v2436_v61, %v837_v5  ;;  %v913_v13 = vmul.f32 %v2464_v9, %v2464_v9 }
 0x173   : > { %v839_v18 = vadd.f32 %v838_v33, %v2457_v37  ;;  %v972_v27 = vadd.f32 %v971_v39, %v909_v53  ;;  %v914_v53 = vmul.f32 %v2485_v55, %v2485_v55 }
 0x175   : > { %v973_v25 = vadd.f32 %v972_v27, %v910_v4  ;;  %v840_v10 = vadd.f32 %v839_v18, %v2468_v11  ;;  %v915_v27 = vmul.f32 %v2496_v26, %v2496_v26 }
 0x177   : > { %v841_v7 = vadd.f32 %v2453_v30, %v840_v10  ;;  %v974_v29 = vadd.f32 %v973_v25, %v911_v57  ;;  %v916_v25 = vmul.f32 %v2481_v54, %v2481_v54 }
 0x179   : > { %v975_v5 = vadd.f32 %v974_v29, %v912_v48  ;;  %v842_v31 = vadd.f32 %v2464_v9, %v841_v7  ;;  %v917_v48 = vmul.f32 %v2492_v28, %v2492_v28 }
 0x17b   : > { %v843_v39 = vadd.f32 %v842_v31, %v2485_v55  ;;  %v976_v33 = vadd.f32 %v975_v5, %v913_v13 }
 0x17d   : > { %v977_v4 = vadd.f32 %v976_v33, %v914_v53  ;;  %v844_v18 = vadd.f32 %v843_v39, %v2496_v26 }
 0x17f   : > { %v845_v10 = vadd.f32 %v2481_v54, %v844_v18  ;;  %v978_v57 = vadd.f32 %v977_v4, %v915_v27 }
 0x181   : > { %v846_v7 = vadd.f32 %v2492_v28, %v845_v10  ;;  %v979_v29 = vadd.f32 %v978_v57, %v916_v25  ;;  %v3697_v57 = vld [vmem:[#allocation26_spill] sm:$0xff]  ;;  %v3698_v25 = vld [vmem:[#allocation28_spill] sm:$0xff] }
 0x183   : > { %v847_v31 = vrot.slane %v846_v7, 4  ;;  %v980_v13 = vadd.f32 %v979_v29, %v917_v48  ;;  %v3686_v29 = vld [vmem:[#allocation14_spill] sm:$0xff] }
 0x184   : > { %v3696_v48 = vld [vmem:[#allocation22_spill] sm:$0xff] }
 0x185   : > { %v848_v5 = vadd.f32 %v847_v31, %v846_v7  ;;  %v981_v53 = vrot.slane %v980_v13, 4  ;;  %v3680_v31 = vld [vmem:[#allocation8_spill] sm:$0xff]  ;;  %v3687_v7 = vld [vmem:[#allocation19_spill] sm:$0xff] }
 0x187   : > { %v849_v39 = vrot.slane %v848_v5, 2  ;;  %v982_v33 = vadd.f32 %v981_v53, %v980_v13  ;;  %v3681_v13 = vld [vmem:[#allocation3_spill] sm:$0xff] }
 0x189   : > { %v850_v55 = vadd.f32 %v849_v39, %v848_v5  ;;  %v983_v26 = vrot.slane %v982_v33, 2  ;;  %v3689_v5 = vld [vmem:[#allocation17_spill] sm:$0xff] }
 0x18b   : > { %v851_v9 = vrot.slane %v850_v55, 1  ;;  %v984_v30 = vadd.f32 %v983_v26, %v982_v33  ;;  %v3688_v26 = vld [vmem:[#allocation23_spill] sm:$0xff] }
 0x18d   : > { %v852_v11 = vadd.f32 %v851_v9, %v850_v55  ;;  %v985_v37 = vrot.slane %v984_v30, 1  ;;  %v3690_v55 = vld [vmem:[#allocation21_spill] sm:$0xff]  ;;  %v3695_v9 = vld [vmem:[#allocation18_spill] sm:$0xff] }
 0x18f   : > { %v2603_v18 = vmul.f32 0.001953125, %v852_v11  ;;  %v986_v4 = vadd.f32 %v985_v37, %v984_v30  ;;  %v3691_v30 = vld [vmem:[#allocation25_spill] sm:$0xff]  ;;  %v3692_v11 = vld [vmem:[#allocation27_spill] sm:$0xff] }
 0x191   : > { %v987_v27 = vmul.f32 0.001953125, %v986_v4  ;;  %v988_v10 = vmul.f32 %v2603_v18, %v2603_v18  ;;  %v3678_v4 = vld [vmem:[#allocation2_spill] sm:$0xff]  ;;  %v3699_v17 = vsub.f32 %v2287_v42, %v2603_v18  ;;  %v3701_v63 = vsub.f32 %v2295_v46, %v2603_v18 }
 0x192   : > { %v3703_v39 = vsub.f32 %v2283_v40, %v2603_v18 }
 0x193   : > { %v989_v37 = vsub.f32 %v987_v27, %v988_v10  ;;  %v3679_v10 = vld [vmem:[#allocation5_spill] sm:$0xff]  ;;  %v3694_v27 = vld [vmem:[#allocation24_spill] sm:$0xff] }
 0x195   : > { %v990_v53 = vmax.f32 %v989_v37, 0.0  ;;  %v3682_v37 = vld [vmem:[#allocation6_spill] sm:$0xff] }
 0x197   : > { %v1055_v33 = vadd.f32 1e-05, %v990_v53 }
 0x199   : > { %2179 = vrsqrt.f32 %v1055_v33  ;;  %v3705_v33 = vsub.f32 %v2291_v44, %v2603_v18 }
 0x1a3   : > { %v2735_v6 = vpop.eup %2179 }
 0x1a4   : > { %v2741_v52 = vmul.f32 %v2735_v6, %v3699_v17  ;;  %v2747_v38 = vmul.f32 %v2735_v6, %v3701_v63  ;;  %v2753_v53 = vmul.f32 %v2735_v6, %v3703_v39  ;;  %v2759_v42 = vmul.f32 %v2735_v6, %v3705_v33 }
 0x1a5   : > { %v3707_v17 = vsub.f32 %v2315_v59, %v2603_v18  ;;  %v3709_v63 = vsub.f32 %v2326_v2, %v2603_v18  ;;  %v3711_v39 = vsub.f32 %v2310_v56, %v2603_v18  ;;  %v3713_v33 = vsub.f32 %v2322_v0, %v2603_v18 }
 0x1a6   : > { %3700 = vst [vmem:[#allocation2_spill] sm:$0xff] %v2741_v52  ;;  %3702 = vst [vmem:[#allocation5_spill] sm:$0xff] %v2747_v38 }
 0x1a7   : > { %3704 = vst [vmem:[#allocation8_spill] sm:$0xff] %v2753_v53  ;;  %3706 = vst [vmem:[#allocation3_spill] sm:$0xff] %v2759_v42  ;;  %v2765_v46 = vmul.f32 %v2735_v6, %v3707_v17  ;;  %v2771_v40 = vmul.f32 %v2735_v6, %v3709_v63  ;;  %v2777_v44 = vmul.f32 %v2735_v6, %v3711_v39 }
 0x1a8   : > { %v2783_v59 = vmul.f32 %v2735_v6, %v3713_v33  ;;  %v3715_v17 = vsub.f32 %v2343_v15, %v2603_v18  ;;  %v3717_v63 = vsub.f32 %v2354_v22, %v2603_v18  ;;  %v3719_v39 = vsub.f32 %v2338_v12, %v2603_v18 }
 0x1a9   : > { %3708 = vst [vmem:[#allocation6_spill] sm:$0xff] %v2765_v46  ;;  %3710 = vst [vmem:[#allocation14_spill] sm:$0xff] %v2771_v40  ;;  %v3721_v33 = vsub.f32 %v2350_v20, %v2603_v18 }
 0x1aa   : > { %3712 = vst [vmem:[#allocation19_spill] sm:$0xff] %v2777_v44  ;;  %3714 = vst [vmem:[#allocation23_spill] sm:$0xff] %v2783_v59  ;;  %v2789_v2 = vmul.f32 %v2735_v6, %v3715_v17  ;;  %v2795_v56 = vmul.f32 %v2735_v6, %v3717_v63  ;;  %v2801_v0 = vmul.f32 %v2735_v6, %v3719_v39 }
 0x1ab   : > { %v2807_v15 = vmul.f32 %v2735_v6, %v3721_v33  ;;  %v3723_v17 = vsub.f32 %v2371_v35, %v2603_v18  ;;  %v3725_v63 = vsub.f32 %v2382_v50, %v2603_v18  ;;  %v3727_v39 = vsub.f32 %v2366_v32, %v2603_v18 }
 0x1ac   : > { %3716 = vst [vmem:[#allocation17_spill] sm:$0xff] %v2789_v2  ;;  %3718 = vst [vmem:[#allocation21_spill] sm:$0xff] %v2795_v56  ;;  %v3729_v33 = vsub.f32 %v3678_v4, %v2603_v18 }
 0x1ad   : > { %3720 = vst [vmem:[#allocation25_spill] sm:$0xff] %v2801_v0  ;;  %3722 = vst [vmem:[#allocation27_spill] sm:$0xff] %v2807_v15  ;;  %v2813_v22 = vmul.f32 %v2735_v6, %v3723_v17  ;;  %v2819_v12 = vmul.f32 %v2735_v6, %v3725_v63  ;;  %v2825_v20 = vmul.f32 %v2735_v6, %v3727_v39 }
 0x1ae   : > { %v2831_v35 = vmul.f32 %v2735_v6, %v3729_v33  ;;  %v3731_v17 = vsub.f32 %v3679_v10, %v2603_v18  ;;  %v3733_v63 = vsub.f32 %v3680_v31, %v2603_v18  ;;  %v3735_v39 = vsub.f32 %v3681_v13, %v2603_v18 }
 0x1af   : > { %3724 = vst [vmem:[#allocation24_spill] sm:$0xff] %v2813_v22  ;;  %3726 = vst [vmem:[#allocation18_spill] sm:$0xff] %v2819_v12  ;;  %v3737_v33 = vsub.f32 %v3682_v37, %v2603_v18 }
 0x1b0   : > { %3728 = vst [vmem:[#allocation22_spill] sm:$0xff] %v2825_v20  ;;  %3730 = vst [vmem:[#allocation26_spill] sm:$0xff] %v2831_v35  ;;  %v2837_v50 = vmul.f32 %v2735_v6, %v3731_v17  ;;  %v2843_v32 = vmul.f32 %v2735_v6, %v3733_v63  ;;  %v2849_v4 = vmul.f32 %v2735_v6, %v3735_v39  ;;  %v3738_v17 = vld [vmem:[#allocation12_spill] sm:$0xff]  ;;  %v3741_v63 = vld [vmem:[#allocation15_spill] sm:$0xff] }
 0x1b1   : > { %v2855_v10 = vmul.f32 %v2735_v6, %v3737_v33  ;;  %v3739_v19 = vsub.f32 %v3738_v17, %v2603_v18  ;;  %v3743_v39 = vld [vmem:[#allocation10_spill] sm:$0xff]  ;;  %v3745_v33 = vsub.f32 %v3686_v29, %v2603_v18 }
 0x1b2   : > { %3732 = vst [vmem:[#allocation28_spill] sm:$0xff] %v2837_v50  ;;  %3734 = vst [vmem:[#allocation29_spill] sm:$0xff] %v2843_v32  ;;  %v3742_v32 = vsub.f32 %v3741_v63, %v2603_v18 }
 0x1b3   : > { %3736 = vst [vmem:[#allocation30_spill] sm:$0xff] %v2849_v4  ;;  %v2861_v31 = vmul.f32 %v2735_v6, %v3739_v19  ;;  %v3744_v4 = vsub.f32 %v3743_v39, %v2603_v18  ;;  %v2879_v17 = vmul.f32 %v2735_v6, %v3745_v33  ;;  %v3747_v19 = vsub.f32 %v3687_v7, %v2603_v18 }
 0x1b4   : > { %v2867_v13 = vmul.f32 %v2735_v6, %v3742_v32  ;;  %v3748_v32 = vsub.f32 %v3688_v26, %v2603_v18  ;;  %v3751_v33 = vsub.f32 %v3690_v55, %v2603_v18 }
 0x1b5   : > { %3740 = vst [vmem:[#allocation12_spill] sm:$0xff] %v2861_v31  ;;  %v2873_v37 = vmul.f32 %v2735_v6, %v3744_v4  ;;  %3746 = vst [vmem:[#allocation15_spill] sm:$0xff] %v2879_v17  ;;  %v2885_v63 = vmul.f32 %v2735_v6, %v3747_v19  ;;  %v3749_v4 = vsub.f32 %v3689_v5, %v2603_v18 }
 0x1b6   : > { %v2891_v39 = vmul.f32 %v2735_v6, %v3748_v32  ;;  %v2903_v7 = vmul.f32 %v2735_v6, %v3751_v33  ;;  %v3752_v19 = vsub.f32 %v3691_v30, %v2603_v18  ;;  %v3753_v32 = vsub.f32 %v3692_v11, %v2603_v18 }
 0x1b7   : > { %v2897_v29 = vmul.f32 %v2735_v6, %v3749_v4  ;;  %v3755_v4 = vsub.f32 %v2478_v62, %v2603_v18  ;;  %v3756_v33 = vsub.f32 %v2490_v24, %v2603_v18 }
 0x1b8   : > { %v2909_v26 = vmul.f32 %v2735_v6, %v3752_v19  ;;  %v2915_v5 = vmul.f32 %v2735_v6, %v3753_v32  ;;  %v3757_v19 = vsub.f32 %v2289_v43, %v2603_v18  ;;  %v3759_v32 = vsub.f32 %v2297_v47, %v2603_v18 }
 0x1b9   : > { %3750 = vst [vmem:[#allocation10_spill] sm:$0xff] %v2897_v29  ;;  %v2921_v55 = vmul.f32 %v2735_v6, %v3755_v4  ;;  %v2927_v30 = vmul.f32 %v2735_v6, %v3756_v33  ;;  %v3760_v4 = vsub.f32 %v2285_v41, %v2603_v18  ;;  %v3761_v33 = vsub.f32 %v2293_v45, %v2603_v18 }
 0x1ba   : > { %3754 = vst [vmem:[#allocation31_spill] sm:$0xff] %v2915_v5  ;;  %v2933_v11 = vmul.f32 %v2735_v6, %v3757_v19  ;;  %v2939_v62 = vmul.f32 %v2735_v6, %v3759_v32  ;;  %v3763_v19 = vsub.f32 %v2317_v60, %v2603_v18  ;;  %v3764_v32 = vsub.f32 %v2328_v3, %v2603_v18 }
 0x1bb   : > { %v2945_v24 = vmul.f32 %v2735_v6, %v3760_v4  ;;  %v2951_v43 = vmul.f32 %v2735_v6, %v3761_v33  ;;  %v3765_v4 = vsub.f32 %v2313_v58, %v2603_v18  ;;  %v3767_v33 = vsub.f32 %v2324_v1, %v2603_v18 }
 0x1bc   : > { %3758 = vst [vmem:[#allocation32_spill] sm:$0xff] %v2933_v11  ;;  %v2957_v47 = vmul.f32 %v2735_v6, %v3763_v19  ;;  %v2963_v41 = vmul.f32 %v2735_v6, %v3764_v32  ;;  %v3768_v19 = vsub.f32 %v2345_v16, %v2603_v18  ;;  %v3770_v32 = vsub.f32 %v2356_v23, %v2603_v18 }
 0x1bd   : > { %3762 = vst [vmem:[#allocation33_spill] sm:$0xff] %v2951_v43  ;;  %v2969_v45 = vmul.f32 %v2735_v6, %v3765_v4  ;;  %v2975_v60 = vmul.f32 %v2735_v6, %v3767_v33  ;;  %v3772_v4 = vsub.f32 %v2341_v14, %v2603_v18  ;;  %v3773_v33 = vsub.f32 %v2352_v21, %v2603_v18 }
 0x1be   : > { %v2981_v3 = vmul.f32 %v2735_v6, %v3768_v19  ;;  %v2987_v58 = vmul.f32 %v2735_v6, %v3770_v32  ;;  %v3775_v19 = vsub.f32 %v2373_v36, %v2603_v18  ;;  %v3777_v32 = vsub.f32 %v2384_v51, %v2603_v18 }
 0x1bf   : > { %3766 = vst [vmem:[#allocation34_spill] sm:$0xff] %v2969_v45  ;;  %v2993_v1 = vmul.f32 %v2735_v6, %v3772_v4  ;;  %v2999_v16 = vmul.f32 %v2735_v6, %v3773_v33  ;;  %v3779_v4 = vsub.f32 %v2369_v34, %v2603_v18  ;;  %v3781_v33 = vsub.f32 %v2380_v49, %v2603_v18 }
 0x1c0   : > { %3769 = vst [vmem:[#allocation35_spill] sm:$0xff] %v2981_v3  ;;  %3771 = vst [vmem:[#allocation36_spill] sm:$0xff] %v2987_v58  ;;  %v3005_v23 = vmul.f32 %v2735_v6, %v3775_v19  ;;  %v3011_v14 = vmul.f32 %v2735_v6, %v3777_v32  ;;  %v3783_v19 = vsub.f32 %v2401_v8, %v2603_v18  ;;  %v3785_v32 = vld [vmem:[#allocation9_spill] sm:$0xff] }
 0x1c1   : > { %3774 = vst [vmem:[#allocation37_spill] sm:$0xff] %v2999_v16  ;;  %v3017_v21 = vmul.f32 %v2735_v6, %v3779_v4  ;;  %v3023_v36 = vmul.f32 %v2735_v6, %v3781_v33  ;;  %v3788_v4 = vld [vmem:[#allocation4_spill] sm:$0xff]  ;;  %v3791_v33 = vld [vmem:[#allocation7_spill] sm:$0xff] }
 0x1c2   : > { %3776 = vst [vmem:[#allocation38_spill] sm:$0xff] %v3005_v23  ;;  %3778 = vst [vmem:[#allocation39_spill] sm:$0xff] %v3011_v14  ;;  %v3029_v51 = vmul.f32 %v2735_v6, %v3783_v19  ;;  %v3786_v14 = vsub.f32 %v3785_v32, %v2603_v18  ;;  %v3793_v19 = vld [vmem:[#allocation13_spill] sm:$0xff] }
 0x1c3   : > { %3780 = vst [vmem:[#allocation40_spill] sm:$0xff] %v3017_v21  ;;  %3782 = vst [vmem:[#allocation41_spill] sm:$0xff] %v3023_v36  ;;  %v3789_v21 = vsub.f32 %v3788_v4, %v2603_v18  ;;  %v3792_v36 = vsub.f32 %v3791_v33, %v2603_v18 }
 0x1c4   : > { %3784 = vst [vmem:[#allocation42_spill] sm:$0xff] %v3029_v51  ;;  %v3035_v34 = vmul.f32 %v2735_v6, %v3786_v14  ;;  %v3794_v51 = vsub.f32 %v3793_v19, %v2603_v18  ;;  %v3796_v14 = vld [vmem:[#allocation16_spill] sm:$0xff] }
 0x1c5   : > { %v3041_v49 = vmul.f32 %v2735_v6, %v3789_v21  ;;  %v3047_v8 = vmul.f32 %v2735_v6, %v3792_v36  ;;  %v3799_v21 = vld [vmem:[#allocation11_spill] sm:$0xff]  ;;  %v3802_v36 = vsub.f32 %v2436_v61, %v2603_v18 }
 0x1c6   : > { %3787 = vst [vmem:[#allocation9_spill] sm:$0xff] %v3035_v34  ;;  %v3053_v32 = vmul.f32 %v2735_v6, %v3794_v51  ;;  %v3797_v34 = vsub.f32 %v3796_v14, %v2603_v18  ;;  %v3804_v51 = vld [vmem:[#allocation20_spill] sm:$0xff] }
 0x1c7   : > { %3790 = vst [vmem:[#allocation4_spill] sm:$0xff] %v3041_v49  ;;  %v3800_v49 = vsub.f32 %v3799_v21, %v2603_v18  ;;  %v3071_v19 = vmul.f32 %v2735_v6, %v3802_v36  ;;  %v3811_v36 = vsub.f32 %v3696_v48, %v2603_v18 }
 0x1c8   : > { %3795 = vst [vmem:[#allocation7_spill] sm:$0xff] %v3053_v32  ;;  %v3059_v4 = vmul.f32 %v2735_v6, %v3797_v34  ;;  %v3805_v32 = vsub.f32 %v3804_v51, %v2603_v18  ;;  %v3807_v34 = vsub.f32 %v3694_v27, %v2603_v18 }
 0x1c9   : > { %v3065_v33 = vmul.f32 %v2735_v6, %v3800_v49  ;;  %3803 = vst [vmem:[#allocation11_spill] sm:$0xff] %v3071_v19  ;;  %v3809_v49 = vsub.f32 %v3695_v9, %v2603_v18  ;;  %v3095_v51 = vmul.f32 %v2735_v6, %v3811_v36  ;;  %v3819_v36 = vsub.f32 %v2492_v28, %v2603_v18  ;;  %v3838_v19 = vld [vmem:[#allocation29_spill] sm:$0xff] }
 0x1ca   : > { %3798 = vst [vmem:[#allocation13_spill] sm:$0xff] %v3059_v4  ;;  %v3077_v14 = vmul.f32 %v2735_v6, %v3805_v32  ;;  %v3083_v21 = vmul.f32 %v2735_v6, %v3807_v34  ;;  %v3813_v32 = vsub.f32 %v3697_v57, %v2603_v18  ;;  %v3815_v34 = vsub.f32 %v3698_v25, %v2603_v18 }
 0x1cb   : > { %3801 = vst [vmem:[#allocation16_spill] sm:$0xff] %v3065_v33  ;;  %v3089_v61 = vmul.f32 %v2735_v6, %v3809_v49  ;;  %3812 = vst [vmem:[#allocation45_spill] sm:$0xff] %v3095_v51  ;;  %v3817_v49 = vsub.f32 %v2481_v54, %v2603_v18  ;;  %v3119_v57 = vmul.f32 %v2735_v6, %v3819_v36  ;;  %v3125_v25 = vmul.f32 0.2, %v2747_v38  ;;  %v3839_v38 = vld [vmem:[#allocation30_spill] sm:$0xff] }
 0x1cc   : > { %3806 = vst [vmem:[#allocation20_spill] sm:$0xff] %v3077_v14  ;;  %3808 = vst [vmem:[#allocation43_spill] sm:$0xff] %v3083_v21  ;;  %v3101_v27 = vmul.f32 %v2735_v6, %v3813_v32  ;;  %v3107_v9 = vmul.f32 %v2735_v6, %v3815_v34  ;;  %v3122_v32 = vmul.f32 0.2, %v2741_v52  ;;  %v3128_v34 = vmul.f32 0.2, %v2753_v53 }
 0x1cd   : > { %3810 = vst [vmem:[#allocation44_spill] sm:$0xff] %v3089_v61  ;;  %v3113_v48 = vmul.f32 %v2735_v6, %v3817_v49  ;;  %3820 = vst [vmem:[#allocation49_spill] sm:$0xff] %v3119_v57  ;;  %v3131_v54 = vmul.f32 0.2, %v2759_v42  ;;  %v3134_v49 = vmul.f32 0.2, %v2765_v46 }
 0x1ce   : > { %3814 = vst [vmem:[#allocation46_spill] sm:$0xff] %v3101_v27  ;;  %3816 = vst [vmem:[#allocation47_spill] sm:$0xff] %v3107_v9  ;;  %v3137_v28 = vmul.f32 0.2, %v2771_v40  ;;  %v3140_v6 = vmul.f32 0.2, %v2777_v44 }
 0x1cf   : > { %3818 = vst [vmem:[#allocation48_spill] sm:$0xff] %v3113_v48  ;;  %3821 = vst [vmem:[#allocation50_spill] sm:$0xff] %v3122_v32  ;;  %v3143_v18 = vmul.f32 0.2, %v2783_v59  ;;  %v3146_v36 = vmul.f32 0.2, %v2789_v2 }
 0x1d0   : > { %3822 = vst [vmem:[#allocation51_spill] sm:$0xff] %v3125_v25  ;;  %3823 = vst [vmem:[#allocation52_spill] sm:$0xff] %v3128_v34  ;;  %v3151_v48 = vmul.f32 0.2, %v2795_v56  ;;  %v3154_v9 = vmul.f32 0.2, %v2801_v0 }
 0x1d1   : > { %3824 = vst [vmem:[#allocation53_spill] sm:$0xff] %v3131_v54  ;;  %3825 = vst [vmem:[#allocation54_spill] sm:$0xff] %v3134_v49  ;;  %v3157_v27 = vmul.f32 0.2, %v2807_v15  ;;  %v3162_v61 = vmul.f32 0.2, %v2813_v22 }
 0x1d2   : > { %3826 = vst [vmem:[#allocation55_spill] sm:$0xff] %v3137_v28  ;;  %3827 = vst [vmem:[#allocation56_spill] sm:$0xff] %v3140_v6  ;;  %v3165_v21 = vmul.f32 0.2, %v2819_v12  ;;  %v3168_v57 = vmul.f32 0.2, %v2825_v20 }
 0x1d3   : > { %3828 = vst [vmem:[#allocation57_spill] sm:$0xff] %v3143_v18  ;;  %3829 = vst [vmem:[#allocation58_spill] sm:$0xff] %v3146_v36  ;;  %v3173_v52 = vmul.f32 0.2, %v2831_v35  ;;  %v3176_v14 = vmul.f32 0.2, %v2837_v50 }
 0x1d4   : > { %3830 = vst [vmem:[#allocation59_spill] sm:$0xff] %v3151_v48  ;;  %3831 = vst [vmem:[#allocation60_spill] sm:$0xff] %v3154_v9  ;;  %v3179_v51 = vmul.f32 0.2, %v3838_v19  ;;  %v3184_v33 = vmul.f32 0.2, %v3839_v38 }
 0x1d5   : > { %3832 = vst [vmem:[#allocation61_spill] sm:$0xff] %v3157_v27  ;;  %3833 = vst [vmem:[#allocation62_spill] sm:$0xff] %v3162_v61  ;;  %v3187_v4 = vmul.f32 0.2, %v2855_v10  ;;  %v3190_v32 = vmul.f32 0.2, %v2861_v31 }
 0x1d6   : > { %3834 = vst [vmem:[#allocation63_spill] sm:$0xff] %v3165_v21  ;;  %3835 = vst [vmem:[#allocation64_spill] sm:$0xff] %v3168_v57  ;;  %v3195_v53 = vmul.f32 0.2, %v2867_v13  ;;  %v3198_v19 = vmul.f32 0.2, %v2873_v37 }
 0x1d7   : > { %3836 = vst [vmem:[#allocation65_spill] sm:$0xff] %v3173_v52  ;;  %3837 = vst [vmem:[#allocation66_spill] sm:$0xff] %v3176_v14  ;;  %v3201_v25 = vmul.f32 0.2, %v2879_v17  ;;  %v3206_v42 = vmul.f32 0.2, %v2885_v63  ;;  %v1203_v14 = vmax.f32 %v3839_v38, %v3184_v33 }
 0x1d8   : > { %v3209_v31 = vmul.f32 0.2, %v2891_v39  ;;  %v3212_v34 = vmul.f32 0.2, %v2897_v29  ;;  %v3217_v46 = vmul.f32 0.2, %v2903_v7 }
 0x1d9   : > { %v3220_v17 = vmul.f32 0.2, %v2909_v26  ;;  %v3223_v54 = vmul.f32 0.2, %v2915_v5  ;;  %v3228_v40 = vmul.f32 0.2, %v2921_v55  ;;  %v1209_v38 = vmax.f32 %v2885_v63, %v3206_v42 }
 0x1da   : > { %v3231_v29 = vmul.f32 0.2, %v2927_v30  ;;  %v3234_v49 = vmul.f32 0.2, %v2933_v11  ;;  %v3239_v44 = vmul.f32 0.2, %v2939_v62  ;;  %v1210_v33 = vmax.f32 %v2891_v39, %v3209_v31 }
 0x1db   : > { %v3242_v5 = vmul.f32 0.2, %v2945_v24  ;;  %v3245_v28 = vmul.f32 0.2, %v2951_v43  ;;  %v3250_v59 = vmul.f32 0.2, %v2957_v47 }
 0x1dc   : > { %v3253_v11 = vmul.f32 0.2, %v2963_v41  ;;  %v3256_v6 = vmul.f32 0.2, %v2969_v45  ;;  %v3261_v2 = vmul.f32 0.2, %v2975_v60  ;;  %v1216_v42 = vmax.f32 %v2927_v30, %v3231_v29 }
 0x1dd   : > { %v3264_v43 = vmul.f32 0.2, %v2981_v3  ;;  %v3267_v18 = vmul.f32 0.2, %v2987_v58  ;;  %v3272_v56 = vmul.f32 0.2, %v2993_v1  ;;  %v1218_v39 = vmax.f32 %v2939_v62, %v3239_v44 }
 0x1de   : > { %v3275_v45 = vmul.f32 0.2, %v2999_v16  ;;  %v3278_v36 = vmul.f32 0.2, %v3005_v23  ;;  %v3844_v0 = vld [vmem:[#allocation39_spill] sm:$0xff]  ;;  %v3845_v58 = vld [vmem:[#allocation40_spill] sm:$0xff]  ;;  %v1224_v30 = vmax.f32 %v2975_v60, %v3261_v2 }
 0x1df   : > { %3840 = vst [vmem:[#allocation30_spill] sm:$0xff] %v3264_v43  ;;  %3841 = vst [vmem:[#allocation67_spill] sm:$0xff] %v3267_v18  ;;  %v3283_v3 = vmul.f32 0.2, %v3844_v0  ;;  %v3286_v18 = vmul.f32 0.2, %v3845_v58 }
 0x1e0   : > { %3842 = vst [vmem:[#allocation68_spill] sm:$0xff] %v3275_v45  ;;  %3843 = vst [vmem:[#allocation69_spill] sm:$0xff] %v3278_v36  ;;  %v3846_v43 = vld [vmem:[#allocation41_spill] sm:$0xff]  ;;  %v3848_v15 = vld [vmem:[#allocation42_spill] sm:$0xff]  ;;  %v3305_v22 = vmul.f32 0.2, %v3047_v8 }
 0x1e1   : > { %v3289_v48 = vmul.f32 0.2, %v3846_v43  ;;  %v3294_v16 = vmul.f32 0.2, %v3848_v15  ;;  %v3849_v23 = vld [vmem:[#allocation9_spill] sm:$0xff]  ;;  %v3851_v45 = vld [vmem:[#allocation4_spill] sm:$0xff] }
 0x1e2   : > { %v3297_v36 = vmul.f32 0.2, %v3849_v23  ;;  %v3300_v9 = vmul.f32 0.2, %v3851_v45  ;;  %v3853_v43 = vld [vmem:[#allocation7_spill] sm:$0xff]  ;;  %v3855_v58 = vld [vmem:[#allocation13_spill] sm:$0xff] }
 0x1e3   : > { %3847 = vst [vmem:[#allocation39_spill] sm:$0xff] %v3289_v48  ;;  %v3308_v48 = vmul.f32 0.2, %v3853_v43  ;;  %v3311_v27 = vmul.f32 0.2, %v3855_v58  ;;  %v3857_v12 = vld [vmem:[#allocation16_spill] sm:$0xff] }
 0x1e4   : > { %3850 = vst [vmem:[#allocation42_spill] sm:$0xff] %v3297_v36  ;;  %3852 = vst [vmem:[#allocation70_spill] sm:$0xff] %v3300_v9  ;;  %v3316_v23 = vmul.f32 0.2, %v3857_v12  ;;  %v3858_v45 = vld [vmem:[#allocation11_spill] sm:$0xff]  ;;  %v3860_v36 = vld [vmem:[#allocation20_spill] sm:$0xff] }
 0x1e5   : > { %3854 = vst [vmem:[#allocation71_spill] sm:$0xff] %v3308_v48  ;;  %3856 = vst [vmem:[#allocation72_spill] sm:$0xff] %v3311_v27  ;;  %v3319_v9 = vmul.f32 0.2, %v3858_v45  ;;  %v3322_v61 = vmul.f32 0.2, %v3860_v36 }
 0x1e6   : > { %v3862_v20 = vld [vmem:[#allocation43_spill] sm:$0xff]  ;;  %v3863_v58 = vld [vmem:[#allocation44_spill] sm:$0xff]  ;;  %v3864_v48 = vld [vmem:[#allocation45_spill] sm:$0xff] }
 0x1e7   : > { %3859 = vst [vmem:[#allocation73_spill] sm:$0xff] %v3319_v9  ;;  %3861 = vst [vmem:[#allocation74_spill] sm:$0xff] %v3322_v61  ;;  %v3327_v43 = vmul.f32 0.2, %v3862_v20  ;;  %v3330_v27 = vmul.f32 0.2, %v3863_v58 }
 0x1e8   : > { %v3333_v21 = vmul.f32 0.2, %v3864_v48  ;;  %v3865_v52 = vld [vmem:[#allocation29_spill] sm:$0xff]  ;;  %v3866_v45 = vld [vmem:[#allocation46_spill] sm:$0xff]  ;;  %v3867_v36 = vld [vmem:[#allocation47_spill] sm:$0xff]  ;;  %v1204_v48 = vmax.f32 %v2855_v10, %v3187_v4 }
 0x1e9   : > { %v1202_v35 = vmax.f32 %v3865_v52, %v3179_v51  ;;  %v3338_v9 = vmul.f32 0.2, %v3866_v45  ;;  %v3341_v61 = vmul.f32 0.2, %v3867_v36  ;;  %v3868_v12 = vld [vmem:[#allocation48_spill] sm:$0xff]  ;;  %v3870_v50 = vld [vmem:[#allocation49_spill] sm:$0xff]  ;;  %v1206_v45 = vmax.f32 %v2867_v13, %v3195_v53 }
 0x1ea   : > { %v3344_v57 = vmul.f32 0.2, %v3868_v12  ;;  %v3349_v58 = vmul.f32 0.2, %v3870_v50  ;;  %v3871_v52 = vld [vmem:[#allocation12_spill] sm:$0xff]  ;;  %v1207_v36 = vmax.f32 %v2873_v37, %v3198_v19  ;;  %v3872_v12 = vld [vmem:[#allocation15_spill] sm:$0xff]  ;;  %v1213_v53 = vmax.f32 %v2909_v26, %v3220_v17 }
 0x1eb   : > { %v1205_v51 = vmax.f32 %v3871_v52, %v3190_v32  ;;  %v3873_v10 = vld [vmem:[#allocation10_spill] sm:$0xff]  ;;  %v1212_v32 = vmax.f32 %v2903_v7, %v3217_v46  ;;  %v3874_v13 = vld [vmem:[#allocation31_spill] sm:$0xff]  ;;  %v3875_v31 = vld [vmem:[#allocation32_spill] sm:$0xff]  ;;  %v1219_v46 = vmax.f32 %v2945_v24, %v3242_v5  ;;  %v1221_v26 = vmax.f32 %v2957_v47, %v3250_v59 }
 0x1ec   : > { %3869 = vst [vmem:[#allocation43_spill] sm:$0xff] %v3344_v57  ;;  %v1208_v57 = vmax.f32 %v3872_v12, %v3201_v25  ;;  %v1211_v4 = vmax.f32 %v3873_v10, %v3212_v34  ;;  %v1214_v37 = vmax.f32 %v3874_v13, %v3223_v54  ;;  %v1215_v12 = vmax.f32 %v2921_v55, %v3228_v40  ;;  %v3876_v17 = vld [vmem:[#allocation33_spill] sm:$0xff]  ;;  %v3877_v29 = vld [vmem:[#allocation34_spill] sm:$0xff]  ;;  %v3879_v44 = vld [vmem:[#allocation35_spill] sm:$0xff] }
 0x1ed   : > { %v1217_v63 = vmax.f32 %v3875_v31, %v3234_v49  ;;  %v1220_v7 = vmax.f32 %v3876_v17, %v3245_v28  ;;  %v1222_v40 = vmax.f32 %v2963_v41, %v3253_v11  ;;  %v1223_v55 = vmax.f32 %v3877_v29, %v3256_v6  ;;  %v3878_v19 = vld [vmem:[#allocation30_spill] sm:$0xff]  ;;  %v3880_v25 = vld [vmem:[#allocation67_spill] sm:$0xff]  ;;  %v3881_v5 = vld [vmem:[#allocation36_spill] sm:$0xff] }
 0x1ee   : > { %v1225_v62 = vmax.f32 %v3879_v44, %v3878_v19  ;;  %v1226_v24 = vmax.f32 %v3881_v5, %v3880_v25  ;;  %v1227_v34 = vmax.f32 %v2993_v1, %v3272_v56  ;;  %v3882_v54 = vld [vmem:[#allocation68_spill] sm:$0xff]  ;;  %v3883_v59 = vld [vmem:[#allocation37_spill] sm:$0xff]  ;;  %v3885_v41 = vld [vmem:[#allocation38_spill] sm:$0xff]  ;;  %v1230_v28 = vmax.f32 %v3844_v0, %v3283_v3 }
 0x1ef   : > { %v1228_v47 = vmax.f32 %v3883_v59, %v3882_v54  ;;  %v3884_v11 = vld [vmem:[#allocation69_spill] sm:$0xff]  ;;  %v3886_v2 = vld [vmem:[#allocation40_spill] sm:$0xff]  ;;  %v3887_v6 = vld [vmem:[#allocation39_spill] sm:$0xff]  ;;  %v1233_v13 = vmax.f32 %v3848_v15, %v3294_v16  ;;  %v1236_v44 = vmax.f32 %v3047_v8, %v3305_v22 }
 0x1f0   : > { %v1229_v49 = vmax.f32 %v3885_v41, %v3884_v11  ;;  %v1231_v60 = vmax.f32 %v3886_v2, %v3286_v18  ;;  %v3888_v52 = vld [vmem:[#allocation41_spill] sm:$0xff]  ;;  %v3889_v56 = vld [vmem:[#allocation42_spill] sm:$0xff]  ;;  %v3892_v29 = vld [vmem:[#allocation4_spill] sm:$0xff] }
 0x1f1   : > { %v1232_v10 = vmax.f32 %v3888_v52, %v3887_v6  ;;  %v3890_v1 = vld [vmem:[#allocation9_spill] sm:$0xff]  ;;  %v3891_v17 = vld [vmem:[#allocation70_spill] sm:$0xff]  ;;  %v3893_v25 = vld [vmem:[#allocation71_spill] sm:$0xff] }
 0x1f2   : > { %v1234_v31 = vmax.f32 %v3890_v1, %v3889_v56  ;;  %v1235_v19 = vmax.f32 %v3892_v29, %v3891_v17  ;;  %v3894_v0 = vld [vmem:[#allocation7_spill] sm:$0xff]  ;;  %v3895_v5 = vld [vmem:[#allocation72_spill] sm:$0xff]  ;;  %v3896_v18 = vld [vmem:[#allocation13_spill] sm:$0xff]  ;;  %v1242_v56 = vmax.f32 %v3862_v20, %v3327_v43 }
 0x1f3   : > { %v1237_v3 = vmax.f32 %v3894_v0, %v3893_v25  ;;  %v1238_v54 = vmax.f32 %v3896_v18, %v3895_v5  ;;  %v3897_v59 = vld [vmem:[#allocation16_spill] sm:$0xff]  ;;  %v3898_v41 = vld [vmem:[#allocation73_spill] sm:$0xff]  ;;  %v3899_v15 = vld [vmem:[#allocation11_spill] sm:$0xff]  ;;  %v1248_v18 = vmax.f32 %v3870_v50, %v3349_v58 }
 0x1f4   : > { %v1239_v11 = vmax.f32 %v3897_v59, %v3316_v23  ;;  %v1240_v16 = vmax.f32 %v3899_v15, %v3898_v41  ;;  %v3900_v2 = vld [vmem:[#allocation74_spill] sm:$0xff]  ;;  %v3901_v6 = vld [vmem:[#allocation20_spill] sm:$0xff]  ;;  %v3903_v8 = vld [vmem:[#allocation45_spill] sm:$0xff] }
 0x1f5   : > { %v1241_v52 = vmax.f32 %v3901_v6, %v3900_v2  ;;  %v3902_v22 = vld [vmem:[#allocation44_spill] sm:$0xff]  ;;  %v1244_v1 = vmax.f32 %v3903_v8, %v3333_v21  ;;  %v3904_v17 = vld [vmem:[#allocation46_spill] sm:$0xff]  ;;  %v3905_v25 = vld [vmem:[#allocation47_spill] sm:$0xff] }
 0x1f6   : > { %v1243_v23 = vmax.f32 %v3902_v22, %v3330_v27  ;;  %v1245_v29 = vmax.f32 %v3904_v17, %v3338_v9  ;;  %v1246_v20 = vmax.f32 %v3905_v25, %v3341_v61  ;;  %v3906_v43 = vld [vmem:[#allocation43_spill] sm:$0xff]  ;;  %v3907_v0 = vld [vmem:[#allocation48_spill] sm:$0xff]  ;;  %v3908_v59 = vld [vmem:[#allocation2_spill] sm:$0xff] }
 0x1f7   : > { %v1247_v5 = vmax.f32 %v3907_v0, %v3906_v43  ;;  %v3909_v27 = vld [vmem:[#allocation50_spill] sm:$0xff]  ;;  %v3911_v15 = vld [vmem:[#allocation5_spill] sm:$0xff]  ;;  %v3912_v21 = vld [vmem:[#allocation51_spill] sm:$0xff] }
 0x1f8   : > { %v3910_v41 = vmax.f32 %v3908_v59, %v3909_v27  ;;  %v3913_v2 = vmax.f32 %v3911_v15, %v3912_v21  ;;  %v3914_v6 = vld [vmem:[#allocation8_spill] sm:$0xff]  ;;  %v3917_v61 = vld [vmem:[#allocation3_spill] sm:$0xff]  ;;  %v3918_v17 = vld [vmem:[#allocation53_spill] sm:$0xff] }
 0x1f9   : > { %v3915_v22 = vld [vmem:[#allocation52_spill] sm:$0xff]  ;;  %v3919_v25 = vmax.f32 %v3917_v61, %v3918_v17  ;;  %v3920_v43 = vld [vmem:[#allocation6_spill] sm:$0xff]  ;;  %v3924_v59 = vld [vmem:[#allocation55_spill] sm:$0xff] }
 0x1fa   : > { %v1807_v9 = vpack.c.bf16 %v3913_v2, %v3910_v41  ;;  %v3916_v8 = vmax.f32 %v3914_v6, %v3915_v22  ;;  %v3921_v50 = vld [vmem:[#allocation54_spill] sm:$0xff]  ;;  %v3926_v2 = vld [vmem:[#allocation19_spill] sm:$0xff]  ;;  %v3927_v41 = vld [vmem:[#allocation56_spill] sm:$0xff] }
 0x1fb   : > { %v3922_v58 = vmax.f32 %v3920_v43, %v3921_v50  ;;  %v3923_v27 = vld [vmem:[#allocation14_spill] sm:$0xff]  ;;  %v3928_v6 = vmax.f32 %v3926_v2, %v3927_v41  ;;  %v3929_v22 = vld [vmem:[#allocation23_spill] sm:$0xff]  ;;  %v3930_v17 = vld [vmem:[#allocation57_spill] sm:$0xff] }
 0x1fc   : > { %v1812_v0 = vpack.c.bf16 %v3919_v25, %v3916_v8  ;;  %v3925_v15 = vmax.f32 %v3923_v27, %v3924_v59  ;;  %v3931_v61 = vmax.f32 %v3929_v22, %v3930_v17  ;;  %v3932_v25 = vld [vmem:[#allocation17_spill] sm:$0xff]  ;;  %v3933_v43 = vld [vmem:[#allocation58_spill] sm:$0xff]  ;;  %v3936_v59 = vld [vmem:[#allocation59_spill] sm:$0xff]  ;;  %1808 = vst [vmem:[%s3434_s9] sm:$0xff] %v1807_v9  }
 0x1fd   : > { %v3934_v50 = vmax.f32 %v3932_v25, %v3933_v43  ;;  %v3935_v27 = vld [vmem:[#allocation21_spill] sm:$0xff]  ;;  %v3939_v41 = vld [vmem:[#allocation60_spill] sm:$0xff]  ;;  %v3941_v22 = vld [vmem:[#allocation27_spill] sm:$0xff] }
 0x1fe   : > { %v1817_v21 = vpack.c.bf16 %v3925_v15, %v3922_v58  ;;  %v1822_v8 = vpack.c.bf16 %v3931_v61, %v3928_v6  ;;  %v3937_v15 = vmax.f32 %v3935_v27, %v3936_v59  ;;  %v3938_v2 = vld [vmem:[#allocation25_spill] sm:$0xff]  ;;  %1964 = vst [vmem:[%s3434_s9 + $0x8] sm:$0xff] %v1812_v0   ;;  %v3944_v43 = vld [vmem:[#allocation24_spill] sm:$0xff]  ;;  %v3945_v27 = vld [vmem:[#allocation62_spill] sm:$0xff] }
 0x1ff   : > { %v3940_v17 = vmax.f32 %v3938_v2, %v3939_v41  ;;  %v3942_v6 = vld [vmem:[#allocation61_spill] sm:$0xff]  ;;  %v3946_v59 = vmax.f32 %v3944_v43, %v3945_v27  ;;  %v3956_v43 = vld [vmem:[#allocation28_spill] sm:$0xff] }
 0x200   : > { %v1827_v58 = vpack.c.bf16 %v3937_v15, %v3934_v50  ;;  %v3943_v61 = vmax.f32 %v3941_v22, %v3942_v6  ;;  %v3947_v15 = vld [vmem:[#allocation18_spill] sm:$0xff]  ;;  %v3948_v50 = vld [vmem:[#allocation63_spill] sm:$0xff]  ;;  %v3951_v22 = vld [vmem:[#allocation64_spill] sm:$0xff]  ;;  %1965 = vst [vmem:[%s3434_s9 + $0x10] sm:$0xff] %v1817_v21   ;;  %v1892_v21 = vpack.c.bf16 %v1220_v7, %v1219_v46 }
 0x201   : > { %v3949_v2 = vmax.f32 %v3947_v15, %v3948_v50  ;;  %v3950_v6 = vld [vmem:[#allocation22_spill] sm:$0xff]  ;;  %v3954_v9 = vld [vmem:[#allocation65_spill] sm:$0xff]  ;;  %1966 = vst [vmem:[%s3434_s9 + $0x18] sm:$0xff] %v1822_v8  }
 0x202   : > { %v1832_v25 = vpack.c.bf16 %v3943_v61, %v3940_v17  ;;  %v3952_v17 = vmax.f32 %v3950_v6, %v3951_v22  ;;  %v3953_v61 = vld [vmem:[#allocation26_spill] sm:$0xff]  ;;  %1967 = vst [vmem:[%s3434_s9 + $0x20] sm:$0xff] %v1827_v58   ;;  %v1857_v6 = vpack.c.bf16 %v1206_v45, %v1205_v51  ;;  %v1862_v22 = vpack.c.bf16 %v1208_v57, %v1207_v36 }
 0x203   : > { %v1837_v41 = vpack.c.bf16 %v3949_v2, %v3946_v59  ;;  %v3955_v0 = vmax.f32 %v3953_v61, %v3954_v9  ;;  %v3957_v15 = vld [vmem:[#allocation66_spill] sm:$0xff]  ;;  %v1852_v59 = vpack.c.bf16 %v1204_v48, %v1203_v14  ;;  %v1867_v9 = vpack.c.bf16 %v1210_v33, %v1209_v38  ;;  %1980 = vst [vmem:[%s3434_s9 + $0x88] sm:$0xff] %v1892_v21  }
 0x204   : > { %v3958_v50 = vmax.f32 %v3956_v43, %v3957_v15  ;;  %1968 = vst [vmem:[%s3434_s9 + $0x28] sm:$0xff] %v1832_v25   ;;  %v1872_v61 = vpack.c.bf16 %v1212_v32, %v1211_v4  ;;  %v1882_v14 = vpack.c.bf16 %v1216_v42, %v1215_v12  ;;  %v1887_v48 = vpack.c.bf16 %v1218_v39, %v1217_v63 }
 0x205   : > { %v1842_v27 = vpack.c.bf16 %v3955_v0, %v3952_v17  ;;  %1969 = vst [vmem:[%s3434_s9 + $0x30] sm:$0xff] %v1837_v41   ;;  %1972 = vst [vmem:[%s3434_s9 + $0x48] sm:$0xff] %v1852_v59   ;;  %v1897_v45 = vpack.c.bf16 %v1222_v40, %v1221_v26  ;;  %v1902_v57 = vpack.c.bf16 %v1224_v30, %v1223_v55 }
 0x206   : > { %v1847_v2 = vpack.c.bf16 %v1202_v35, %v3958_v50  ;;  %v1877_v35 = vpack.c.bf16 %v1214_v37, %v1213_v53  ;;  %1973 = vst [vmem:[%s3434_s9 + $0x50] sm:$0xff] %v1857_v6   ;;  %1974 = vst [vmem:[%s3434_s9 + $0x58] sm:$0xff] %v1862_v22   ;;  %v1907_v36 = vpack.c.bf16 %v1226_v24, %v1225_v62 }
 0x207   : > { %1970 = vst [vmem:[%s3434_s9 + $0x38] sm:$0xff] %v1842_v27   ;;  %1975 = vst [vmem:[%s3434_s9 + $0x60] sm:$0xff] %v1867_v9   ;;  %v1912_v51 = vpack.c.bf16 %v1228_v47, %v1227_v34  ;;  %v1917_v38 = vpack.c.bf16 %v1230_v28, %v1229_v49  ;;  %v1922_v33 = vpack.c.bf16 %v1232_v10, %v1231_v60 }
 0x208   : > { %1971 = vst [vmem:[%s3434_s9 + $0x40] sm:$0xff] %v1847_v2   ;;  %1976 = vst [vmem:[%s3434_s9 + $0x68] sm:$0xff] %v1872_v61   ;;  %v1927_v4 = vpack.c.bf16 %v1234_v31, %v1233_v13  ;;  %v1932_v32 = vpack.c.bf16 %v1236_v44, %v1235_v19  ;;  %v1937_v53 = vpack.c.bf16 %v1238_v54, %v1237_v3 }
 0x209   : > { %1977 = vst [vmem:[%s3434_s9 + $0x70] sm:$0xff] %v1877_v35   ;;  %1978 = vst [vmem:[%s3434_s9 + $0x78] sm:$0xff] %v1882_v14   ;;  %v1942_v37 = vpack.c.bf16 %v1240_v16, %v1239_v11  ;;  %v1947_v12 = vpack.c.bf16 %v1242_v56, %v1241_v52  ;;  %v1952_v42 = vpack.c.bf16 %v1244_v1, %v1243_v23 }
 0x20a   : > { %1979 = vst [vmem:[%s3434_s9 + $0x80] sm:$0xff] %v1887_v48   ;;  %1981 = vst [vmem:[%s3434_s9 + $0x90] sm:$0xff] %v1897_v45   ;;  %v1957_v63 = vpack.c.bf16 %v1246_v20, %v1245_v29  ;;  %v1962_v39 = vpack.c.bf16 %v1248_v18, %v1247_v5 }
 0x20b   : > { %1982 = vst [vmem:[%s3434_s9 + $0x98] sm:$0xff] %v1902_v57   ;;  %1983 = vst [vmem:[%s3434_s9 + $0xa0] sm:$0xff] %v1907_v36  }
 0x20c   : > { %1984 = vst [vmem:[%s3434_s9 + $0xa8] sm:$0xff] %v1912_v51   ;;  %1985 = vst [vmem:[%s3434_s9 + $0xb0] sm:$0xff] %v1917_v38  }
 0x20d   : > { %1986 = vst [vmem:[%s3434_s9 + $0xb8] sm:$0xff] %v1922_v33   ;;  %1987 = vst [vmem:[%s3434_s9 + $0xc0] sm:$0xff] %v1927_v4  }
 0x20e   : > { %1988 = vst [vmem:[%s3434_s9 + $0xc8] sm:$0xff] %v1932_v32   ;;  %1989 = vst [vmem:[%s3434_s9 + $0xd0] sm:$0xff] %v1937_v53  }
 0x20f   : > { %1990 = vst [vmem:[%s3434_s9 + $0xd8] sm:$0xff] %v1942_v37   ;;  %1991 = vst [vmem:[%s3434_s9 + $0xe0] sm:$0xff] %v1947_v12  }
 0x210   : > { %1992 = vst [vmem:[%s3434_s9 + $0xe8] sm:$0xff] %v1952_v42   ;;  %1993 = vst [vmem:[%s3434_s9 + $0xf0] sm:$0xff] %v1957_v63  }
 0x211   : > { %1994 = vst [vmem:[%s3434_s9 + $0xf8] sm:$0xff] %v1962_v39  }
 0x212 PF: > { %s13_s12 = sadd.s32 1, %s2187_s12  }
 0x213   : > { %p10_p4 = scmp.ge.s32.totalorder %s13_s12, 4  }
 0x215   :  { %12 = sbr.rel (!%p10_p4) target bundleno = 1 (0x1), region = 62 }

// kernel: _lambda_.9
= control target key start
LH: loop header
LB: loop body
LE: loop exit
PB: predicated region body
PF: predicated region fallthrough
CT: control target
= control target key end

     0   :  { %s1046_s12 = smov 0   ;;  %s1231_s0 = inlined_call_operand.vmem [shape: bf16[256,256], index: 0, kind: input, shape index: {}]   ;;  %s1232_s1 = inlined_call_operand.vmem [shape: bf16[256,128], index: 1, kind: input, shape index: {}]   ;;  %s1233_s2 = inlined_call_operand.vmem [shape: f32[1,128], index: 2, kind: input, shape index: {}]   ;;  %s1234_s3 = inlined_call_operand.vmem [shape: bf16[256,128], index: 3, kind: output, shape index: {}]  }
   0x1 LB: > { %s764_s13 = sadd.s32 4294967295, %s1024_s12   ;;  %p768_p0 = scmp.ge.s32.totalorder %s1024_s12, 1  ;;  %s1024_s12 = sphi %s1046_s12, %s13_s12  }
   0x2   : > { %p139_p1 = scmp.lt.s32.totalorder %s1024_s12, 3 }
   0x4   : > { %p140_p2 = pnand %p768_p0, %p139_p1 }
   0x5   : > { %v976_v0 = vld [vmem:[%s1232_s1 + $0x40] sm:$0xff] (!%p140_p2)   ;;  %s769_s15 = sshll.u32 (!%p140_p2), %s764_s13, 4  ;;  %v978_v2 = vld [vmem:[%s1232_s1 + $0x48] sm:$0xff] (!%p140_p2)   ;;  %v980_v4 = vld [vmem:[%s1232_s1 + $0x50] sm:$0xff] (!%p140_p2)  }
   0x6   : > { %143 = sbr.rel (%p140_p2) target bundleno = 348 (0x15c), region = 32  ;;  %v977_v1 = vld [vmem:[%s1232_s1] sm:$0xff] (!%p140_p2)   ;;  %888 = vmatprep.subr.bf16.mxu0 (!%p140_p2), %v976_v0  ;;  %952 = vmatprep.subr.bf16.mxu1 (!%p140_p2), %v976_v0  ;;  %v979_v3 = vld [vmem:[%s1232_s1 + $0x8] sm:$0xff] (!%p140_p2)   ;;  %p165_p3 = scmp.lt.s32.totalorder (!%p140_p2), %s769_s15, 31  ;;  %v981_v5 = vld [vmem:[%s1232_s1 + $0x10] sm:$0xff] (!%p140_p2)  }
   0x7   : > { %889 = vmatpush3.bf16.msra.mxu0 (!%p140_p2), %v977_v1  ;;  %960 = vmatpush3.bf16.msra.mxu1 (!%p140_p2), %v977_v1  ;;  %v982_v6 = vld [vmem:[%s1232_s1 + $0x58] sm:$0xff] (!%p140_p2)   ;;  %v984_v8 = vld [vmem:[%s1232_s1 + $0x60] sm:$0xff] (!%p140_p2)   ;;  %v986_v10 = vld [vmem:[%s1232_s1 + $0x68] sm:$0xff] (!%p140_p2)  }
   0x8   : > { %890 = vmatprep.subr.bf16.mxu0 (!%p140_p2), %v978_v2  ;;  %953 = vmatprep.subr.bf16.mxu1 (!%p140_p2), %v978_v2  ;;  %v983_v7 = vld [vmem:[%s1232_s1 + $0x18] sm:$0xff] (!%p140_p2)   ;;  %v985_v9 = vld [vmem:[%s1232_s1 + $0x20] sm:$0xff] (!%p140_p2)   ;;  %v987_v12 = vld [vmem:[%s1232_s1 + $0x28] sm:$0xff] (!%p140_p2)  }
   0x9   : > { %v988_v14 = vld [vmem:[%s1232_s1 + $0x70] sm:$0xff] (!%p140_p2)   ;;  %v990_v16 = vld [vmem:[%s1232_s1 + $0x78] sm:$0xff] (!%p140_p2)  }
   0xa   : > { %v989_v15 = vld [vmem:[%s1232_s1 + $0x30] sm:$0xff] (!%p140_p2)   ;;  %v991_v17 = vld [vmem:[%s1232_s1 + $0x38] sm:$0xff] (!%p140_p2)  }
   0xb   : > { %891 = vmatpush3.bf16.msra.mxu0 (!%p140_p2), %v979_v3  ;;  %961 = vmatpush3.bf16.msra.mxu1 (!%p140_p2), %v979_v3 }
   0xc   : > { %892 = vmatprep.subr.bf16.mxu0 (!%p140_p2), %v980_v4  ;;  %954 = vmatprep.subr.bf16.mxu1 (!%p140_p2), %v980_v4 }
   0xd   : > { %s1236_s15 = smov (!%p165_p3, %s769_s15), 31 }
   0xe   : > { %s824_s30 = sshll.u32 %s1236_s15, 3  ;;  %s773_s24 = sshll.u32 %s1236_s15, 2 }
   0xf   : > { %893 = vmatpush3.bf16.msra.mxu0 %v981_v5  ;;  %962 = vmatpush3.bf16.msra.mxu1 %v981_v5  ;;  %s1087_s8 = scalar_lea.vmem %s1231_s0, %s824_s30  ;;  %s175_s27 = scalar_lea.vmem %s1234_s3, %s773_s24 }
  0x10   : > { %894 = vmatprep.subr.bf16.mxu0 %v982_v6  ;;  %955 = vmatprep.subr.bf16.mxu1 %v982_v6  ;;  %v994_v11 = vld [vmem:[%s1087_s8 + $0x4] ss:$8 sps:$4 sm:$0xff]   ;;  %v992_v18 = vld [vmem:[%s1087_s8] ss:$8 sps:$4 sm:$0xff]   ;;  %v995_v20 = vld [vmem:[%s1087_s8 + $0x14] ss:$8 sps:$4 sm:$0xff]  }
  0x11   : > { %v1000_v13 = vld [vmem:[%s1087_s8 + $0x44] ss:$8 sps:$4 sm:$0xff]   ;;  %434 = vmatprep.mubr.bf16.mxu0 %v994_v11  ;;  %v998_v19 = vld [vmem:[%s1087_s8 + $0x40] ss:$8 sps:$4 sm:$0xff]   ;;  %v1004_v21 = vld [vmem:[%s1087_s8 + $0x54] ss:$8 sps:$4 sm:$0xff]  }
  0x12   : > { %466 = vmatprep.mubr.bf16.mxu1 %v1000_v13  ;;  %v997_v22 = vld [vmem:[%s1087_s8 + $0x10] ss:$8 sps:$4 sm:$0xff]   ;;  %v1001_v24 = vld [vmem:[%s1087_s8 + $0x24] ss:$8 sps:$4 sm:$0xff]   ;;  %v1003_v26 = vld [vmem:[%s1087_s8 + $0x20] ss:$8 sps:$4 sm:$0xff]  }
  0x13   : > { %895 = vmatpush3.bf16.msra.mxu0 %v983_v7  ;;  %963 = vmatpush3.bf16.msra.mxu1 %v983_v7  ;;  %v1006_v23 = vld [vmem:[%s1087_s8 + $0x50] ss:$8 sps:$4 sm:$0xff]   ;;  %v1010_v25 = vld [vmem:[%s1087_s8 + $0x64] ss:$8 sps:$4 sm:$0xff]   ;;  %v1012_v27 = vld [vmem:[%s1087_s8 + $0x60] ss:$8 sps:$4 sm:$0xff]  }
  0x14   : > { %896 = vmatprep.subr.bf16.mxu0 %v984_v8  ;;  %956 = vmatprep.subr.bf16.mxu1 %v984_v8  ;;  %v1007_v28 = vld [vmem:[%s1087_s8 + $0x34] ss:$8 sps:$4 sm:$0xff]   ;;  %v1009_v30 = vld [vmem:[%s1087_s8 + $0x30] ss:$8 sps:$4 sm:$0xff]  }
  0x15   : > { %v1013_v29 = vld [vmem:[%s1087_s8 + $0x74] ss:$8 sps:$4 sm:$0xff]   ;;  %v1015_v31 = vld [vmem:[%s1087_s8 + $0x70] ss:$8 sps:$4 sm:$0xff]  }
  0x17   : > { %897 = vmatpush3.bf16.msra.mxu0 %v985_v9  ;;  %964 = vmatpush3.bf16.msra.mxu1 %v985_v9 }
  0x18   : > { %898 = vmatprep.subr.bf16.mxu0 %v986_v10  ;;  %957 = vmatprep.subr.bf16.mxu1 %v986_v10 }
  0x1b   : > { %899 = vmatpush3.bf16.msra.mxu0 %v987_v12  ;;  %965 = vmatpush3.bf16.msra.mxu1 %v987_v12 }
  0x1c   : > { %900 = vmatprep.subr.bf16.mxu0 %v988_v14  ;;  %958 = vmatprep.subr.bf16.mxu1 %v988_v14 }
  0x1f   : > { %901 = vmatpush3.bf16.msra.mxu0 %v989_v15  ;;  %966 = vmatpush3.bf16.msra.mxu1 %v989_v15 }
  0x20   : > { %902 = vmatprep.subr.bf16.mxu0 %v990_v16  ;;  %959 = vmatprep.subr.bf16.mxu1 %v990_v16 }
  0x23   : > { %903 = vmatpush3.bf16.msra.mxu0 %v991_v17  ;;  %967 = vmatpush3.bf16.msra.mxu1 %v991_v17 }
  0x26   : > { %435 = vmatmul.mubr.bf16.vlgmr.msra.gmra.mrb[0].mxu0 %v992_v18  ;;  %467 = vmatmul.mubr.bf16.vlgmr.msra.gmra.mrb[0].mxu1 %v998_v19 }
  0x27   : > { %442 = vmatprep.mubr.bf16.mxu0 %v995_v20  ;;  %474 = vmatprep.mubr.bf16.mxu1 %v1004_v21 }
  0x2e   : > { %443 = vmatmul.mubr.bf16.gmra.mrb[4].mxu0 %v997_v22  ;;  %475 = vmatmul.mubr.bf16.gmra.mrb[4].mxu1 %v1006_v23 }
  0x2f   : > { %450 = vmatprep.mubr.bf16.mxu0 %v1001_v24  ;;  %482 = vmatprep.mubr.bf16.mxu1 %v1010_v25 }
  0x36   : > { %451 = vmatmul.mubr.bf16.gmra.mrb[8].mxu0 %v1003_v26  ;;  %483 = vmatmul.mubr.bf16.gmra.mrb[8].mxu1 %v1012_v27 }
  0x37   : > { %458 = vmatprep.mubr.bf16.mxu0 %v1007_v28  ;;  %490 = vmatprep.mubr.bf16.mxu1 %v1013_v29 }
  0x3e   : > { %459 = vmatmul.mubr.bf16.gmra.mrb[12].mxu0 %v1009_v30  ;;  %491 = vmatmul.mubr.bf16.gmra.mrb[12].mxu1 %v1015_v31 }
  0xf9   : > { %v904_v32 = vpop.f32.mrb[0].mxu0  ;;  %v928_v33 = vpop.f32.mrb[0].mxu1 }
  0xfa   : > { %v905_v34 = vpop.f32.mrb[1].mxu0  ;;  %v929_v35 = vpop.f32.mrb[1].mxu1 }
  0xfb   : > { %v1126_v36 = vadd.f32 %v905_v34, %v904_v32  ;;  %v907_v37 = vpop.f32.mrb[2].mxu0  ;;  %v1128_v38 = vadd.f32 %v929_v35, %v928_v33  ;;  %v931_v39 = vpop.f32.mrb[2].mxu1 }
  0xfc   : > { %v908_v40 = vpop.f32.mrb[3].mxu0  ;;  %v932_v41 = vpop.f32.mrb[3].mxu1 }
  0xfd   : > { %v1130_v42 = vadd.f32 %v908_v40, %v907_v37  ;;  %v1132_v43 = vadd.f32 %v932_v41, %v931_v39  ;;  %v521_v44 = vmul.f32 %v1126_v36, %v1126_v36  ;;  %v529_v39 = vmul.f32 %v1128_v38, %v1128_v38 }
  0xff   : > { %v499_v45 = vadd.f32 %v1130_v42, %v1126_v36  ;;  %v522_v46 = vmul.f32 %v1130_v42, %v1130_v42 }
 0x101   : > { %v537_v47 = vadd.f32 %v522_v46, %v521_v44  ;;  %v910_v48 = vpop.f32.mrb[4].mxu0  ;;  %v934_v49 = vpop.f32.mrb[4].mxu1  ;;  %v530_v44 = vmul.f32 %v1132_v43, %v1132_v43 }
 0x102   : > { %v911_v50 = vpop.f32.mrb[5].mxu0  ;;  %v935_v51 = vpop.f32.mrb[5].mxu1 }
 0x103   : > { %v1140_v52 = vadd.f32 %v911_v50, %v910_v48  ;;  %v913_v53 = vpop.f32.mrb[6].mxu0  ;;  %v1142_v54 = vadd.f32 %v935_v51, %v934_v49  ;;  %v937_v55 = vpop.f32.mrb[6].mxu1 }
 0x104   : > { %v914_v56 = vpop.f32.mrb[7].mxu0  ;;  %v938_v57 = vpop.f32.mrb[7].mxu1 }
 0x105   : > { %v500_v58 = vadd.f32 %v1140_v52, %v499_v45  ;;  %v523_v59 = vmul.f32 %v1140_v52, %v1140_v52  ;;  %v1147_v60 = vadd.f32 %v914_v56, %v913_v53  ;;  %v1149_v61 = vadd.f32 %v938_v57, %v937_v55 }
 0x107   : > { %v538_v62 = vadd.f32 %v537_v47, %v523_v59  ;;  %v501_v63 = vadd.f32 %v1147_v60, %v500_v58  ;;  %v524_v0 = vmul.f32 %v1147_v60, %v1147_v60  ;;  %v531_v47 = vmul.f32 %v1142_v54, %v1142_v54 }
 0x108   : > { %v532_v50 = vmul.f32 %v1149_v61, %v1149_v61 }
 0x109   : > { %v539_v1 = vadd.f32 %v538_v62, %v524_v0  ;;  %v916_v2 = vpop.f32.mrb[8].mxu0  ;;  %v940_v3 = vpop.f32.mrb[8].mxu1 }
 0x10a   : > { %v917_v4 = vpop.f32.mrb[9].mxu0  ;;  %v941_v5 = vpop.f32.mrb[9].mxu1 }
 0x10b   : > { %v1154_v6 = vadd.f32 %v917_v4, %v916_v2  ;;  %v919_v7 = vpop.f32.mrb[10].mxu0  ;;  %v1156_v8 = vadd.f32 %v941_v5, %v940_v3  ;;  %v943_v9 = vpop.f32.mrb[10].mxu1 }
 0x10c   : > { %v920_v10 = vpop.f32.mrb[11].mxu0  ;;  %v944_v11 = vpop.f32.mrb[11].mxu1 }
 0x10d   : > { %v502_v12 = vadd.f32 %v1154_v6, %v501_v63  ;;  %v525_v13 = vmul.f32 %v1154_v6, %v1154_v6  ;;  %v1161_v14 = vadd.f32 %v920_v10, %v919_v7  ;;  %v1163_v15 = vadd.f32 %v944_v11, %v943_v9 }
 0x10e   : > { %v533_v56 = vmul.f32 %v1156_v8, %v1156_v8 }
 0x10f   : > { %v540_v16 = vadd.f32 %v539_v1, %v525_v13  ;;  %v503_v17 = vadd.f32 %v1161_v14, %v502_v12  ;;  %v526_v18 = vmul.f32 %v1161_v14, %v1161_v14  ;;  %v534_v62 = vmul.f32 %v1163_v15, %v1163_v15 }
 0x111   : > { %v541_v19 = vadd.f32 %v540_v16, %v526_v18  ;;  %v922_v20 = vpop.f32.mrb[12].mxu0  ;;  %v946_v21 = vpop.f32.mrb[12].mxu1 }
 0x112   : > { %v923_v22 = vpop.f32.mrb[13].mxu0  ;;  %v947_v23 = vpop.f32.mrb[13].mxu1 }
 0x113   : > { %v1168_v24 = vadd.f32 %v923_v22, %v922_v20  ;;  %v925_v25 = vpop.f32.mrb[14].mxu0  ;;  %v1170_v26 = vadd.f32 %v947_v23, %v946_v21  ;;  %v949_v27 = vpop.f32.mrb[14].mxu1 }
 0x114   : > { %v926_v28 = vpop.f32.mrb[15].mxu0  ;;  %v950_v29 = vpop.f32.mrb[15].mxu1 }
 0x115   : > { %v504_v30 = vadd.f32 %v1168_v24, %v503_v17  ;;  %v527_v31 = vmul.f32 %v1168_v24, %v1168_v24  ;;  %v1175_v32 = vadd.f32 %v926_v28, %v925_v25  ;;  %v1177_v33 = vadd.f32 %v950_v29, %v949_v27 }
 0x116   : > { %v535_v63 = vmul.f32 %v1170_v26, %v1170_v26 }
 0x117   : > { %v542_v34 = vadd.f32 %v541_v19, %v527_v31  ;;  %v505_v35 = vadd.f32 %v1175_v32, %v504_v30  ;;  %v528_v37 = vmul.f32 %v1175_v32, %v1175_v32  ;;  %v536_v4 = vmul.f32 %v1177_v33, %v1177_v33 }
 0x119   : > { %v506_v40 = vadd.f32 %v1128_v38, %v505_v35  ;;  %v543_v41 = vadd.f32 %v542_v34, %v528_v37 }
 0x11b   : > { %v507_v45 = vadd.f32 %v1132_v43, %v506_v40  ;;  %v544_v46 = vadd.f32 %v543_v41, %v529_v39 }
 0x11d   : > { %v545_v48 = vadd.f32 %v544_v46, %v530_v44  ;;  %v508_v49 = vadd.f32 %v1142_v54, %v507_v45 }
 0x11f   : > { %v509_v51 = vadd.f32 %v1149_v61, %v508_v49  ;;  %v546_v53 = vadd.f32 %v545_v48, %v531_v47 }
 0x121   : > { %v510_v55 = vadd.f32 %v1156_v8, %v509_v51  ;;  %v547_v57 = vadd.f32 %v546_v53, %v532_v50 }
 0x123   : > { %v548_v58 = vadd.f32 %v547_v57, %v533_v56  ;;  %v511_v59 = vadd.f32 %v1163_v15, %v510_v55 }
 0x125   : > { %v549_v0 = vadd.f32 %v548_v58, %v534_v62  ;;  %v512_v1 = vadd.f32 %v1170_v26, %v511_v59 }
 0x127   : > { %v550_v2 = vadd.f32 %v549_v0, %v535_v63  ;;  %v513_v3 = vadd.f32 %v1177_v33, %v512_v1 }
 0x129   : > { %v514_v5 = vrot.slane %v513_v3, 4  ;;  %v551_v7 = vadd.f32 %v550_v2, %v536_v4 }
 0x12b   : > { %v515_v9 = vadd.f32 %v514_v5, %v513_v3  ;;  %v552_v10 = vrot.slane %v551_v7, 4 }
 0x12d   : > { %v516_v11 = vrot.slane %v515_v9, 2  ;;  %v553_v12 = vadd.f32 %v552_v10, %v551_v7 }
 0x12f   : > { %v517_v13 = vadd.f32 %v516_v11, %v515_v9  ;;  %v554_v16 = vrot.slane %v553_v12, 2 }
 0x131   : > { %v518_v17 = vrot.slane %v517_v13, 1  ;;  %v555_v18 = vadd.f32 %v554_v16, %v553_v12 }
 0x133   : > { %v519_v19 = vadd.f32 %v518_v17, %v517_v13  ;;  %v556_v20 = vrot.slane %v555_v18, 1 }
 0x135   : > { %v520_v21 = vmul.f32 0.0078125, %v519_v19  ;;  %v557_v22 = vadd.f32 %v556_v20, %v555_v18 }
 0x137   : > { %v558_v23 = vmul.f32 0.0078125, %v557_v22  ;;  %v559_v25 = vmul.f32 %v520_v21, %v520_v21  ;;  %v562_v27 = vsub.f32 %v1126_v36, %v520_v21  ;;  %v563_v28 = vsub.f32 %v1130_v42, %v520_v21 }
 0x138   : > { %v564_v29 = vsub.f32 %v1140_v52, %v520_v21  ;;  %v565_v30 = vsub.f32 %v1147_v60, %v520_v21  ;;  %v566_v31 = vsub.f32 %v1154_v6, %v520_v21  ;;  %v567_v34 = vsub.f32 %v1161_v14, %v520_v21 }
 0x139   : > { %v560_v35 = vsub.f32 %v558_v23, %v559_v25  ;;  %v568_v37 = vsub.f32 %v1168_v24, %v520_v21  ;;  %v569_v39 = vsub.f32 %v1175_v32, %v520_v21  ;;  %v570_v40 = vsub.f32 %v1128_v38, %v520_v21 }
 0x13a   : > { %v571_v41 = vsub.f32 %v1132_v43, %v520_v21  ;;  %v572_v36 = vsub.f32 %v1142_v54, %v520_v21  ;;  %v573_v42 = vsub.f32 %v1149_v61, %v520_v21  ;;  %v574_v52 = vsub.f32 %v1156_v8, %v520_v21 }
 0x13b   : > { %v561_v60 = vmax.f32 %v560_v35, 0.0  ;;  %v575_v6 = vsub.f32 %v1163_v15, %v520_v21  ;;  %v576_v14 = vsub.f32 %v1170_v26, %v520_v21  ;;  %v577_v44 = vsub.f32 %v1177_v33, %v520_v21 }
 0x13d   : > { %v578_v24 = vadd.f32 1e-05, %v561_v60 }
 0x13f   : > { %1016 = vrsqrt.f32 %v578_v24 }
 0x149   : > { %v1017_v32 = vpop.eup %1016 }
 0x14a   : > { %v580_v38 = vmul.f32 %v1017_v32, %v562_v27  ;;  %v581_v45 = vmul.f32 %v1017_v32, %v563_v28  ;;  %v582_v43 = vmul.f32 %v1017_v32, %v564_v29  ;;  %v583_v46 = vmul.f32 %v1017_v32, %v565_v30 }
 0x14b   : > { %v584_v54 = vmul.f32 %v1017_v32, %v566_v31  ;;  %v585_v47 = vmul.f32 %v1017_v32, %v567_v34  ;;  %v586_v61 = vmul.f32 %v1017_v32, %v568_v37  ;;  %v587_v48 = vmul.f32 %v1017_v32, %v569_v39 }
 0x14c   : > { %v588_v8 = vmul.f32 %v1017_v32, %v570_v40  ;;  %v589_v49 = vmul.f32 %v1017_v32, %v571_v41  ;;  %v590_v50 = vmul.f32 %v1017_v32, %v572_v36  ;;  %v591_v15 = vmul.f32 %v1017_v32, %v573_v42 }
 0x14d   : > { %v592_v26 = vmul.f32 %v1017_v32, %v574_v52  ;;  %v593_v51 = vmul.f32 %v1017_v32, %v575_v6  ;;  %v594_v33 = vmul.f32 %v1017_v32, %v576_v14  ;;  %v595_v53 = vmul.f32 %v1017_v32, %v577_v44 }
 0x14e   : > { %v596_v55 = vmul.f32 0.2, %v580_v38  ;;  %v597_v56 = vmul.f32 0.2, %v581_v45  ;;  %v598_v57 = vmul.f32 0.2, %v582_v43 }
 0x14f   : > { %v599_v58 = vmul.f32 0.2, %v583_v46  ;;  %v600_v59 = vmul.f32 0.2, %v584_v54  ;;  %v601_v62 = vmul.f32 0.2, %v585_v47 }
 0x150   : > { %v602_v63 = vmul.f32 0.2, %v586_v61  ;;  %v603_v0 = vmul.f32 0.2, %v587_v48  ;;  %v604_v1 = vmul.f32 0.2, %v588_v8  ;;  %v612_v2 = vmax.f32 %v580_v38, %v596_v55 }
 0x151   : > { %v605_v3 = vmul.f32 0.2, %v589_v49  ;;  %v606_v4 = vmul.f32 0.2, %v590_v50  ;;  %v607_v5 = vmul.f32 0.2, %v591_v15  ;;  %v613_v7 = vmax.f32 %v581_v45, %v597_v56 }
 0x152   : > { %v608_v9 = vmul.f32 0.2, %v592_v26  ;;  %v609_v10 = vmul.f32 0.2, %v593_v51  ;;  %v610_v11 = vmul.f32 0.2, %v594_v33  ;;  %v614_v12 = vmax.f32 %v582_v43, %v598_v57 }
 0x153   : > { %v611_v13 = vmul.f32 0.2, %v595_v53  ;;  %v615_v16 = vmax.f32 %v583_v46, %v599_v58  ;;  %v616_v17 = vmax.f32 %v584_v54, %v600_v59  ;;  %v617_v18 = vmax.f32 %v585_v47, %v601_v62 }
 0x154   : > { %v618_v19 = vmax.f32 %v586_v61, %v602_v63  ;;  %v619_v20 = vmax.f32 %v587_v48, %v603_v0  ;;  %v620_v21 = vmax.f32 %v588_v8, %v604_v1  ;;  %v621_v22 = vmax.f32 %v589_v49, %v605_v3 }
 0x155   : > { %v622_v23 = vmax.f32 %v590_v50, %v606_v4  ;;  %v623_v25 = vmax.f32 %v591_v15, %v607_v5  ;;  %v624_v27 = vmax.f32 %v592_v26, %v608_v9  ;;  %v625_v28 = vmax.f32 %v593_v51, %v609_v10 }
 0x156   : > { %v626_v29 = vmax.f32 %v594_v33, %v610_v11  ;;  %v627_v30 = vmax.f32 %v595_v53, %v611_v13  ;;  %v844_v31 = vpack.c.bf16 %v613_v7, %v612_v2  ;;  %v849_v34 = vpack.c.bf16 %v615_v16, %v614_v12 }
 0x157   : > { %v854_v35 = vpack.c.bf16 %v617_v18, %v616_v17  ;;  %v859_v37 = vpack.c.bf16 %v619_v20, %v618_v19  ;;  %v864_v39 = vpack.c.bf16 %v621_v22, %v620_v21  ;;  %v869_v40 = vpack.c.bf16 %v623_v25, %v622_v23 }
 0x158   : > { %845 = vst [vmem:[%s175_s27] sm:$0xff] %v844_v31   ;;  %881 = vst [vmem:[%s175_s27 + $0x8] sm:$0xff] %v849_v34   ;;  %v874_v41 = vpack.c.bf16 %v625_v28, %v624_v27  ;;  %v879_v36 = vpack.c.bf16 %v627_v30, %v626_v29 }
 0x159   : > { %882 = vst [vmem:[%s175_s27 + $0x10] sm:$0xff] %v854_v35   ;;  %883 = vst [vmem:[%s175_s27 + $0x18] sm:$0xff] %v859_v37  }
 0x15a   : > { %884 = vst [vmem:[%s175_s27 + $0x20] sm:$0xff] %v864_v39   ;;  %885 = vst [vmem:[%s175_s27 + $0x28] sm:$0xff] %v869_v40  }
 0x15b   : > { %886 = vst [vmem:[%s175_s27 + $0x30] sm:$0xff] %v874_v41   ;;  %887 = vst [vmem:[%s175_s27 + $0x38] sm:$0xff] %v879_v36  }
 0x15c PF: > { %s13_s12 = sadd.s32 1, %s1024_s12  }
 0x15d   : > { %p10_p4 = scmp.ge.s32.totalorder %s13_s12, 4  }
 0x15f   :  { %12 = sbr.rel (!%p10_p4) target bundleno = 1 (0x1), region = 62 }

// kernel: _lambda_.10
= control target key start
LH: loop header
LB: loop body
LE: loop exit
PB: predicated region body
PF: predicated region fallthrough
CT: control target
= control target key end

     0   :  { %s911_s12 = smov 0   ;;  %s1030_s0 = inlined_call_operand.vmem [shape: bf16[64,512], index: 0, kind: input, shape index: {}]   ;;  %s1031_s1 = inlined_call_operand.vmem [shape: bf16[512,128], index: 1, kind: input, shape index: {}]   ;;  %s1032_s2 = inlined_call_operand.vmem [shape: f32[1,128], index: 2, kind: input, shape index: {}]   ;;  %s1033_s3 = inlined_call_operand.vmem [shape: bf16[64,128], index: 3, kind: output, shape index: {}]  }
   0x1 LB: > { %s701_s13 = sadd.s32 4294967295, %s889_s12   ;;  %p705_p0 = scmp.ge.s32.totalorder %s889_s12, 1  ;;  %s889_s12 = sphi %s911_s12, %s13_s12  }
   0x2   : > { %p139_p1 = scmp.lt.s32.totalorder %s889_s12, 3 }
   0x4   : > { %p140_p2 = pnand %p705_p0, %p139_p1 }
   0x5   : > { %v837_v0 = vld [vmem:[%s1031_s1 + $0x40] sm:$0xff] (!%p140_p2)   ;;  %v841_v4 = vld [vmem:[%s1031_s1 + $0x48] sm:$0xff] (!%p140_p2)   ;;  %v845_v8 = vld [vmem:[%s1031_s1 + $0x50] sm:$0xff] (!%p140_p2)   ;;  %s706_s19 = sshll.u32 (!%p140_p2), %s701_s13, 2 }
   0x6   : > { %143 = sbr.rel (%p140_p2) target bundleno = 312 (0x138), region = 32  ;;  %v838_v1 = vld [vmem:[%s1031_s1 + $0xc0] sm:$0xff] (!%p140_p2)   ;;  %773 = vmatprep.subr.bf16.mxu0 (!%p140_p2), %v837_v0  ;;  %v842_v5 = vld [vmem:[%s1031_s1 + $0xc8] sm:$0xff] (!%p140_p2)   ;;  %v846_v9 = vld [vmem:[%s1031_s1 + $0xd0] sm:$0xff] (!%p140_p2)   ;;  %p165_p3 = scmp.lt.s32.totalorder (!%p140_p2), %s706_s19, 7 }
   0x7   : > { %v839_v2 = vld [vmem:[%s1031_s1] sm:$0xff] (!%p140_p2)   ;;  %801 = vmatprep.subr.bf16.mxu1 (!%p140_p2), %v838_v1  ;;  %v843_v6 = vld [vmem:[%s1031_s1 + $0x8] sm:$0xff] (!%p140_p2)   ;;  %v847_v10 = vld [vmem:[%s1031_s1 + $0x10] sm:$0xff] (!%p140_p2)  }
   0x8   : > { %v840_v3 = vld [vmem:[%s1031_s1 + $0x80] sm:$0xff] (!%p140_p2)   ;;  %774 = vmatpush3.bf16.msra.mxu0 (!%p140_p2), %v839_v2  ;;  %v844_v7 = vld [vmem:[%s1031_s1 + $0x88] sm:$0xff] (!%p140_p2)   ;;  %v848_v11 = vld [vmem:[%s1031_s1 + $0x90] sm:$0xff] (!%p140_p2)  }
   0x9   : > { %802 = vmatpush3.bf16.msra.mxu1 (!%p140_p2), %v840_v3  ;;  %775 = vmatprep.subr.bf16.mxu0 (!%p140_p2), %v841_v4  ;;  %v849_v12 = vld [vmem:[%s1031_s1 + $0x58] sm:$0xff] (!%p140_p2)   ;;  %v853_v16 = vld [vmem:[%s1031_s1 + $0x60] sm:$0xff] (!%p140_p2)   ;;  %v857_v20 = vld [vmem:[%s1031_s1 + $0x68] sm:$0xff] (!%p140_p2)  }
   0xa   : > { %803 = vmatprep.subr.bf16.mxu1 (!%p140_p2), %v842_v5  ;;  %v850_v13 = vld [vmem:[%s1031_s1 + $0xd8] sm:$0xff] (!%p140_p2)   ;;  %v854_v17 = vld [vmem:[%s1031_s1 + $0xe0] sm:$0xff] (!%p140_p2)   ;;  %v858_v21 = vld [vmem:[%s1031_s1 + $0xe8] sm:$0xff] (!%p140_p2)  }
   0xb   : > { %v851_v14 = vld [vmem:[%s1031_s1 + $0x18] sm:$0xff] (!%p140_p2)   ;;  %v855_v18 = vld [vmem:[%s1031_s1 + $0x20] sm:$0xff] (!%p140_p2)   ;;  %v859_v22 = vld [vmem:[%s1031_s1 + $0x28] sm:$0xff] (!%p140_p2)  }
   0xc   : > { %776 = vmatpush3.bf16.msra.mxu0 (!%p140_p2), %v843_v6  ;;  %v852_v15 = vld [vmem:[%s1031_s1 + $0x98] sm:$0xff] (!%p140_p2)   ;;  %v856_v19 = vld [vmem:[%s1031_s1 + $0xa0] sm:$0xff] (!%p140_p2)   ;;  %v860_v23 = vld [vmem:[%s1031_s1 + $0xa8] sm:$0xff] (!%p140_p2)  }
   0xd   : > { %804 = vmatpush3.bf16.msra.mxu1 %v844_v7  ;;  %777 = vmatprep.subr.bf16.mxu0 %v845_v8  ;;  %s1035_s19 = smov (!%p165_p3, %s706_s19), 7  ;;  %v861_v24 = vld [vmem:[%s1031_s1 + $0x70] sm:$0xff]   ;;  %v865_v28 = vld [vmem:[%s1031_s1 + $0x78] sm:$0xff]  }
   0xe   : > { %805 = vmatprep.subr.bf16.mxu1 %v846_v9  ;;  %v862_v25 = vld [vmem:[%s1031_s1 + $0xf0] sm:$0xff]   ;;  %s757_s15 = sshll.u32 %s1035_s19, 4  ;;  %v866_v29 = vld [vmem:[%s1031_s1 + $0xf8] sm:$0xff]   ;;  %s710_s29 = sshll.u32 %s1035_s19, 2 }
   0xf   : > { %v863_v26 = vld [vmem:[%s1031_s1 + $0x30] sm:$0xff]   ;;  %s169_s25 = scalar_lea.vmem %s1030_s0, %s757_s15  ;;  %v867_v30 = vld [vmem:[%s1031_s1 + $0x38] sm:$0xff]   ;;  %s175_s5 = scalar_lea.vmem %s1033_s3, %s710_s29 }
  0x10   : > { %778 = vmatpush3.bf16.msra.mxu0 %v847_v10  ;;  %v864_v27 = vld [vmem:[%s1031_s1 + $0xb0] sm:$0xff]   ;;  %v868_v31 = vld [vmem:[%s1031_s1 + $0xb8] sm:$0xff]  }
  0x11   : > { %806 = vmatpush3.bf16.msra.mxu1 %v848_v11  ;;  %779 = vmatprep.subr.bf16.mxu0 %v849_v12  ;;  %v869_v32 = vld [vmem:[%s169_s25] ss:$16 sps:$4 sm:$0xff]   ;;  %v871_v33 = vld [vmem:[%s169_s25 + $0x4] ss:$16 sps:$4 sm:$0xff]   ;;  %v872_v34 = vld [vmem:[%s169_s25 + $0x8] ss:$16 sps:$4 sm:$0xff]  }
  0x12   : > { %807 = vmatprep.subr.bf16.mxu1 %v850_v13  ;;  %v874_v35 = vld [vmem:[%s169_s25 + $0xc] ss:$16 sps:$4 sm:$0xff]   ;;  %514 = vmatprep.mubr.bf16.mxu0 %v871_v33  ;;  %v875_v36 = vld [vmem:[%s169_s25 + $0x24] ss:$16 sps:$4 sm:$0xff]   ;;  %v879_v38 = vld [vmem:[%s169_s25 + $0x20] ss:$16 sps:$4 sm:$0xff]  }
  0x13   : > { %563 = vmatprep.mubr.bf16.mxu1 %v874_v35  ;;  %v877_v37 = vld [vmem:[%s169_s25 + $0x2c] ss:$16 sps:$4 sm:$0xff]   ;;  %v880_v39 = vld [vmem:[%s169_s25 + $0x28] ss:$16 sps:$4 sm:$0xff]  }
  0x14   : > { %780 = vmatpush3.bf16.msra.mxu0 %v851_v14 }
  0x15   : > { %808 = vmatpush3.bf16.msra.mxu1 %v852_v15  ;;  %781 = vmatprep.subr.bf16.mxu0 %v853_v16 }
  0x16   : > { %809 = vmatprep.subr.bf16.mxu1 %v854_v17 }
  0x18   : > { %782 = vmatpush3.bf16.msra.mxu0 %v855_v18 }
  0x19   : > { %810 = vmatpush3.bf16.msra.mxu1 %v856_v19  ;;  %783 = vmatprep.subr.bf16.mxu0 %v857_v20 }
  0x1a   : > { %811 = vmatprep.subr.bf16.mxu1 %v858_v21 }
  0x1c   : > { %784 = vmatpush3.bf16.msra.mxu0 %v859_v22 }
  0x1d   : > { %812 = vmatpush3.bf16.msra.mxu1 %v860_v23  ;;  %785 = vmatprep.subr.bf16.mxu0 %v861_v24 }
  0x1e   : > { %813 = vmatprep.subr.bf16.mxu1 %v862_v25 }
  0x20   : > { %786 = vmatpush3.bf16.msra.mxu0 %v863_v26 }
  0x21   : > { %814 = vmatpush3.bf16.msra.mxu1 %v864_v27  ;;  %787 = vmatprep.subr.bf16.mxu0 %v865_v28 }
  0x22   : > { %815 = vmatprep.subr.bf16.mxu1 %v866_v29 }
  0x24   : > { %788 = vmatpush3.bf16.msra.mxu0 %v867_v30 }
  0x25   : > { %816 = vmatpush3.bf16.msra.mxu1 %v868_v31 }
  0x27   : > { %515 = vmatmul.mubr.bf16.vlgmr.msra.gmra.mrb[0].mxu0 %v869_v32 }
  0x28   : > { %564 = vmatmul.mubr.bf16.vlgmr.msra.gmra.mrb[0].mxu1 %v872_v34  ;;  %522 = vmatprep.mubr.bf16.mxu0 %v875_v36 }
  0x29   : > { %571 = vmatprep.mubr.bf16.mxu1 %v877_v37 }
  0x2f   : > { %523 = vmatmul.mubr.bf16.gmra.mrb[4].mxu0 %v879_v38 }
  0x30   : > { %572 = vmatmul.mubr.bf16.gmra.mrb[4].mxu1 %v880_v39 }
  0xfa   : > { %v789_v40 = vpop.f32.mrb[0].mxu0 }
  0xfb   : > { %v817_v41 = vpop.f32.mrb[0].mxu1  ;;  %v790_v42 = vpop.f32.mrb[1].mxu0 }
  0xfc   : > { %v791_v43 = vadd.f32 %v790_v42, %v789_v40  ;;  %v818_v44 = vpop.f32.mrb[1].mxu1  ;;  %v792_v45 = vpop.f32.mrb[2].mxu0 }
  0xfd   : > { %v819_v46 = vadd.f32 %v818_v44, %v817_v41  ;;  %v820_v47 = vpop.f32.mrb[2].mxu1  ;;  %v793_v48 = vpop.f32.mrb[3].mxu0 }
  0xfe   : > { %v794_v49 = vadd.f32 %v793_v48, %v792_v45  ;;  %v821_v50 = vpop.f32.mrb[3].mxu1 }
  0xff   : > { %v566_v51 = vadd.f32 %v819_v46, %v791_v43  ;;  %v822_v52 = vadd.f32 %v821_v50, %v820_v47 }
 0x101   : > { %v569_v53 = vadd.f32 %v822_v52, %v794_v49  ;;  %v590_v55 = vmul.f32 %v566_v51, %v566_v51 }
 0x102   : > { %v795_v54 = vpop.f32.mrb[4].mxu0 }
 0x103   : > { %v580_v56 = vadd.f32 %v569_v53, %v566_v51  ;;  %v591_v57 = vmul.f32 %v569_v53, %v569_v53  ;;  %v823_v58 = vpop.f32.mrb[4].mxu1  ;;  %v796_v59 = vpop.f32.mrb[5].mxu0 }
 0x104   : > { %v797_v60 = vadd.f32 %v796_v59, %v795_v54  ;;  %v824_v61 = vpop.f32.mrb[5].mxu1  ;;  %v798_v62 = vpop.f32.mrb[6].mxu0 }
 0x105   : > { %v594_v63 = vadd.f32 %v591_v57, %v590_v55  ;;  %v825_v0 = vadd.f32 %v824_v61, %v823_v58  ;;  %v826_v1 = vpop.f32.mrb[6].mxu1  ;;  %v799_v2 = vpop.f32.mrb[7].mxu0 }
 0x106   : > { %v800_v3 = vadd.f32 %v799_v2, %v798_v62  ;;  %v827_v4 = vpop.f32.mrb[7].mxu1 }
 0x107   : > { %v574_v5 = vadd.f32 %v825_v0, %v797_v60  ;;  %v828_v6 = vadd.f32 %v827_v4, %v826_v1 }
 0x109   : > { %v581_v7 = vadd.f32 %v580_v56, %v574_v5  ;;  %v592_v8 = vmul.f32 %v574_v5, %v574_v5  ;;  %v577_v9 = vadd.f32 %v828_v6, %v800_v3 }
 0x10b   : > { %v595_v10 = vadd.f32 %v594_v63, %v592_v8  ;;  %v582_v11 = vadd.f32 %v581_v7, %v577_v9  ;;  %v593_v12 = vmul.f32 %v577_v9, %v577_v9 }
 0x10d   : > { %v583_v13 = vrot.slane %v582_v11, 4  ;;  %v596_v14 = vadd.f32 %v595_v10, %v593_v12 }
 0x10f   : > { %v584_v15 = vadd.f32 %v583_v13, %v582_v11  ;;  %v597_v16 = vrot.slane %v596_v14, 4 }
 0x111   : > { %v585_v17 = vrot.slane %v584_v15, 2  ;;  %v598_v18 = vadd.f32 %v597_v16, %v596_v14 }
 0x113   : > { %v586_v19 = vadd.f32 %v585_v17, %v584_v15  ;;  %v599_v20 = vrot.slane %v598_v18, 2 }
 0x115   : > { %v587_v21 = vrot.slane %v586_v19, 1  ;;  %v600_v22 = vadd.f32 %v599_v20, %v598_v18 }
 0x117   : > { %v588_v23 = vadd.f32 %v587_v21, %v586_v19  ;;  %v601_v24 = vrot.slane %v600_v22, 1 }
 0x119   : > { %v589_v25 = vmul.f32 0.03125, %v588_v23  ;;  %v602_v26 = vadd.f32 %v601_v24, %v600_v22 }
 0x11b   : > { %v603_v27 = vmul.f32 0.03125, %v602_v26  ;;  %v604_v28 = vmul.f32 %v589_v25, %v589_v25  ;;  %v607_v29 = vsub.f32 %v566_v51, %v589_v25  ;;  %v608_v30 = vsub.f32 %v569_v53, %v589_v25 }
 0x11c   : > { %v609_v31 = vsub.f32 %v574_v5, %v589_v25  ;;  %v610_v32 = vsub.f32 %v577_v9, %v589_v25 }
 0x11d   : > { %v605_v33 = vsub.f32 %v603_v27, %v604_v28 }
 0x11f   : > { %v606_v34 = vmax.f32 %v605_v33, 0.0 }
 0x121   : > { %v611_v35 = vadd.f32 1e-05, %v606_v34 }
 0x123   : > { %881 = vrsqrt.f32 %v611_v35 }
 0x12d   : > { %v882_v36 = vpop.eup %881 }
 0x12e   : > { %v613_v37 = vmul.f32 %v882_v36, %v607_v29  ;;  %v614_v38 = vmul.f32 %v882_v36, %v608_v30  ;;  %v615_v39 = vmul.f32 %v882_v36, %v609_v31  ;;  %v616_v40 = vmul.f32 %v882_v36, %v610_v32 }
 0x130   : > { %v617_v41 = vmul.f32 0.2, %v613_v37  ;;  %v618_v42 = vmul.f32 0.2, %v614_v38  ;;  %v619_v43 = vmul.f32 0.2, %v615_v39 }
 0x131   : > { %v620_v44 = vmul.f32 0.2, %v616_v40 }
 0x132   : > { %v621_v45 = vmax.f32 %v613_v37, %v617_v41  ;;  %v622_v46 = vmax.f32 %v614_v38, %v618_v42  ;;  %v623_v47 = vmax.f32 %v615_v39, %v619_v43 }
 0x133   : > { %v624_v48 = vmax.f32 %v616_v40, %v620_v44 }
 0x134   : > { %v765_v49 = vpack.c.bf16 %v622_v46, %v621_v45 }
 0x135   : > { %v770_v50 = vpack.c.bf16 %v624_v48, %v623_v47 }
 0x136   : > { %766 = vst [vmem:[%s175_s5] sm:$0xff] %v765_v49  }
 0x137   : > { %772 = vst [vmem:[%s175_s5 + $0x8] sm:$0xff] %v770_v50  }
 0x138 PF: > { %s13_s12 = sadd.s32 1, %s889_s12  }
 0x139   : > { %p10_p4 = scmp.ge.s32.totalorder %s13_s12, 4  }
 0x13b   :  { %12 = sbr.rel (!%p10_p4) target bundleno = 1 (0x1), region = 62 }

// kernel: _lambda_.11
= control target key start
LH: loop header
LB: loop body
LE: loop exit
PB: predicated region body
PF: predicated region fallthrough
CT: control target
= control target key end

     0   :  { %s1429_s12 = smov 0   ;;  %s1662_s0 = inlined_call_operand.vmem [shape: bf16[64,1024], index: 0, kind: input, shape index: {}]   ;;  %s1663_s1 = inlined_call_operand.vmem [shape: bf16[1024,128], index: 1, kind: input, shape index: {}]   ;;  %s1664_s2 = inlined_call_operand.vmem [shape: f32[1,128], index: 2, kind: input, shape index: {}]   ;;  %s1665_s3 = inlined_call_operand.vmem [shape: bf16[64,128], index: 3, kind: output, shape index: {}]  }
   0x1 LB: > { %s1103_s13 = sadd.s32 4294967295, %s1407_s12   ;;  %p1107_p0 = scmp.ge.s32.totalorder %s1407_s12, 1  ;;  %s1407_s12 = sphi %s1429_s12, %s13_s12  }
   0x2   : > { %p139_p1 = scmp.lt.s32.totalorder %s1407_s12, 3 }
   0x4   : > { %p140_p2 = pnand %p1107_p0, %p139_p1 }
   0x5   : > { %v1335_v0 = vld [vmem:[%s1663_s1 + $0x40] sm:$0xff] (!%p140_p2)   ;;  %v1339_v4 = vld [vmem:[%s1663_s1 + $0x48] sm:$0xff] (!%p140_p2)   ;;  %v1343_v8 = vld [vmem:[%s1663_s1 + $0x50] sm:$0xff] (!%p140_p2)   ;;  %s1108_s19 = sshll.u32 (!%p140_p2), %s1103_s13, 2 }
   0x6   : > { %143 = sbr.rel (%p140_p2) target bundleno = 345 (0x159), region = 32  ;;  %v1336_v1 = vld [vmem:[%s1663_s1 + $0xc0] sm:$0xff] (!%p140_p2)   ;;  %1215 = vmatprep.subr.bf16.mxu0 (!%p140_p2), %v1335_v0  ;;  %v1340_v5 = vld [vmem:[%s1663_s1 + $0xc8] sm:$0xff] (!%p140_p2)   ;;  %v1344_v9 = vld [vmem:[%s1663_s1 + $0xd0] sm:$0xff] (!%p140_p2)   ;;  %p165_p3 = scmp.lt.s32.totalorder (!%p140_p2), %s1108_s19, 7 }
   0x7   : > { %v1337_v2 = vld [vmem:[%s1663_s1] sm:$0xff] (!%p140_p2)   ;;  %1243 = vmatprep.subr.bf16.mxu1 (!%p140_p2), %v1336_v1  ;;  %v1341_v6 = vld [vmem:[%s1663_s1 + $0x8] sm:$0xff] (!%p140_p2)   ;;  %v1345_v10 = vld [vmem:[%s1663_s1 + $0x10] sm:$0xff] (!%p140_p2)  }
   0x8   : > { %v1338_v3 = vld [vmem:[%s1663_s1 + $0x80] sm:$0xff] (!%p140_p2)   ;;  %1216 = vmatpush3.bf16.msra.mxu0 (!%p140_p2), %v1337_v2  ;;  %v1342_v7 = vld [vmem:[%s1663_s1 + $0x88] sm:$0xff] (!%p140_p2)   ;;  %v1346_v11 = vld [vmem:[%s1663_s1 + $0x90] sm:$0xff] (!%p140_p2)  }
   0x9   : > { %1244 = vmatpush3.bf16.msra.mxu1 (!%p140_p2), %v1338_v3  ;;  %1217 = vmatprep.subr.bf16.mxu0 (!%p140_p2), %v1339_v4  ;;  %v1347_v12 = vld [vmem:[%s1663_s1 + $0x58] sm:$0xff] (!%p140_p2)   ;;  %v1351_v16 = vld [vmem:[%s1663_s1 + $0x60] sm:$0xff] (!%p140_p2)   ;;  %v1355_v20 = vld [vmem:[%s1663_s1 + $0x68] sm:$0xff] (!%p140_p2)  }
   0xa   : > { %1245 = vmatprep.subr.bf16.mxu1 (!%p140_p2), %v1340_v5  ;;  %v1348_v13 = vld [vmem:[%s1663_s1 + $0xd8] sm:$0xff] (!%p140_p2)   ;;  %v1352_v17 = vld [vmem:[%s1663_s1 + $0xe0] sm:$0xff] (!%p140_p2)   ;;  %v1356_v21 = vld [vmem:[%s1663_s1 + $0xe8] sm:$0xff] (!%p140_p2)  }
   0xb   : > { %v1349_v14 = vld [vmem:[%s1663_s1 + $0x18] sm:$0xff] (!%p140_p2)   ;;  %v1353_v18 = vld [vmem:[%s1663_s1 + $0x20] sm:$0xff] (!%p140_p2)   ;;  %v1357_v22 = vld [vmem:[%s1663_s1 + $0x28] sm:$0xff] (!%p140_p2)  }
   0xc   : > { %1218 = vmatpush3.bf16.msra.mxu0 (!%p140_p2), %v1341_v6  ;;  %v1350_v15 = vld [vmem:[%s1663_s1 + $0x98] sm:$0xff] (!%p140_p2)   ;;  %v1354_v19 = vld [vmem:[%s1663_s1 + $0xa0] sm:$0xff] (!%p140_p2)   ;;  %v1358_v23 = vld [vmem:[%s1663_s1 + $0xa8] sm:$0xff] (!%p140_p2)  }
   0xd   : > { %1246 = vmatpush3.bf16.msra.mxu1 %v1342_v7  ;;  %1219 = vmatprep.subr.bf16.mxu0 %v1343_v8  ;;  %s1667_s19 = smov (!%p165_p3, %s1108_s19), 7  ;;  %v1359_v24 = vld [vmem:[%s1663_s1 + $0x70] sm:$0xff]   ;;  %v1363_v28 = vld [vmem:[%s1663_s1 + $0x78] sm:$0xff]   ;;  %v1367_v40 = vld [vmem:[%s1663_s1 + $0x140] sm:$0xff]  }
   0xe   : > { %1247 = vmatprep.subr.bf16.mxu1 %v1344_v9  ;;  %v1360_v25 = vld [vmem:[%s1663_s1 + $0xf0] sm:$0xff]   ;;  %s1199_s15 = sshll.u32 %s1667_s19, 5  ;;  %v1364_v29 = vld [vmem:[%s1663_s1 + $0xf8] sm:$0xff]   ;;  %v1368_v41 = vld [vmem:[%s1663_s1 + $0x1c0] sm:$0xff]  }
   0xf   : > { %v1361_v26 = vld [vmem:[%s1663_s1 + $0x30] sm:$0xff]   ;;  %s1535_s25 = scalar_lea.vmem %s1662_s0, %s1199_s15  ;;  %v1365_v30 = vld [vmem:[%s1663_s1 + $0x38] sm:$0xff]   ;;  %v1369_v42 = vld [vmem:[%s1663_s1 + $0x100] sm:$0xff]  }
  0x10   : > { %1220 = vmatpush3.bf16.msra.mxu0 %v1345_v10  ;;  %v1362_v27 = vld [vmem:[%s1663_s1 + $0xb0] sm:$0xff]   ;;  %v1366_v31 = vld [vmem:[%s1663_s1 + $0xb8] sm:$0xff]   ;;  %v178_v32 = vld [vmem:[%s1535_s25] sm:$0xff] }
  0x11   : > { %1248 = vmatpush3.bf16.msra.mxu1 %v1346_v11  ;;  %1221 = vmatprep.subr.bf16.mxu0 %v1347_v12  ;;  %v182_v33 = vld [vmem:[%s1535_s25 + $0x20] sm:$0xff]  ;;  %v179_v34 = vld [vmem:[%s1535_s25 + $0x8] sm:$0xff]  ;;  %v1375_v48 = vld [vmem:[%s1663_s1 + $0x150] sm:$0xff]  }
  0x12   : > { %1249 = vmatprep.subr.bf16.mxu1 %v1348_v13  ;;  %v1113_v35 = vcombine.low %v178_v32, %v182_v33  ;;  %v1114_v36 = vcombine.high %v178_v32, %v182_v33  ;;  %v183_v37 = vld [vmem:[%s1535_s25 + $0x28] sm:$0xff]  ;;  %v1370_v43 = vld [vmem:[%s1663_s1 + $0x180] sm:$0xff]   ;;  %v1376_v49 = vld [vmem:[%s1663_s1 + $0x1d0] sm:$0xff]  }
  0x13   : > { %v1115_v38 = vcombine.low %v179_v34, %v183_v37  ;;  %v1116_v39 = vcombine.high %v179_v34, %v183_v37  ;;  %v1371_v44 = vld [vmem:[%s1663_s1 + $0x148] sm:$0xff]   ;;  %v1377_v50 = vld [vmem:[%s1663_s1 + $0x110] sm:$0xff]   ;;  %v1379_v52 = vld [vmem:[%s1663_s1 + $0x158] sm:$0xff]  }
  0x14   : > { %1222 = vmatpush3.bf16.msra.mxu0 %v1349_v14  ;;  %818 = vmatprep.mubr.bf16.mxu0 %v1114_v36  ;;  %v1372_v45 = vld [vmem:[%s1663_s1 + $0x1c8] sm:$0xff]   ;;  %v1378_v51 = vld [vmem:[%s1663_s1 + $0x190] sm:$0xff]   ;;  %v1380_v53 = vld [vmem:[%s1663_s1 + $0x1d8] sm:$0xff]  }
  0x15   : > { %1250 = vmatpush3.bf16.msra.mxu1 %v1350_v15  ;;  %1223 = vmatprep.subr.bf16.mxu0 %v1351_v16  ;;  %v1373_v46 = vld [vmem:[%s1663_s1 + $0x108] sm:$0xff]   ;;  %v1381_v54 = vld [vmem:[%s1663_s1 + $0x118] sm:$0xff]   ;;  %v1383_v56 = vld [vmem:[%s1663_s1 + $0x160] sm:$0xff]  }
  0x16   : > { %1251 = vmatprep.subr.bf16.mxu1 %v1352_v17  ;;  %867 = vmatprep.mubr.bf16.mxu1 %v1116_v39  ;;  %v1374_v47 = vld [vmem:[%s1663_s1 + $0x188] sm:$0xff]   ;;  %v1382_v55 = vld [vmem:[%s1663_s1 + $0x198] sm:$0xff]   ;;  %v1384_v57 = vld [vmem:[%s1663_s1 + $0x1e0] sm:$0xff]  }
  0x17   : > { %v1385_v58 = vld [vmem:[%s1663_s1 + $0x120] sm:$0xff]   ;;  %v187_v63 = vld [vmem:[%s1535_s25 + $0x48] sm:$0xff]  ;;  %v1391_v8 = vld [vmem:[%s1663_s1 + $0x170] sm:$0xff]  }
  0x18   : > { %1224 = vmatpush3.bf16.msra.mxu0 %v1353_v18  ;;  %v1386_v59 = vld [vmem:[%s1663_s1 + $0x1a0] sm:$0xff]   ;;  %v191_v0 = vld [vmem:[%s1535_s25 + $0x68] sm:$0xff]  ;;  %v1392_v9 = vld [vmem:[%s1663_s1 + $0x1f0] sm:$0xff]  }
  0x19   : > { %1252 = vmatpush3.bf16.msra.mxu1 %v1354_v19  ;;  %1225 = vmatprep.subr.bf16.mxu0 %v1355_v20  ;;  %v186_v60 = vld [vmem:[%s1535_s25 + $0x40] sm:$0xff]  ;;  %v1124_v2 = vcombine.high %v187_v63, %v191_v0  ;;  %v1387_v3 = vld [vmem:[%s1663_s1 + $0x168] sm:$0xff]   ;;  %v1123_v4 = vcombine.low %v187_v63, %v191_v0  ;;  %v1393_v10 = vld [vmem:[%s1663_s1 + $0x130] sm:$0xff]  }
  0x1a   : > { %1253 = vmatprep.subr.bf16.mxu1 %v1356_v21  ;;  %v190_v61 = vld [vmem:[%s1535_s25 + $0x60] sm:$0xff]  ;;  %v1388_v5 = vld [vmem:[%s1663_s1 + $0x1e8] sm:$0xff]   ;;  %v1394_v11 = vld [vmem:[%s1663_s1 + $0x1b0] sm:$0xff]  }
  0x1b   : > { %v1122_v62 = vcombine.high %v186_v60, %v190_v61  ;;  %v1121_v1 = vcombine.low %v186_v60, %v190_v61  ;;  %v1389_v6 = vld [vmem:[%s1663_s1 + $0x128] sm:$0xff]   ;;  %v1395_v12 = vld [vmem:[%s1663_s1 + $0x178] sm:$0xff]   ;;  %v180_v16 = vld [vmem:[%s1535_s25 + $0x10] sm:$0xff] }
  0x1c   : > { %1226 = vmatpush3.bf16.msra.mxu0 %v1357_v22  ;;  %v1390_v7 = vld [vmem:[%s1663_s1 + $0x1a8] sm:$0xff]   ;;  %v1396_v13 = vld [vmem:[%s1663_s1 + $0x1f8] sm:$0xff]   ;;  %v184_v17 = vld [vmem:[%s1535_s25 + $0x30] sm:$0xff] }
  0x1d   : > { %1254 = vmatpush3.bf16.msra.mxu1 %v1358_v23  ;;  %1227 = vmatprep.subr.bf16.mxu0 %v1359_v24  ;;  %v1397_v14 = vld [vmem:[%s1663_s1 + $0x138] sm:$0xff]   ;;  %v1117_v20 = vcombine.low %v180_v16, %v184_v17  ;;  %v1118_v21 = vcombine.high %v180_v16, %v184_v17  ;;  %v188_v24 = vld [vmem:[%s1535_s25 + $0x50] sm:$0xff] }
  0x1e   : > { %1255 = vmatprep.subr.bf16.mxu1 %v1360_v25  ;;  %v1398_v15 = vld [vmem:[%s1663_s1 + $0x1b8] sm:$0xff]   ;;  %v192_v25 = vld [vmem:[%s1535_s25 + $0x70] sm:$0xff] }
  0x1f   : > { %v181_v18 = vld [vmem:[%s1535_s25 + $0x18] sm:$0xff] }
  0x20   : > { %1228 = vmatpush3.bf16.msra.mxu0 %v1361_v26  ;;  %v185_v19 = vld [vmem:[%s1535_s25 + $0x38] sm:$0xff] }
  0x21   : > { %1256 = vmatpush3.bf16.msra.mxu1 %v1362_v27  ;;  %1229 = vmatprep.subr.bf16.mxu0 %v1363_v28  ;;  %v1119_v22 = vcombine.low %v181_v18, %v185_v19  ;;  %v1120_v23 = vcombine.high %v181_v18, %v185_v19  ;;  %v189_v26 = vld [vmem:[%s1535_s25 + $0x58] sm:$0xff]  ;;  %v1126_v27 = vcombine.high %v188_v24, %v192_v25 }
  0x22   : > { %1257 = vmatprep.subr.bf16.mxu1 %v1364_v29  ;;  %v193_v28 = vld [vmem:[%s1535_s25 + $0x78] sm:$0xff]  ;;  %s1112_s25 = sshll.u32 %s1667_s19, 2 }
  0x23   : > { %v1128_v29 = vcombine.high %v189_v26, %v193_v28  ;;  %s175_s20 = scalar_lea.vmem %s1665_s3, %s1112_s25 }
  0x24   : > { %1230 = vmatpush3.bf16.msra.mxu0 %v1365_v30  ;;  %v1125_v30 = vcombine.low %v188_v24, %v192_v25 }
  0x25   : > { %1258 = vmatpush3.bf16.msra.mxu1 %v1366_v31  ;;  %1271 = vmatprep.subr.bf16.mxu0 %v1367_v40  ;;  %v1127_v31 = vcombine.low %v189_v26, %v193_v28 }
  0x26   : > { %1299 = vmatprep.subr.bf16.mxu1 %v1368_v41 }
  0x27   : > { %819 = vmatmul.mubr.bf16.vlgmr.msra.gmra.mrb[0].mxu0 %v1113_v35 }
  0x28   : > { %868 = vmatmul.mubr.bf16.vlgmr.msra.gmra.mrb[0].mxu1 %v1115_v38  ;;  %1272 = vmatpush3.bf16.msra.mxu0 %v1369_v42 }
  0x29   : > { %1300 = vmatpush3.bf16.msra.mxu1 %v1370_v43  ;;  %1273 = vmatprep.subr.bf16.mxu0 %v1371_v44 }
  0x2a   : > { %1301 = vmatprep.subr.bf16.mxu1 %v1372_v45  ;;  %826 = vmatprep.mubr.bf16.mxu0 %v1122_v62 }
  0x2b   : > { %875 = vmatprep.mubr.bf16.mxu1 %v1124_v2 }
  0x2c   : > { %1274 = vmatpush3.bf16.msra.mxu0 %v1373_v46 }
  0x2d   : > { %1302 = vmatpush3.bf16.msra.mxu1 %v1374_v47  ;;  %1275 = vmatprep.subr.bf16.mxu0 %v1375_v48 }
  0x2e   : > { %1303 = vmatprep.subr.bf16.mxu1 %v1376_v49 }
  0x2f   : > { %827 = vmatmul.mubr.bf16.gmra.mrb[4].mxu0 %v1121_v1 }
  0x30   : > { %1276 = vmatpush3.bf16.msra.mxu0 %v1377_v50  ;;  %876 = vmatmul.mubr.bf16.gmra.mrb[4].mxu1 %v1123_v4 }
  0x31   : > { %1304 = vmatpush3.bf16.msra.mxu1 %v1378_v51  ;;  %1277 = vmatprep.subr.bf16.mxu0 %v1379_v52 }
  0x32   : > { %1305 = vmatprep.subr.bf16.mxu1 %v1380_v53  ;;  %916 = vmatprep.mubr.bf16.mxu0 %v1118_v21 }
  0x33   : > { %965 = vmatprep.mubr.bf16.mxu1 %v1120_v23 }
  0x34   : > { %1278 = vmatpush3.bf16.msra.mxu0 %v1381_v54 }
  0x35   : > { %1306 = vmatpush3.bf16.msra.mxu1 %v1382_v55  ;;  %1279 = vmatprep.subr.bf16.mxu0 %v1383_v56 }
  0x36   : > { %1307 = vmatprep.subr.bf16.mxu1 %v1384_v57 }
  0x38   : > { %1280 = vmatpush3.bf16.msra.mxu0 %v1385_v58 }
  0x39   : > { %1308 = vmatpush3.bf16.msra.mxu1 %v1386_v59  ;;  %1281 = vmatprep.subr.bf16.mxu0 %v1387_v3 }
  0x3a   : > { %1309 = vmatprep.subr.bf16.mxu1 %v1388_v5 }
  0x3c   : > { %1282 = vmatpush3.bf16.msra.mxu0 %v1389_v6 }
  0x3d   : > { %1310 = vmatpush3.bf16.msra.mxu1 %v1390_v7  ;;  %1283 = vmatprep.subr.bf16.mxu0 %v1391_v8 }
  0x3e   : > { %1311 = vmatprep.subr.bf16.mxu1 %v1392_v9 }
  0x40   : > { %1284 = vmatpush3.bf16.msra.mxu0 %v1393_v10 }
  0x41   : > { %1312 = vmatpush3.bf16.msra.mxu1 %v1394_v11  ;;  %1285 = vmatprep.subr.bf16.mxu0 %v1395_v12 }
  0x42   : > { %1313 = vmatprep.subr.bf16.mxu1 %v1396_v13 }
  0x44   : > { %1286 = vmatpush3.bf16.msra.mxu0 %v1397_v14 }
  0x45   : > { %1314 = vmatpush3.bf16.msra.mxu1 %v1398_v15 }
  0x47   : > { %917 = vmatmul.mubr.bf16.vlgmr.msra.gmra.mrb[8].mxu0 %v1117_v20 }
  0x48   : > { %966 = vmatmul.mubr.bf16.vlgmr.msra.gmra.mrb[8].mxu1 %v1119_v22  ;;  %924 = vmatprep.mubr.bf16.mxu0 %v1126_v27 }
  0x49   : > { %973 = vmatprep.mubr.bf16.mxu1 %v1128_v29 }
  0x4f   : > { %925 = vmatmul.mubr.bf16.gmra.mrb[12].mxu0 %v1125_v30 }
  0x50   : > { %974 = vmatmul.mubr.bf16.gmra.mrb[12].mxu1 %v1127_v31 }
  0xfa   : > { %v1231_v32 = vpop.f32.mrb[0].mxu0 }
  0xfb   : > { %v1259_v33 = vpop.f32.mrb[0].mxu1  ;;  %v1232_v34 = vpop.f32.mrb[1].mxu0 }
  0xfc   : > { %v1233_v35 = vadd.f32 %v1232_v34, %v1231_v32  ;;  %v1260_v36 = vpop.f32.mrb[1].mxu1  ;;  %v1234_v37 = vpop.f32.mrb[2].mxu0 }
  0xfd   : > { %v1261_v38 = vadd.f32 %v1260_v36, %v1259_v33  ;;  %v1262_v39 = vpop.f32.mrb[2].mxu1  ;;  %v1235_v40 = vpop.f32.mrb[3].mxu0 }
  0xfe   : > { %v1236_v41 = vadd.f32 %v1235_v40, %v1234_v37  ;;  %v1263_v42 = vpop.f32.mrb[3].mxu1 }
  0xff   : > { %v870_v43 = vadd.f32 %v1261_v38, %v1233_v35  ;;  %v1264_v44 = vadd.f32 %v1263_v42, %v1262_v39 }
 0x101   : > { %v873_v45 = vadd.f32 %v1264_v44, %v1236_v41 }
 0x102   : > { %v1237_v46 = vpop.f32.mrb[4].mxu0 }
 0x103   : > { %v1265_v47 = vpop.f32.mrb[4].mxu1  ;;  %v1238_v48 = vpop.f32.mrb[5].mxu0 }
 0x104   : > { %v1239_v49 = vadd.f32 %v1238_v48, %v1237_v46  ;;  %v1266_v50 = vpop.f32.mrb[5].mxu1  ;;  %v1240_v51 = vpop.f32.mrb[6].mxu0 }
 0x105   : > { %v1267_v52 = vadd.f32 %v1266_v50, %v1265_v47  ;;  %v1268_v53 = vpop.f32.mrb[6].mxu1  ;;  %v1241_v54 = vpop.f32.mrb[7].mxu0 }
 0x106   : > { %v1242_v55 = vadd.f32 %v1241_v54, %v1240_v51  ;;  %v1269_v56 = vpop.f32.mrb[7].mxu1 }
 0x107   : > { %v878_v57 = vadd.f32 %v1267_v52, %v1239_v49  ;;  %v1270_v58 = vadd.f32 %v1269_v56, %v1268_v53 }
 0x109   : > { %v881_v59 = vadd.f32 %v1270_v58, %v1242_v55 }
 0x11a   : > { %v1287_v60 = vpop.f32.mrb[8].mxu0 }
 0x11b   : > { %v1315_v61 = vpop.f32.mrb[8].mxu1  ;;  %v1288_v62 = vpop.f32.mrb[9].mxu0 }
 0x11c   : > { %v1316_v63 = vpop.f32.mrb[9].mxu1  ;;  %v1289_v0 = vadd.f32 %v1288_v62, %v1287_v60  ;;  %v1290_v2 = vpop.f32.mrb[10].mxu0 }
 0x11d   : > { %v1317_v1 = vadd.f32 %v1316_v63, %v1315_v61  ;;  %v1318_v3 = vpop.f32.mrb[10].mxu1  ;;  %v1291_v4 = vpop.f32.mrb[11].mxu0 }
 0x11e   : > { %v1319_v5 = vpop.f32.mrb[11].mxu1  ;;  %v919_v6 = vadd.f32 %v1289_v0, %v870_v43  ;;  %v1292_v7 = vadd.f32 %v1291_v4, %v1290_v2 }
 0x11f   : > { %v1320_v8 = vadd.f32 %v1319_v5, %v1318_v3 }
 0x120   : > { %v968_v9 = vadd.f32 %v1317_v1, %v919_v6  ;;  %v922_v10 = vadd.f32 %v1292_v7, %v873_v45 }
 0x122   : > { %v971_v11 = vadd.f32 %v1320_v8, %v922_v10  ;;  %v1293_v12 = vpop.f32.mrb[12].mxu0  ;;  %v992_v14 = vmul.f32 %v968_v9, %v968_v9 }
 0x123   : > { %v1321_v13 = vpop.f32.mrb[12].mxu1  ;;  %v1294_v15 = vpop.f32.mrb[13].mxu0 }
 0x124   : > { %v1322_v16 = vpop.f32.mrb[13].mxu1  ;;  %v982_v17 = vadd.f32 %v971_v11, %v968_v9  ;;  %v993_v18 = vmul.f32 %v971_v11, %v971_v11  ;;  %v1295_v19 = vadd.f32 %v1294_v15, %v1293_v12  ;;  %v1296_v21 = vpop.f32.mrb[14].mxu0 }
 0x125   : > { %v1323_v20 = vadd.f32 %v1322_v16, %v1321_v13  ;;  %v1324_v22 = vpop.f32.mrb[14].mxu1  ;;  %v1297_v23 = vpop.f32.mrb[15].mxu0 }
 0x126   : > { %v1325_v24 = vpop.f32.mrb[15].mxu1  ;;  %v996_v25 = vadd.f32 %v993_v18, %v992_v14  ;;  %v927_v26 = vadd.f32 %v1295_v19, %v878_v57  ;;  %v1298_v27 = vadd.f32 %v1297_v23, %v1296_v21 }
 0x127   : > { %v1326_v28 = vadd.f32 %v1325_v24, %v1324_v22 }
 0x128   : > { %v976_v29 = vadd.f32 %v1323_v20, %v927_v26  ;;  %v930_v30 = vadd.f32 %v1298_v27, %v881_v59 }
 0x12a   : > { %v983_v31 = vadd.f32 %v982_v17, %v976_v29  ;;  %v994_v32 = vmul.f32 %v976_v29, %v976_v29  ;;  %v979_v33 = vadd.f32 %v1326_v28, %v930_v30 }
 0x12c   : > { %v997_v34 = vadd.f32 %v996_v25, %v994_v32  ;;  %v984_v35 = vadd.f32 %v983_v31, %v979_v33  ;;  %v995_v36 = vmul.f32 %v979_v33, %v979_v33 }
 0x12e   : > { %v985_v37 = vrot.slane %v984_v35, 4  ;;  %v998_v38 = vadd.f32 %v997_v34, %v995_v36 }
 0x130   : > { %v986_v39 = vadd.f32 %v985_v37, %v984_v35  ;;  %v999_v40 = vrot.slane %v998_v38, 4 }
 0x132   : > { %v987_v41 = vrot.slane %v986_v39, 2  ;;  %v1000_v42 = vadd.f32 %v999_v40, %v998_v38 }
 0x134   : > { %v988_v43 = vadd.f32 %v987_v41, %v986_v39  ;;  %v1001_v44 = vrot.slane %v1000_v42, 2 }
 0x136   : > { %v989_v45 = vrot.slane %v988_v43, 1  ;;  %v1002_v46 = vadd.f32 %v1001_v44, %v1000_v42 }
 0x138   : > { %v990_v47 = vadd.f32 %v989_v45, %v988_v43  ;;  %v1003_v48 = vrot.slane %v1002_v46, 1 }
 0x13a   : > { %v991_v49 = vmul.f32 0.055555556, %v990_v47  ;;  %v1004_v50 = vadd.f32 %v1003_v48, %v1002_v46 }
 0x13c   : > { %v1005_v51 = vmul.f32 0.055555556, %v1004_v50  ;;  %v1006_v52 = vmul.f32 %v991_v49, %v991_v49  ;;  %v1009_v53 = vsub.f32 %v968_v9, %v991_v49  ;;  %v1010_v54 = vsub.f32 %v971_v11, %v991_v49 }
 0x13d   : > { %v1011_v55 = vsub.f32 %v976_v29, %v991_v49  ;;  %v1012_v56 = vsub.f32 %v979_v33, %v991_v49 }
 0x13e   : > { %v1007_v57 = vsub.f32 %v1005_v51, %v1006_v52 }
 0x140   : > { %v1008_v58 = vmax.f32 %v1007_v57, 0.0 }
 0x142   : > { %v1013_v59 = vadd.f32 1e-05, %v1008_v58 }
 0x144   : > { %1399 = vrsqrt.f32 %v1013_v59 }
 0x14e   : > { %v1400_v60 = vpop.eup %1399 }
 0x14f   : > { %v1015_v61 = vmul.f32 %v1400_v60, %v1009_v53  ;;  %v1016_v62 = vmul.f32 %v1400_v60, %v1010_v54  ;;  %v1017_v63 = vmul.f32 %v1400_v60, %v1011_v55  ;;  %v1018_v0 = vmul.f32 %v1400_v60, %v1012_v56 }
 0x151   : > { %v1019_v1 = vmul.f32 0.2, %v1015_v61  ;;  %v1020_v2 = vmul.f32 0.2, %v1016_v62  ;;  %v1021_v3 = vmul.f32 0.2, %v1017_v63 }
 0x152   : > { %v1022_v4 = vmul.f32 0.2, %v1018_v0 }
 0x153   : > { %v1023_v5 = vmax.f32 %v1015_v61, %v1019_v1  ;;  %v1024_v6 = vmax.f32 %v1016_v62, %v1020_v2  ;;  %v1025_v7 = vmax.f32 %v1017_v63, %v1021_v3 }
 0x154   : > { %v1026_v8 = vmax.f32 %v1018_v0, %v1022_v4 }
 0x155   : > { %v1207_v9 = vpack.c.bf16 %v1024_v6, %v1023_v5 }
 0x156   : > { %v1212_v10 = vpack.c.bf16 %v1026_v8, %v1025_v7 }
 0x157   : > { %1208 = vst [vmem:[%s175_s20] sm:$0xff] %v1207_v9  }
 0x158   : > { %1214 = vst [vmem:[%s175_s20 + $0x8] sm:$0xff] %v1212_v10  }
 0x159 PF: > { %s13_s12 = sadd.s32 1, %s1407_s12  }
 0x15a   : > { %p10_p4 = scmp.ge.s32.totalorder %s13_s12, 4  }
 0x15c   :  { %12 = sbr.rel (!%p10_p4) target bundleno = 1 (0x1), region = 62 }

// kernel: _lambda_.13
= control target key start
LH: loop header
LB: loop body
LE: loop exit
PB: predicated region body
PF: predicated region fallthrough
CT: control target
= control target key end

     0   :  { %v14_v1 = vlaneseq  ;;  %s114_s0 = inlined_call_operand.vmem [shape: f32[1,128], index: 0, kind: input, shape index: {}]   ;;  %s115_s1 = inlined_call_operand.vmem [shape: f32[1,128], index: 1, kind: input, shape index: {}]   ;;  %s116_s2 = inlined_call_operand.hbm [shape: f32[1,1], index: 2, kind: output, shape index: {}]  }
   0x1   :  { %v12_v0 = vld [vmem:[%s114_s0] sm:$0x1] }
   0x2   :  { %v13_v2 = vld [vmem:[%s115_s1] sm:$0x1]  ;;  %v17_v3 = vsub.f32 1.0, %v12_v0 }
   0x3   :  { %v32_v4 = vadd.f32 1.0, %v13_v2 }
   0x4   :  { %7 = vsyncpa [#allocation3], 0  ;;  %v15_v5 = vand.u32 127, %v14_v1  ;;  %v18_v6 = vmax.f32 %v17_v3, 0.0  ;;  %vm20_vm0 = vcmask 1040384   ;;  %s68_s19 = scalar_lea.hbm %s116_s2, 16 }
   0x5   :  { %v33_v7 = vmax.f32 %v32_v4, 0.0  ;;  %p69_p0 = scmp.ne.s32.totalorder %s116_s2, %s68_s19  ;;  %p72_p1 = scmp.lt.u32.totalorder %s68_s19, %s116_s2 }
   0x6   :  { %vm16_vm1 = vcmp.lt.s32.totalorder %v15_v5, 8 }
   0x7   :  { %v19_v8 = vsel %vm16_vm1, %v18_v6, 0.0  ;;  %v34_v9 = vsel %vm16_vm1, %v33_v7, 0.0  ;;  %p74_p2 = pnand %p72_p1, %p69_p0 }
   0x8   :  { %v21_v10 = vsel %vm20_vm0, %v19_v8, 0.0  ;;  %v35_v11 = vsel %vm20_vm0, %v34_v9, 0.0 }
   0x9   :  { %22 = vadd.xlane.f32.xlu0 %v21_v10 }
   0xd   :  { %36 = vadd.xlane.f32.xlu0 %v35_v11 }
  0x96   :  { %v23_v12 = vpop.xlane.xlu0 %22 }
  0x97   :  { %v24_v13 = vrot.slane %v23_v12, 4 }
  0x99   :  { %v25_v14 = vadd.f32 %v24_v13, %v23_v12 }
  0x9a   :  { %v37_v15 = vpop.xlane.xlu0 %36 }
  0x9b   :  { %v26_v16 = vrot.slane %v25_v14, 2  ;;  %v38_v17 = vrot.slane %v37_v15, 4 }
  0x9d   :  { %v39_v18 = vadd.f32 %v38_v17, %v37_v15  ;;  %v27_v19 = vadd.f32 %v26_v16, %v25_v14 }
  0x9f   :  { %v40_v20 = vrot.slane %v39_v18, 2  ;;  %v28_v21 = vrot.slane %v27_v19, 1 }
  0xa1   :  { %v41_v22 = vadd.f32 %v40_v20, %v39_v18  ;;  %v29_v23 = vadd.f32 %v28_v21, %v27_v19 }
  0xa3   :  { %63 = vpush %v29_v23  ;;  %v42_v24 = vrot.slane %v41_v22, 1 }
  0xa5   :  { %v43_v25 = vadd.f32 %v42_v24, %v41_v22 }
  0xa7   :  { %65 = vpush %v43_v25 }
  0xd4   :  { %s64_s0 = spop %63 }
  0xd5   :  { %s31_s1 = smul.f32 0.125, %s64_s0 }
  0xd8   :  { %s66_s13 = spop %65 }
  0xd9   :  { %s45_s14 = smul.f32 0.125, %s66_s13 }
  0xdb   :  { %s46_s15 = sadd.f32 %s45_s14, %s31_s1 }
  0xdd   :  { %s47_s16 = smul.f32 0.5, %s46_s15 }
  0xdf   :  { %49 = sst [smem:[#allocation2]] %s47_s16 }
  0xe0   :  { %77 = shalt.err (!%p74_p2)
}
  0xe1   :  { %s80_s24 = smov [#allocation2]  }
  0xe2   :  { %57 = dma.smem_to_hbm %s80_s24, 16, %s116_s2, [#allocation3]  }
  0xe3   :  { %78 = dma.done.wait [#allocation3], 16  }
  0xe4   :  { %79 = vsyncadd [#allocation3], 4294967280 }
  0xe5   :  { %61 = sfence }
  0xe6   :  { %62 = vsyncpa [#allocation3], 1 }

// kernel: _lambda_.12
= control target key start
LH: loop header
LB: loop body
LE: loop exit
PB: predicated region body
PF: predicated region fallthrough
CT: control target
= control target key end

     0   :  { %s1258_s12 = smov 0   ;;  %s1486_s0 = inlined_call_operand.vmem [shape: bf16[32,1024], index: 0, kind: input, shape index: {}]   ;;  %s1487_s1 = inlined_call_operand.vmem [shape: bf16[1024,128], index: 1, kind: input, shape index: {}]   ;;  %s1488_s2 = inlined_call_operand.vmem [shape: f32[1,128], index: 2, kind: input, shape index: {}]   ;;  %s1489_s3 = inlined_call_operand.vmem [shape: bf16[32,128], index: 3, kind: output, shape index: {}]  }
   0x1 LB: > { %s975_s13 = sadd.s32 4294967295, %s1236_s12   ;;  %p979_p0 = scmp.ge.s32.totalorder %s1236_s12, 1  ;;  %s1236_s12 = sphi %s1258_s12, %s13_s12  }
   0x2   : > { %p139_p1 = scmp.lt.s32.totalorder %s1236_s12, 3 }
   0x4   : > { %p140_p2 = pnand %p979_p0, %p139_p1 }
   0x5   : > { %v1166_v0 = vld [vmem:[%s1487_s1 + $0x40] sm:$0xff] (!%p140_p2)   ;;  %v1170_v4 = vld [vmem:[%s1487_s1 + $0x48] sm:$0xff] (!%p140_p2)   ;;  %v1174_v8 = vld [vmem:[%s1487_s1 + $0x50] sm:$0xff] (!%p140_p2)   ;;  %s980_s21 = sshll.u32 (!%p140_p2), %s975_s13, 1 }
   0x6   : > { %143 = sbr.rel (%p140_p2) target bundleno = 295 (0x127), region = 32  ;;  %v1167_v1 = vld [vmem:[%s1487_s1 + $0xc0] sm:$0xff] (!%p140_p2)   ;;  %1070 = vmatprep.subr.bf16.mxu0 (!%p140_p2), %v1166_v0  ;;  %v1171_v5 = vld [vmem:[%s1487_s1 + $0xc8] sm:$0xff] (!%p140_p2)   ;;  %v1175_v9 = vld [vmem:[%s1487_s1 + $0xd0] sm:$0xff] (!%p140_p2)   ;;  %p165_p3 = scmp.lt.s32.totalorder (!%p140_p2), %s980_s21, 3 }
   0x7   : > { %v1168_v2 = vld [vmem:[%s1487_s1] sm:$0xff] (!%p140_p2)   ;;  %1092 = vmatprep.subr.bf16.mxu1 (!%p140_p2), %v1167_v1  ;;  %v1172_v6 = vld [vmem:[%s1487_s1 + $0x8] sm:$0xff] (!%p140_p2)   ;;  %v1176_v10 = vld [vmem:[%s1487_s1 + $0x10] sm:$0xff] (!%p140_p2)  }
   0x8   : > { %v1169_v3 = vld [vmem:[%s1487_s1 + $0x80] sm:$0xff] (!%p140_p2)   ;;  %1071 = vmatpush3.bf16.msra.mxu0 (!%p140_p2), %v1168_v2  ;;  %v1173_v7 = vld [vmem:[%s1487_s1 + $0x88] sm:$0xff] (!%p140_p2)   ;;  %v1177_v11 = vld [vmem:[%s1487_s1 + $0x90] sm:$0xff] (!%p140_p2)  }
   0x9   : > { %1093 = vmatpush3.bf16.msra.mxu1 (!%p140_p2), %v1169_v3  ;;  %1072 = vmatprep.subr.bf16.mxu0 (!%p140_p2), %v1170_v4  ;;  %v1178_v12 = vld [vmem:[%s1487_s1 + $0x58] sm:$0xff] (!%p140_p2)   ;;  %v1182_v16 = vld [vmem:[%s1487_s1 + $0x60] sm:$0xff] (!%p140_p2)   ;;  %v1186_v20 = vld [vmem:[%s1487_s1 + $0x68] sm:$0xff] (!%p140_p2)  }
   0xa   : > { %1094 = vmatprep.subr.bf16.mxu1 (!%p140_p2), %v1171_v5  ;;  %v1179_v13 = vld [vmem:[%s1487_s1 + $0xd8] sm:$0xff] (!%p140_p2)   ;;  %v1183_v17 = vld [vmem:[%s1487_s1 + $0xe0] sm:$0xff] (!%p140_p2)   ;;  %v1187_v21 = vld [vmem:[%s1487_s1 + $0xe8] sm:$0xff] (!%p140_p2)  }
   0xb   : > { %v1180_v14 = vld [vmem:[%s1487_s1 + $0x18] sm:$0xff] (!%p140_p2)   ;;  %v1184_v18 = vld [vmem:[%s1487_s1 + $0x20] sm:$0xff] (!%p140_p2)   ;;  %v1188_v22 = vld [vmem:[%s1487_s1 + $0x28] sm:$0xff] (!%p140_p2)  }
   0xc   : > { %1073 = vmatpush3.bf16.msra.mxu0 (!%p140_p2), %v1172_v6  ;;  %v1181_v15 = vld [vmem:[%s1487_s1 + $0x98] sm:$0xff] (!%p140_p2)   ;;  %v1185_v19 = vld [vmem:[%s1487_s1 + $0xa0] sm:$0xff] (!%p140_p2)   ;;  %v1189_v23 = vld [vmem:[%s1487_s1 + $0xa8] sm:$0xff] (!%p140_p2)  }
   0xd   : > { %1095 = vmatpush3.bf16.msra.mxu1 %v1173_v7  ;;  %1074 = vmatprep.subr.bf16.mxu0 %v1174_v8  ;;  %s1491_s21 = smov (!%p165_p3, %s980_s21), 3  ;;  %v1190_v24 = vld [vmem:[%s1487_s1 + $0x70] sm:$0xff]   ;;  %v1194_v28 = vld [vmem:[%s1487_s1 + $0x78] sm:$0xff]   ;;  %v1198_v40 = vld [vmem:[%s1487_s1 + $0x140] sm:$0xff]  }
   0xe   : > { %1096 = vmatprep.subr.bf16.mxu1 %v1175_v9  ;;  %v1191_v25 = vld [vmem:[%s1487_s1 + $0xf0] sm:$0xff]   ;;  %s1062_s18 = sshll.u32 %s1491_s21, 5  ;;  %v1195_v29 = vld [vmem:[%s1487_s1 + $0xf8] sm:$0xff]   ;;  %v1199_v41 = vld [vmem:[%s1487_s1 + $0x1c0] sm:$0xff]  }
   0xf   : > { %v1192_v26 = vld [vmem:[%s1487_s1 + $0x30] sm:$0xff]   ;;  %s1364_s28 = scalar_lea.vmem %s1486_s0, %s1062_s18  ;;  %v1196_v30 = vld [vmem:[%s1487_s1 + $0x38] sm:$0xff]   ;;  %v1200_v42 = vld [vmem:[%s1487_s1 + $0x100] sm:$0xff]  }
  0x10   : > { %1075 = vmatpush3.bf16.msra.mxu0 %v1176_v10  ;;  %v1193_v27 = vld [vmem:[%s1487_s1 + $0xb0] sm:$0xff]   ;;  %v1197_v31 = vld [vmem:[%s1487_s1 + $0xb8] sm:$0xff]   ;;  %v178_v32 = vld [vmem:[%s1364_s28] sm:$0xff] }
  0x11   : > { %1097 = vmatpush3.bf16.msra.mxu1 %v1177_v11  ;;  %1076 = vmatprep.subr.bf16.mxu0 %v1178_v12  ;;  %v182_v33 = vld [vmem:[%s1364_s28 + $0x20] sm:$0xff]  ;;  %v179_v34 = vld [vmem:[%s1364_s28 + $0x8] sm:$0xff]  ;;  %v1206_v48 = vld [vmem:[%s1487_s1 + $0x150] sm:$0xff]  }
  0x12   : > { %1098 = vmatprep.subr.bf16.mxu1 %v1179_v13  ;;  %v986_v35 = vcombine.low %v178_v32, %v182_v33  ;;  %v987_v36 = vcombine.high %v178_v32, %v182_v33  ;;  %v183_v37 = vld [vmem:[%s1364_s28 + $0x28] sm:$0xff]  ;;  %v1201_v43 = vld [vmem:[%s1487_s1 + $0x180] sm:$0xff]   ;;  %v1207_v49 = vld [vmem:[%s1487_s1 + $0x1d0] sm:$0xff]  }
  0x13   : > { %v988_v38 = vcombine.low %v179_v34, %v183_v37  ;;  %v989_v39 = vcombine.high %v179_v34, %v183_v37  ;;  %v1202_v44 = vld [vmem:[%s1487_s1 + $0x148] sm:$0xff]   ;;  %v1208_v50 = vld [vmem:[%s1487_s1 + $0x110] sm:$0xff]   ;;  %v1210_v52 = vld [vmem:[%s1487_s1 + $0x158] sm:$0xff]  }
  0x14   : > { %1077 = vmatpush3.bf16.msra.mxu0 %v1180_v14  ;;  %777 = vmatprep.mubr.bf16.mxu0 %v987_v36  ;;  %v1203_v45 = vld [vmem:[%s1487_s1 + $0x1c8] sm:$0xff]   ;;  %v1209_v51 = vld [vmem:[%s1487_s1 + $0x190] sm:$0xff]   ;;  %v1211_v53 = vld [vmem:[%s1487_s1 + $0x1d8] sm:$0xff]  }
  0x15   : > { %1099 = vmatpush3.bf16.msra.mxu1 %v1181_v15  ;;  %1078 = vmatprep.subr.bf16.mxu0 %v1182_v16  ;;  %v1204_v46 = vld [vmem:[%s1487_s1 + $0x108] sm:$0xff]   ;;  %v1212_v54 = vld [vmem:[%s1487_s1 + $0x118] sm:$0xff]   ;;  %v1214_v56 = vld [vmem:[%s1487_s1 + $0x160] sm:$0xff]  }
  0x16   : > { %1100 = vmatprep.subr.bf16.mxu1 %v1183_v17  ;;  %818 = vmatprep.mubr.bf16.mxu1 %v989_v39  ;;  %v1205_v47 = vld [vmem:[%s1487_s1 + $0x188] sm:$0xff]   ;;  %v1213_v55 = vld [vmem:[%s1487_s1 + $0x198] sm:$0xff]   ;;  %v1215_v57 = vld [vmem:[%s1487_s1 + $0x1e0] sm:$0xff]  }
  0x17   : > { %v1216_v58 = vld [vmem:[%s1487_s1 + $0x120] sm:$0xff]   ;;  %v1218_v60 = vld [vmem:[%s1487_s1 + $0x168] sm:$0xff]   ;;  %v1222_v0 = vld [vmem:[%s1487_s1 + $0x170] sm:$0xff]  }
  0x18   : > { %1079 = vmatpush3.bf16.msra.mxu0 %v1184_v18  ;;  %v1217_v59 = vld [vmem:[%s1487_s1 + $0x1a0] sm:$0xff]   ;;  %v1219_v61 = vld [vmem:[%s1487_s1 + $0x1e8] sm:$0xff]   ;;  %v1223_v1 = vld [vmem:[%s1487_s1 + $0x1f0] sm:$0xff]  }
  0x19   : > { %1101 = vmatpush3.bf16.msra.mxu1 %v1185_v19  ;;  %1080 = vmatprep.subr.bf16.mxu0 %v1186_v20  ;;  %v1220_v62 = vld [vmem:[%s1487_s1 + $0x128] sm:$0xff]   ;;  %v1224_v2 = vld [vmem:[%s1487_s1 + $0x130] sm:$0xff]   ;;  %v1226_v4 = vld [vmem:[%s1487_s1 + $0x178] sm:$0xff]  }
  0x1a   : > { %1102 = vmatprep.subr.bf16.mxu1 %v1187_v21  ;;  %v1221_v63 = vld [vmem:[%s1487_s1 + $0x1a8] sm:$0xff]   ;;  %v1225_v3 = vld [vmem:[%s1487_s1 + $0x1b0] sm:$0xff]   ;;  %v1227_v5 = vld [vmem:[%s1487_s1 + $0x1f8] sm:$0xff]  }
  0x1b   : > { %v1228_v6 = vld [vmem:[%s1487_s1 + $0x138] sm:$0xff]   ;;  %v180_v8 = vld [vmem:[%s1364_s28 + $0x10] sm:$0xff]  ;;  %v985_v18 = vld [vmem:[%s1488_s2] ss:$0 sm:$0xff] }
  0x1c   : > { %1081 = vmatpush3.bf16.msra.mxu0 %v1188_v22  ;;  %v1229_v7 = vld [vmem:[%s1487_s1 + $0x1b8] sm:$0xff]   ;;  %v184_v9 = vld [vmem:[%s1364_s28 + $0x30] sm:$0xff] }
  0x1d   : > { %1103 = vmatpush3.bf16.msra.mxu1 %v1189_v23  ;;  %1082 = vmatprep.subr.bf16.mxu0 %v1190_v24  ;;  %v990_v10 = vcombine.low %v180_v8, %v184_v9  ;;  %v991_v11 = vcombine.high %v180_v8, %v184_v9  ;;  %v181_v12 = vld [vmem:[%s1364_s28 + $0x18] sm:$0xff] }
  0x1e   : > { %1104 = vmatprep.subr.bf16.mxu1 %v1191_v25  ;;  %v185_v13 = vld [vmem:[%s1364_s28 + $0x38] sm:$0xff]  ;;  %s984_s28 = sshll.u32 %s1491_s21, 2 }
  0x1f   : > { %v992_v14 = vcombine.low %v181_v12, %v185_v13  ;;  %v993_v15 = vcombine.high %v181_v12, %v185_v13  ;;  %s175_s29 = scalar_lea.vmem %s1489_s3, %s984_s28 }
  0x20   : > { %1083 = vmatpush3.bf16.msra.mxu0 %v1192_v26 }
  0x21   : > { %1105 = vmatpush3.bf16.msra.mxu1 %v1193_v27  ;;  %1084 = vmatprep.subr.bf16.mxu0 %v1194_v28 }
  0x22   : > { %1106 = vmatprep.subr.bf16.mxu1 %v1195_v29 }
  0x24   : > { %1085 = vmatpush3.bf16.msra.mxu0 %v1196_v30 }
  0x25   : > { %1107 = vmatpush3.bf16.msra.mxu1 %v1197_v31  ;;  %1114 = vmatprep.subr.bf16.mxu0 %v1198_v40 }
  0x26   : > { %1136 = vmatprep.subr.bf16.mxu1 %v1199_v41 }
  0x27   : > { %778 = vmatmul.mubr.bf16.vlgmr.msra.gmra.mrb[0].mxu0 %v986_v35 }
  0x28   : > { %819 = vmatmul.mubr.bf16.vlgmr.msra.gmra.mrb[0].mxu1 %v988_v38  ;;  %1115 = vmatpush3.bf16.msra.mxu0 %v1200_v42 }
  0x29   : > { %1137 = vmatpush3.bf16.msra.mxu1 %v1201_v43  ;;  %1116 = vmatprep.subr.bf16.mxu0 %v1202_v44 }
  0x2a   : > { %1138 = vmatprep.subr.bf16.mxu1 %v1203_v45  ;;  %859 = vmatprep.mubr.bf16.mxu0 %v991_v11 }
  0x2b   : > { %900 = vmatprep.mubr.bf16.mxu1 %v993_v15 }
  0x2c   : > { %1117 = vmatpush3.bf16.msra.mxu0 %v1204_v46 }
  0x2d   : > { %1139 = vmatpush3.bf16.msra.mxu1 %v1205_v47  ;;  %1118 = vmatprep.subr.bf16.mxu0 %v1206_v48 }
  0x2e   : > { %1140 = vmatprep.subr.bf16.mxu1 %v1207_v49 }
  0x30   : > { %1119 = vmatpush3.bf16.msra.mxu0 %v1208_v50 }
  0x31   : > { %1141 = vmatpush3.bf16.msra.mxu1 %v1209_v51  ;;  %1120 = vmatprep.subr.bf16.mxu0 %v1210_v52 }
  0x32   : > { %1142 = vmatprep.subr.bf16.mxu1 %v1211_v53 }
  0x34   : > { %1121 = vmatpush3.bf16.msra.mxu0 %v1212_v54 }
  0x35   : > { %1143 = vmatpush3.bf16.msra.mxu1 %v1213_v55  ;;  %1122 = vmatprep.subr.bf16.mxu0 %v1214_v56 }
  0x36   : > { %1144 = vmatprep.subr.bf16.mxu1 %v1215_v57 }
  0x38   : > { %1123 = vmatpush3.bf16.msra.mxu0 %v1216_v58 }
  0x39   : > { %1145 = vmatpush3.bf16.msra.mxu1 %v1217_v59  ;;  %1124 = vmatprep.subr.bf16.mxu0 %v1218_v60 }
  0x3a   : > { %1146 = vmatprep.subr.bf16.mxu1 %v1219_v61 }
  0x3c   : > { %1125 = vmatpush3.bf16.msra.mxu0 %v1220_v62 }
  0x3d   : > { %1147 = vmatpush3.bf16.msra.mxu1 %v1221_v63  ;;  %1126 = vmatprep.subr.bf16.mxu0 %v1222_v0 }
  0x3e   : > { %1148 = vmatprep.subr.bf16.mxu1 %v1223_v1 }
  0x40   : > { %1127 = vmatpush3.bf16.msra.mxu0 %v1224_v2 }
  0x41   : > { %1149 = vmatpush3.bf16.msra.mxu1 %v1225_v3  ;;  %1128 = vmatprep.subr.bf16.mxu0 %v1226_v4 }
  0x42   : > { %1150 = vmatprep.subr.bf16.mxu1 %v1227_v5 }
  0x44   : > { %1129 = vmatpush3.bf16.msra.mxu0 %v1228_v6 }
  0x45   : > { %1151 = vmatpush3.bf16.msra.mxu1 %v1229_v7 }
  0x47   : > { %860 = vmatmul.mubr.bf16.vlgmr.msra.gmra.mrb[4].mxu0 %v990_v10 }
  0x48   : > { %901 = vmatmul.mubr.bf16.vlgmr.msra.gmra.mrb[4].mxu1 %v992_v14 }
  0xfa   : > { %v1086_v16 = vpop.f32.mrb[0].mxu0 }
  0xfb   : > { %v1108_v17 = vpop.f32.mrb[0].mxu1  ;;  %v1087_v19 = vpop.f32.mrb[1].mxu0 }
  0xfc   : > { %v1088_v20 = vadd.f32 %v1087_v19, %v1086_v16  ;;  %v1109_v21 = vpop.f32.mrb[1].mxu1  ;;  %v1089_v22 = vpop.f32.mrb[2].mxu0 }
  0xfd   : > { %v1110_v23 = vadd.f32 %v1109_v21, %v1108_v17  ;;  %v1111_v24 = vpop.f32.mrb[2].mxu1  ;;  %v1090_v25 = vpop.f32.mrb[3].mxu0 }
  0xfe   : > { %v780_v26 = vadd.f32 %v1088_v20, %v985_v18  ;;  %v1091_v27 = vadd.f32 %v1090_v25, %v1089_v22  ;;  %v1112_v28 = vpop.f32.mrb[3].mxu1 }
  0xff   : > { %v1113_v29 = vadd.f32 %v1112_v28, %v1111_v24 }
 0x100   : > { %v821_v30 = vadd.f32 %v1110_v23, %v780_v26  ;;  %v783_v31 = vadd.f32 %v1091_v27, %v985_v18 }
 0x102   : > { %v824_v32 = vadd.f32 %v1113_v29, %v783_v31 }
 0x11a   : > { %v1130_v33 = vpop.f32.mrb[4].mxu0 }
 0x11b   : > { %v1152_v34 = vpop.f32.mrb[4].mxu1  ;;  %v1131_v35 = vpop.f32.mrb[5].mxu0 }
 0x11c   : > { %v1132_v36 = vadd.f32 %v1131_v35, %v1130_v33  ;;  %v1153_v37 = vpop.f32.mrb[5].mxu1  ;;  %v1133_v38 = vpop.f32.mrb[6].mxu0 }
 0x11d   : > { %v1154_v39 = vadd.f32 %v1153_v37, %v1152_v34  ;;  %v1155_v40 = vpop.f32.mrb[6].mxu1  ;;  %v1134_v41 = vpop.f32.mrb[7].mxu0 }
 0x11e   : > { %v862_v42 = vadd.f32 %v1132_v36, %v821_v30  ;;  %v1135_v43 = vadd.f32 %v1134_v41, %v1133_v38  ;;  %v1156_v44 = vpop.f32.mrb[7].mxu1 }
 0x11f   : > { %v1157_v45 = vadd.f32 %v1156_v44, %v1155_v40 }
 0x120   : > { %v903_v46 = vadd.f32 %v1154_v39, %v862_v42  ;;  %v865_v47 = vadd.f32 %v1135_v43, %v824_v32 }
 0x122   : > { %v906_v48 = vadd.f32 %v1157_v45, %v865_v47 }
 0x124   : > { %v1068_v49 = vpack.c.bf16 %v906_v48, %v903_v46 }
 0x126   : > { %1069 = vst [vmem:[%s175_s29] sm:$0xff] %v1068_v49  }
 0x127 PF: > { %s13_s12 = sadd.s32 1, %s1236_s12  }
 0x128   : > { %p10_p4 = scmp.ge.s32.totalorder %s13_s12, 4  }
 0x12a   :  { %12 = sbr.rel (!%p10_p4) target bundleno = 1 (0x1), region = 62 }

</bundles_post_ra>
